<compile_context>
chip_gen: v7x
topology: tpu7x:2x2x1
jax: 0.10.0
libtpu: 0.0.40
codegen_flags: <defaults>
</compile_context>

<pallas_src>
import jax
import jax.numpy as jnp
from jax.experimental import pallas as pl
from jax.experimental.pallas import tpu as pltpu

_BN_EPS = 1e-5


# ----------------------------------------------------------------------------
# In-kernel helpers
# ----------------------------------------------------------------------------
def _build_col(xp_ref, col_ref, rows, wd, c):
    """col[i*wd + j, dx*c:(dx+1)*c] = xp[i, j+dx, :] for dx in {0,1,2}.

    dx=0 and dx=1 are concatenated along the channel (lane) axis and stored as
    one 128-lane write; dx=2 lands at a 128-lane-aligned offset.
    """
    p0 = xp_ref[:, 0:wd, :]
    p1 = xp_ref[:, 1:wd + 1, :]
    p2 = xp_ref[:, 2:wd + 2, :]
    pair = jnp.concatenate([p0, p1], axis=-1)                 # (rows, wd, 2c)
    col_ref[:, 0:2 * c] = pair.reshape(rows * wd, 2 * c)
    col_ref[:, 2 * c:3 * c] = p2.reshape(rows * wd, c)


def _conv3x3(col_ref, w_ref, b_ref, rows_out, wd):
    """3 accumulating MXU matmuls (K = 3*Cin) over the dy taps; f32 result."""
    m = rows_out * wd
    acc = jnp.dot(col_ref[0:m, :], w_ref[0],
                  preferred_element_type=jnp.float32)
    acc += jnp.dot(col_ref[wd:wd + m, :], w_ref[1],
                   preferred_element_type=jnp.float32)
    acc += jnp.dot(col_ref[2 * wd:2 * wd + m, :], w_ref[2],
                   preferred_element_type=jnp.float32)
    return acc + b_ref[...]                                   # (1, C) broadcast


# ----------------------------------------------------------------------------
# Fused kernel: conv1 + BN1 + PReLU + conv2 + BN2 + residual (one row strip)
# ----------------------------------------------------------------------------
def _conv_block_kernel(x_top, x_mid, x_bot, w1_ref, b1_ref, w2_ref, b2_ref,
                       alpha_ref, o_ref, xp1, col1, xp2, col2):
    r = pl.program_id(1)
    last = pl.num_programs(1) - 1
    _, tr, wd, cin = x_mid.shape
    cmid = w1_ref.shape[-1]
    cout = o_ref.shape[-1]

    # ---- assemble width-padded x strip: rows [r*tr - 2, r*tr + tr + 2) ------
    zcol1 = jnp.zeros((tr + 4, 1, cin), xp1.dtype)
    xp1[:, 0:1, :] = zcol1                                    # left zero column
    xp1[:, wd + 1:wd + 2, :] = zcol1                          # right zero column
    xp1[2:tr + 2, 1:wd + 1, :] = x_mid[0]                     # center rows

    @pl.when(r == 0)                                          # top halo (2 rows)
    def _():
        xp1[0:2, 1:wd + 1, :] = jnp.zeros((2, wd, cin), xp1.dtype)

    @pl.when(r != 0)
    def _():
        xp1[0:2, 1:wd + 1, :] = x_top[0]

    @pl.when(r == last)                                       # bottom halo
    def _():
        xp1[tr + 2:tr + 4, 1:wd + 1, :] = jnp.zeros((2, wd, cin), xp1.dtype)

    @pl.when(r != last)
    def _():
        xp1[tr + 2:tr + 4, 1:wd + 1, :] = x_bot[0]

    # ---- conv1 + folded BN1 + PReLU over tr+2 rows (1-row h1 halo) ----------
    _build_col(xp1, col1, tr + 4, wd, cin)
    h1 = _conv3x3(col1, w1_ref, b1_ref, tr + 2, wd)           # f32
    a = alpha_ref[0]
    h1 = jnp.where(h1 >= 0.0, h1, a * h1)

    # ---- stage h1 strip (width-padded bf16); zero out-of-image halo rows ----
    zcol2 = jnp.zeros((tr + 2, 1, cmid), xp2.dtype)
    xp2[:, 0:1, :] = zcol2
    xp2[:, wd + 1:wd + 2, :] = zcol2
    xp2[:, 1:wd + 1, :] = h1.reshape(tr + 2, wd, cmid).astype(xp2.dtype)

    @pl.when(r == 0)
    def _():
        xp2[0:1, 1:wd + 1, :] = jnp.zeros((1, wd, cmid), xp2.dtype)

    @pl.when(r == last)
    def _():
        xp2[tr + 1:tr + 2, 1:wd + 1, :] = jnp.zeros((1, wd, cmid), xp2.dtype)

    # ---- conv2 + folded BN2 + residual add (residual reused from x_mid) -----
    _build_col(xp2, col2, tr + 2, wd, cmid)
    acc2 = _conv3x3(col2, w2_ref, b2_ref, tr, wd)             # f32, (tr*wd, cout)
    out = acc2.reshape(tr, wd, cout) + x_mid[0].astype(jnp.float32)
    o_ref[...] = out.reshape(1, tr, wd, cout).astype(o_ref.dtype)


# ----------------------------------------------------------------------------
# pallas_call wrapper
# ----------------------------------------------------------------------------
def _pick_tr(h, wd):
    """Largest even divisor of H keeping the matmul M dim (tr*W) <= 1024."""
    divs = [t for t in range(2, h + 1, 2) if h % t == 0]
    assert divs, "H must have an even divisor >= 2"
    good = [t for t in divs if t * wd <= 1024]
    return max(good) if good else min(divs)


def _vmem_limit_bytes(tr, wd, cin, cmid, cout):
    bf = 2  # bf16 bytes
    blocks = 2 * bf * (tr * wd * cin + 2 * 2 * wd * cin + tr * wd * cout)
    weights = 2 * bf * (9 * cin * cmid + 9 * cmid * cout)
    scratch = bf * ((tr + 4) * (wd + 2) * cin + (tr + 4) * wd * 3 * cin
                    + (tr + 2) * (wd + 2) * cmid + (tr + 2) * wd * 3 * cmid)
    est = blocks + weights + scratch
    return int(min(max(2 * est, 16 << 20), 56 << 20))


def fused_conv_block(x_bf16, w1_3d, b1_row, w2_3d, b2_row, alpha, *, tr):
    n, h, wd, cin = x_bf16.shape
    cmid = w1_3d.shape[-1]
    cout = w2_3d.shape[-1]
    nrows = h // tr
    half = tr // 2            # halo blocks are 2 rows tall
    nhalf = h // 2

    top_map = lambda b, r: (b, jnp.maximum(r * half - 1, 0), 0, 0)
    mid_map = lambda b, r: (b, r, 0, 0)
    bot_map = lambda b, r: (b, jnp.minimum(r * half + half, nhalf - 1), 0, 0)

    return pl.pallas_call(
        _conv_block_kernel,
        out_shape=jax.ShapeDtypeStruct((n, h, wd, cout), jnp.bfloat16),
        grid=(n, nrows),
        in_specs=[
            pl.BlockSpec((1, 2, wd, cin), top_map),            # 2-row top halo
            pl.BlockSpec((1, tr, wd, cin), mid_map),           # center strip
            pl.BlockSpec((1, 2, wd, cin), bot_map),            # 2-row bottom halo
            pl.BlockSpec((3, 3 * cin, cmid), lambda b, r: (0, 0, 0)),
            pl.BlockSpec((1, cmid), lambda b, r: (0, 0)),
            pl.BlockSpec((3, 3 * cmid, cout), lambda b, r: (0, 0, 0)),
            pl.BlockSpec((1, cout), lambda b, r: (0, 0)),
            pl.BlockSpec(memory_space=pltpu.MemorySpace.SMEM),  # PReLU alpha
        ],
        out_specs=pl.BlockSpec((1, tr, wd, cout), lambda b, r: (b, r, 0, 0)),
        scratch_shapes=[
            pltpu.VMEM((tr + 4, wd + 2, cin), jnp.bfloat16),      # padded x strip
            pltpu.VMEM(((tr + 4) * wd, 3 * cin), jnp.bfloat16),   # conv1 im2col(dx)
            pltpu.VMEM((tr + 2, wd + 2, cmid), jnp.bfloat16),     # padded h1 strip
            pltpu.VMEM(((tr + 2) * wd, 3 * cmid), jnp.bfloat16),  # conv2 im2col(dx)
        ],
        compiler_params=pltpu.CompilerParams(
            dimension_semantics=("parallel", "parallel"),
            vmem_limit_bytes=_vmem_limit_bytes(tr, wd, cin, cmid, cout)),
    )(x_bf16, x_bf16, x_bf16, w1_3d, b1_row, w2_3d, b2_row, alpha)


# ----------------------------------------------------------------------------
# Parameter folding + forward (matches ConvBlock.forward, BN in eval mode)
# ----------------------------------------------------------------------------
def fold_bn_into_conv(w, b, gamma, beta, mean, var, eps=_BN_EPS):
    scale = gamma / jnp.sqrt(var + eps)           # (Cout,)
    return w * scale, (b - mean) * scale + beta   # HWIO broadcasts over Cout


def conv_block_forward(x_nchw, p):
    x_nhwc = jnp.transpose(x_nchw, (0, 2, 3, 1))
    n, h, wd, c = x_nhwc.shape
    assert h % 2 == 0 and wd % 8 == 0, "requires even H and W % 8 == 0"

    w1, b1 = fold_bn_into_conv(p['w1'], p['b1'], p['g1'], p['be1'], p['m1'], p['v1'])
    w2, b2 = fold_bn_into_conv(p['w2'], p['b2'], p['g2'], p['be2'], p['m2'], p['v2'])
    cmid, cout = w1.shape[-1], w2.shape[-1]
    assert cout == c, "residual add requires output_channels == input_channels"

    w1_3d = w1.reshape(3, 3 * c, cmid).astype(jnp.bfloat16)     # (dy, dx*Cin, Cmid)
    w2_3d = w2.reshape(3, 3 * cmid, cout).astype(jnp.bfloat16)
    b1_row = b1.reshape(1, cmid).astype(jnp.float32)
    b2_row = b2.reshape(1, cout).astype(jnp.float32)
    alpha = jnp.asarray(p['alpha'], jnp.float32).reshape(1)

    tr = _pick_tr(h, wd)
    x_bf16 = x_nhwc.astype(jnp.bfloat16)      # single bf16 copy (conv + residual)
    out = fused_conv_block(x_bf16, w1_3d, b1_row, w2_3d, b2_row, alpha, tr=tr)
    return jnp.transpose(out, (0, 3, 1, 2)).astype(jnp.float32)


# ----------------------------------------------------------------------------
# Pure-JAX reference (f32) for a numerical sanity check
# ----------------------------------------------------------------------------
def reference_forward(x_nchw, p):
    x = jnp.transpose(x_nchw, (0, 2, 3, 1)).astype(jnp.float32)

    def conv(x, w, b):
        y = jax.lax.conv_general_dilated(
            x, w, window_strides=(1, 1), padding='SAME',
            dimension_numbers=('NHWC', 'HWIO', 'NHWC'))
        return y + b

    def bn(x, g, be, m, v):
        return (x - m) / jnp.sqrt(v + _BN_EPS) * g + be

    h = bn(conv(x, p['w1'], p['b1']), p['g1'], p['be1'], p['m1'], p['v1'])
    h = jnp.where(h >= 0.0, h, p['alpha'] * h)
    h = bn(conv(h, p['w2'], p['b2']), p['g2'], p['be2'], p['m2'], p['v2'])
    return jnp.transpose(x + h, (0, 3, 1, 2))


if __name__ == "__main__":
    N, C, H, W = 2, 64, 16, 16
    keys = jax.random.split(jax.random.PRNGKey(0), 12)
    x = jax.random.uniform(keys[0], (N, C, H, W), jnp.float32)
    p = {
        'w1': 0.05 * jax.random.normal(keys[1], (3, 3, C, C), jnp.float32),
        'b1': 0.05 * jax.random.normal(keys[2], (C,), jnp.float32),
        'g1': 1.0 + 0.2 * jax.random.normal(keys[3], (C,), jnp.float32),
        'be1': 0.1 * jax.random.normal(keys[4], (C,), jnp.float32),
        'm1': 0.1 * jax.random.normal(keys[5], (C,), jnp.float32),
        'v1': jax.random.uniform(keys[6], (C,), jnp.float32, 0.5, 1.5),
        'alpha': jnp.float32(0.25),                      # nn.PReLU() default
        'w2': 0.05 * jax.random.normal(keys[7], (3, 3, C, C), jnp.float32),
        'b2': 0.05 * jax.random.normal(keys[8], (C,), jnp.float32),
        'g2': 1.0 + 0.2 * jax.random.normal(keys[9], (C,), jnp.float32),
        'be2': 0.1 * jax.random.normal(keys[10], (C,), jnp.float32),
        'm2': 0.1 * jax.random.normal(keys[11], (C,), jnp.float32),
        'v2': jnp.ones((C,), jnp.float32),
    }

    out = jax.block_until_ready(jax.jit(conv_block_forward)(x, p))
    assert out.shape == (N, C, H, W), out.shape
    assert out.dtype == jnp.float32, out.dtype

    ref = jax.block_until_ready(reference_forward(x, p))
    err = float(jnp.max(jnp.abs(out - ref)))
    scale = float(jnp.max(jnp.abs(ref)))
    assert err / max(scale, 1.0) < 5e-2, f"max abs err {err} (ref scale {scale})"
    print("KERNEL_OK")
</pallas_src>

<mosaic_0001>
module attributes {stable_mosaic.version = 11 : i64} {
  func.func @_conv_block_kernel(%arg0: i32, %arg1: i32, %arg2: memref<1x2x16x64xbf16, #tpu.memory_space<vmem>>, %arg3: memref<1x16x16x64xbf16, #tpu.memory_space<vmem>>, %arg4: memref<1x2x16x64xbf16, #tpu.memory_space<vmem>>, %arg5: memref<3x192x64xbf16, #tpu.memory_space<vmem>>, %arg6: memref<1x64xf32, #tpu.memory_space<vmem>>, %arg7: memref<3x192x64xbf16, #tpu.memory_space<vmem>>, %arg8: memref<1x64xf32, #tpu.memory_space<vmem>>, %arg9: memref<1xf32, #tpu.memory_space<smem>>, %arg10: memref<1x16x16x64xbf16, #tpu.memory_space<vmem>>, %arg11: memref<20x18x64xbf16, #tpu.memory_space<vmem>>, %arg12: memref<320x192xbf16, #tpu.memory_space<vmem>>, %arg13: memref<18x18x64xbf16, #tpu.memory_space<vmem>>, %arg14: memref<288x192xbf16, #tpu.memory_space<vmem>>) attributes {dimension_semantics = [#tpu.dimension_semantics<parallel>, #tpu.dimension_semantics<parallel>], iteration_bounds = array<i64: 2, 1>, scalar_prefetch = 0 : i64, scratch_operands = 4 : i64, tpu.core_type = #tpu.core_type<tc>, window_params = [{transform_indices = @transform_0, window_bounds = array<i64: 1, 2, 16, 64>}, {transform_indices = @transform_1, window_bounds = array<i64: 1, 16, 16, 64>}, {transform_indices = @transform_2, window_bounds = array<i64: 1, 2, 16, 64>}, {pipeline_mode = #tpu.pipeline_mode<synchronous>, transform_indices = @transform_3, window_bounds = array<i64: 3, 192, 64>}, {pipeline_mode = #tpu.pipeline_mode<synchronous>, transform_indices = @transform_4, window_bounds = array<i64: 1, 64>}, {pipeline_mode = #tpu.pipeline_mode<synchronous>, transform_indices = @transform_5, window_bounds = array<i64: 3, 192, 64>}, {pipeline_mode = #tpu.pipeline_mode<synchronous>, transform_indices = @transform_6, window_bounds = array<i64: 1, 64>}, {transform_indices = @transform_7, window_bounds = array<i64: 1>}, {transform_indices = @transform_8, window_bounds = array<i64: 1, 16, 16, 64>}]} {
    %cst = arith.constant 0.000000e+00 : bf16
    %0 = vector.broadcast %cst : bf16 to vector<20x1x64xbf16>
    %c0 = arith.constant 0 : index
    %c0_0 = arith.constant 0 : index
    %c0_1 = arith.constant 0 : index
    %1 = vector.load %arg11[%c0, %c0_0, %c0_1] : memref<20x18x64xbf16, #tpu.memory_space<vmem>>, vector<20x1x64xbf16>
    tpu.vector_store %arg11[%c0, %c0_0, %c0_1], %0 {strides = array<i32>} : memref<20x18x64xbf16, #tpu.memory_space<vmem>>, vector<20x1x64xbf16>,
    %c0_2 = arith.constant 0 : index
    %c17 = arith.constant 17 : index
    %c0_3 = arith.constant 0 : index
    %2 = vector.load %arg11[%c0_2, %c17, %c0_3] : memref<20x18x64xbf16, #tpu.memory_space<vmem>>, vector<20x1x64xbf16>
    tpu.vector_store %arg11[%c0_2, %c17, %c0_3], %0 {strides = array<i32>} : memref<20x18x64xbf16, #tpu.memory_space<vmem>>, vector<20x1x64xbf16>,
    %c0_4 = arith.constant 0 : index
    %c0_5 = arith.constant 0 : index
    %c0_6 = arith.constant 0 : index
    %c0_7 = arith.constant 0 : index
    %3 = vector.load %arg3[%c0_4, %c0_5, %c0_6, %c0_7] : memref<1x16x16x64xbf16, #tpu.memory_space<vmem>>, vector<1x16x16x64xbf16>
    %4 = vector.shape_cast %3 : vector<1x16x16x64xbf16> to vector<16x16x64xbf16>
    %c2 = arith.constant 2 : index
    %c1 = arith.constant 1 : index
    %c0_8 = arith.constant 0 : index
    %5 = vector.load %arg11[%c2, %c1, %c0_8] : memref<20x18x64xbf16, #tpu.memory_space<vmem>>, vector<16x16x64xbf16>
    tpu.vector_store %arg11[%c2, %c1, %c0_8], %4 {strides = array<i32>} : memref<20x18x64xbf16, #tpu.memory_space<vmem>>, vector<16x16x64xbf16>,
    %c0_i32 = arith.constant 0 : i32
    %6 = arith.cmpi eq, %arg1, %c0_i32 : i32
    %7 = arith.extui %6 : i1 to i32
    %c0_i32_9 = arith.constant 0 : i32
    %8 = arith.cmpi ne, %7, %c0_i32_9 : i32
    scf.if %8 {
      %cst_103 = arith.constant 0.000000e+00 : bf16
      %94 = vector.broadcast %cst_103 : bf16 to vector<2x16x64xbf16>
      %c0_104 = arith.constant 0 : index
      %c1_105 = arith.constant 1 : index
      %c0_106 = arith.constant 0 : index
      %95 = vector.load %arg11[%c0_104, %c1_105, %c0_106] : memref<20x18x64xbf16, #tpu.memory_space<vmem>>, vector<2x16x64xbf16>
      tpu.vector_store %arg11[%c0_104, %c1_105, %c0_106], %94 {strides = array<i32>} : memref<20x18x64xbf16, #tpu.memory_space<vmem>>, vector<2x16x64xbf16>,
    } else {
    }
    %c0_i32_10 = arith.constant 0 : i32
    %9 = arith.cmpi ne, %arg1, %c0_i32_10 : i32
    %10 = arith.extui %9 : i1 to i32
    %c0_i32_11 = arith.constant 0 : i32
    %11 = arith.cmpi ne, %10, %c0_i32_11 : i32
    scf.if %11 {
      %c0_103 = arith.constant 0 : index
      %c0_104 = arith.constant 0 : index
      %c0_105 = arith.constant 0 : index
      %c0_106 = arith.constant 0 : index
      %94 = vector.load %arg2[%c0_103, %c0_104, %c0_105, %c0_106] : memref<1x2x16x64xbf16, #tpu.memory_space<vmem>>, vector<1x2x16x64xbf16>
      %95 = vector.shape_cast %94 : vector<1x2x16x64xbf16> to vector<2x16x64xbf16>
      %c0_107 = arith.constant 0 : index
      %c1_108 = arith.constant 1 : index
      %c0_109 = arith.constant 0 : index
      %96 = vector.load %arg11[%c0_107, %c1_108, %c0_109] : memref<20x18x64xbf16, #tpu.memory_space<vmem>>, vector<2x16x64xbf16>
      tpu.vector_store %arg11[%c0_107, %c1_108, %c0_109], %95 {strides = array<i32>} : memref<20x18x64xbf16, #tpu.memory_space<vmem>>, vector<2x16x64xbf16>,
    } else {
    }
    %c0_i32_12 = arith.constant 0 : i32
    %12 = arith.cmpi eq, %arg1, %c0_i32_12 : i32
    %13 = arith.extui %12 : i1 to i32
    %c0_i32_13 = arith.constant 0 : i32
    %14 = arith.cmpi ne, %13, %c0_i32_13 : i32
    scf.if %14 {
      %cst_103 = arith.constant 0.000000e+00 : bf16
      %94 = vector.broadcast %cst_103 : bf16 to vector<2x16x64xbf16>
      %c18 = arith.constant 18 : index
      %c1_104 = arith.constant 1 : index
      %c0_105 = arith.constant 0 : index
      %95 = vector.load %arg11[%c18, %c1_104, %c0_105] : memref<20x18x64xbf16, #tpu.memory_space<vmem>>, vector<2x16x64xbf16>
      tpu.vector_store %arg11[%c18, %c1_104, %c0_105], %94 {strides = array<i32>} : memref<20x18x64xbf16, #tpu.memory_space<vmem>>, vector<2x16x64xbf16>,
    } else {
    }
    %c0_i32_14 = arith.constant 0 : i32
    %15 = arith.cmpi ne, %arg1, %c0_i32_14 : i32
    %16 = arith.extui %15 : i1 to i32
    %c0_i32_15 = arith.constant 0 : i32
    %17 = arith.cmpi ne, %16, %c0_i32_15 : i32
    scf.if %17 {
      %c0_103 = arith.constant 0 : index
      %c0_104 = arith.constant 0 : index
      %c0_105 = arith.constant 0 : index
      %c0_106 = arith.constant 0 : index
      %94 = vector.load %arg4[%c0_103, %c0_104, %c0_105, %c0_106] : memref<1x2x16x64xbf16, #tpu.memory_space<vmem>>, vector<1x2x16x64xbf16>
      %95 = vector.shape_cast %94 : vector<1x2x16x64xbf16> to vector<2x16x64xbf16>
      %c18 = arith.constant 18 : index
      %c1_107 = arith.constant 1 : index
      %c0_108 = arith.constant 0 : index
      %96 = vector.load %arg11[%c18, %c1_107, %c0_108] : memref<20x18x64xbf16, #tpu.memory_space<vmem>>, vector<2x16x64xbf16>
      tpu.vector_store %arg11[%c18, %c1_107, %c0_108], %95 {strides = array<i32>} : memref<20x18x64xbf16, #tpu.memory_space<vmem>>, vector<2x16x64xbf16>,
    } else {
    }
    %c0_16 = arith.constant 0 : index
    %c0_17 = arith.constant 0 : index
    %c0_18 = arith.constant 0 : index
    %18 = vector.load %arg11[%c0_16, %c0_17, %c0_18] : memref<20x18x64xbf16, #tpu.memory_space<vmem>>, vector<20x16x64xbf16>
    %c0_19 = arith.constant 0 : index
    %c1_20 = arith.constant 1 : index
    %c0_21 = arith.constant 0 : index
    %19 = vector.load %arg11[%c0_19, %c1_20, %c0_21] : memref<20x18x64xbf16, #tpu.memory_space<vmem>>, vector<20x16x64xbf16>
    %c0_22 = arith.constant 0 : index
    %c2_23 = arith.constant 2 : index
    %c0_24 = arith.constant 0 : index
    %20 = vector.load %arg11[%c0_22, %c2_23, %c0_24] : memref<20x18x64xbf16, #tpu.memory_space<vmem>>, vector<20x16x64xbf16>
    %21 = tpu.concatenate %18, %19 in 2 : vector<20x16x64xbf16>, vector<20x16x64xbf16> -> vector<20x16x128xbf16>
    %22 = vector.shape_cast %21 : vector<20x16x128xbf16> to vector<320x128xbf16>
    %c0_25 = arith.constant 0 : index
    %c0_26 = arith.constant 0 : index
    %23 = vector.load %arg12[%c0_25, %c0_26] : memref<320x192xbf16, #tpu.memory_space<vmem>>, vector<320x128xbf16>
    tpu.vector_store %arg12[%c0_25, %c0_26], %22 {strides = array<i32>} : memref<320x192xbf16, #tpu.memory_space<vmem>>, vector<320x128xbf16>,
    %24 = vector.shape_cast %20 : vector<20x16x64xbf16> to vector<320x64xbf16>
    %c0_27 = arith.constant 0 : index
    %c128 = arith.constant 128 : index
    %25 = vector.load %arg12[%c0_27, %c128] : memref<320x192xbf16, #tpu.memory_space<vmem>>, vector<320x64xbf16>
    tpu.vector_store %arg12[%c0_27, %c128], %24 {strides = array<i32>} : memref<320x192xbf16, #tpu.memory_space<vmem>>, vector<320x64xbf16>,
    %c0_28 = arith.constant 0 : index
    %c0_29 = arith.constant 0 : index
    %26 = vector.load %arg12[%c0_28, %c0_29] : memref<320x192xbf16, #tpu.memory_space<vmem>>, vector<288x192xbf16>
    %c0_30 = arith.constant 0 : index
    %c0_31 = arith.constant 0 : index
    %c0_32 = arith.constant 0 : index
    %27 = vector.load %arg5[%c0_30, %c0_31, %c0_32] : memref<3x192x64xbf16, #tpu.memory_space<vmem>>, vector<1x192x64xbf16>
    %28 = vector.shape_cast %27 : vector<1x192x64xbf16> to vector<192x64xbf16>
    %cst_33 = arith.constant dense<0.000000e+00> : vector<288x64xf32>
    %29 = tpu.matmul %26, %28, %cst_33 {dimension_numbers = #tpu.dot_dimension_numbers<[1], [0], [0], [1], [0, 0, 1, 1], [], []>} : vector<288x192xbf16>, vector<192x64xbf16>, vector<288x64xf32> -> vector<288x64xf32>
    %c16 = arith.constant 16 : index
    %c0_34 = arith.constant 0 : index
    %30 = vector.load %arg12[%c16, %c0_34] : memref<320x192xbf16, #tpu.memory_space<vmem>>, vector<288x192xbf16>
    %c1_35 = arith.constant 1 : index
    %c0_36 = arith.constant 0 : index
    %c0_37 = arith.constant 0 : index
    %31 = vector.load %arg5[%c1_35, %c0_36, %c0_37] : memref<3x192x64xbf16, #tpu.memory_space<vmem>>, vector<1x192x64xbf16>
    %32 = vector.shape_cast %31 : vector<1x192x64xbf16> to vector<192x64xbf16>
    %cst_38 = arith.constant dense<0.000000e+00> : vector<288x64xf32>
    %33 = tpu.matmul %30, %32, %cst_38 {dimension_numbers = #tpu.dot_dimension_numbers<[1], [0], [0], [1], [0, 0, 1, 1], [], []>} : vector<288x192xbf16>, vector<192x64xbf16>, vector<288x64xf32> -> vector<288x64xf32>
    %34 = arith.addf %29, %33 : vector<288x64xf32>
    %c32 = arith.constant 32 : index
    %c0_39 = arith.constant 0 : index
    %35 = vector.load %arg12[%c32, %c0_39] : memref<320x192xbf16, #tpu.memory_space<vmem>>, vector<288x192xbf16>
    %c2_40 = arith.constant 2 : index
    %c0_41 = arith.constant 0 : index
    %c0_42 = arith.constant 0 : index
    %36 = vector.load %arg5[%c2_40, %c0_41, %c0_42] : memref<3x192x64xbf16, #tpu.memory_space<vmem>>, vector<1x192x64xbf16>
    %37 = vector.shape_cast %36 : vector<1x192x64xbf16> to vector<192x64xbf16>
    %cst_43 = arith.constant dense<0.000000e+00> : vector<288x64xf32>
    %38 = tpu.matmul %35, %37, %cst_43 {dimension_numbers = #tpu.dot_dimension_numbers<[1], [0], [0], [1], [0, 0, 1, 1], [], []>} : vector<288x192xbf16>, vector<192x64xbf16>, vector<288x64xf32> -> vector<288x64xf32>
    %39 = arith.addf %34, %38 : vector<288x64xf32>
    %c0_44 = arith.constant 0 : index
    %c0_45 = arith.constant 0 : index
    %40 = vector.load %arg6[%c0_44, %c0_45] : memref<1x64xf32, #tpu.memory_space<vmem>>, vector<1x64xf32>
    %41 = vector.broadcast %40 : vector<1x64xf32> to vector<288x64xf32>
    %42 = arith.addf %39, %41 : vector<288x64xf32>
    %c0_46 = arith.constant 0 : index
    %43 = memref.load %arg9[%c0_46] : memref<1xf32, #tpu.memory_space<smem>>
    %cst_47 = arith.constant 0.000000e+00 : f32
    %44 = vector.broadcast %cst_47 : f32 to vector<288x64xf32>
    %45 = arith.cmpf oge, %42, %44 : vector<288x64xf32>
    %46 = vector.broadcast %43 : f32 to vector<288x64xf32>
    %47 = arith.mulf %46, %42 : vector<288x64xf32>
    %48 = arith.select %45, %42, %47 : vector<288x64xi1>, vector<288x64xf32>
    %cst_48 = arith.constant 0.000000e+00 : bf16
    %49 = vector.broadcast %cst_48 : bf16 to vector<18x1x64xbf16>
    %c0_49 = arith.constant 0 : index
    %c0_50 = arith.constant 0 : index
    %c0_51 = arith.constant 0 : index
    %50 = vector.load %arg13[%c0_49, %c0_50, %c0_51] : memref<18x18x64xbf16, #tpu.memory_space<vmem>>, vector<18x1x64xbf16>
    tpu.vector_store %arg13[%c0_49, %c0_50, %c0_51], %49 {strides = array<i32>} : memref<18x18x64xbf16, #tpu.memory_space<vmem>>, vector<18x1x64xbf16>,
    %c0_52 = arith.constant 0 : index
    %c17_53 = arith.constant 17 : index
    %c0_54 = arith.constant 0 : index
    %51 = vector.load %arg13[%c0_52, %c17_53, %c0_54] : memref<18x18x64xbf16, #tpu.memory_space<vmem>>, vector<18x1x64xbf16>
    tpu.vector_store %arg13[%c0_52, %c17_53, %c0_54], %49 {strides = array<i32>} : memref<18x18x64xbf16, #tpu.memory_space<vmem>>, vector<18x1x64xbf16>,
    %52 = vector.shape_cast %48 : vector<288x64xf32> to vector<18x16x64xf32>
    %53 = arith.truncf %52 : vector<18x16x64xf32> to vector<18x16x64xbf16>
    %c0_55 = arith.constant 0 : index
    %c1_56 = arith.constant 1 : index
    %c0_57 = arith.constant 0 : index
    %54 = vector.load %arg13[%c0_55, %c1_56, %c0_57] : memref<18x18x64xbf16, #tpu.memory_space<vmem>>, vector<18x16x64xbf16>
    tpu.vector_store %arg13[%c0_55, %c1_56, %c0_57], %53 {strides = array<i32>} : memref<18x18x64xbf16, #tpu.memory_space<vmem>>, vector<18x16x64xbf16>,
    %c0_i32_58 = arith.constant 0 : i32
    %55 = arith.cmpi eq, %arg1, %c0_i32_58 : i32
    %56 = arith.extui %55 : i1 to i32
    %c0_i32_59 = arith.constant 0 : i32
    %57 = arith.cmpi ne, %56, %c0_i32_59 : i32
    scf.if %57 {
      %cst_103 = arith.constant 0.000000e+00 : bf16
      %94 = vector.broadcast %cst_103 : bf16 to vector<1x16x64xbf16>
      %c0_104 = arith.constant 0 : index
      %c1_105 = arith.constant 1 : index
      %c0_106 = arith.constant 0 : index
      %95 = vector.load %arg13[%c0_104, %c1_105, %c0_106] : memref<18x18x64xbf16, #tpu.memory_space<vmem>>, vector<1x16x64xbf16>
      tpu.vector_store %arg13[%c0_104, %c1_105, %c0_106], %94 {strides = array<i32>} : memref<18x18x64xbf16, #tpu.memory_space<vmem>>, vector<1x16x64xbf16>,
    } else {
    }
    %c0_i32_60 = arith.constant 0 : i32
    %58 = arith.cmpi eq, %arg1, %c0_i32_60 : i32
    %59 = arith.extui %58 : i1 to i32
    %c0_i32_61 = arith.constant 0 : i32
    %60 = arith.cmpi ne, %59, %c0_i32_61 : i32
    scf.if %60 {
      %cst_103 = arith.constant 0.000000e+00 : bf16
      %94 = vector.broadcast %cst_103 : bf16 to vector<1x16x64xbf16>
      %c17_104 = arith.constant 17 : index
      %c1_105 = arith.constant 1 : index
      %c0_106 = arith.constant 0 : index
      %95 = vector.load %arg13[%c17_104, %c1_105, %c0_106] : memref<18x18x64xbf16, #tpu.memory_space<vmem>>, vector<1x16x64xbf16>
      tpu.vector_store %arg13[%c17_104, %c1_105, %c0_106], %94 {strides = array<i32>} : memref<18x18x64xbf16, #tpu.memory_space<vmem>>, vector<1x16x64xbf16>,
    } else {
    }
    %c0_62 = arith.constant 0 : index
    %c0_63 = arith.constant 0 : index
    %c0_64 = arith.constant 0 : index
    %61 = vector.load %arg13[%c0_62, %c0_63, %c0_64] : memref<18x18x64xbf16, #tpu.memory_space<vmem>>, vector<18x16x64xbf16>
    %c0_65 = arith.constant 0 : index
    %c1_66 = arith.constant 1 : index
    %c0_67 = arith.constant 0 : index
    %62 = vector.load %arg13[%c0_65, %c1_66, %c0_67] : memref<18x18x64xbf16, #tpu.memory_space<vmem>>, vector<18x16x64xbf16>
    %c0_68 = arith.constant 0 : index
    %c2_69 = arith.constant 2 : index
    %c0_70 = arith.constant 0 : index
    %63 = vector.load %arg13[%c0_68, %c2_69, %c0_70] : memref<18x18x64xbf16, #tpu.memory_space<vmem>>, vector<18x16x64xbf16>
    %64 = tpu.concatenate %61, %62 in 2 : vector<18x16x64xbf16>, vector<18x16x64xbf16> -> vector<18x16x128xbf16>
    %65 = vector.shape_cast %64 : vector<18x16x128xbf16> to vector<288x128xbf16>
    %c0_71 = arith.constant 0 : index
    %c0_72 = arith.constant 0 : index
    %66 = vector.load %arg14[%c0_71, %c0_72] : memref<288x192xbf16, #tpu.memory_space<vmem>>, vector<288x128xbf16>
    tpu.vector_store %arg14[%c0_71, %c0_72], %65 {strides = array<i32>} : memref<288x192xbf16, #tpu.memory_space<vmem>>, vector<288x128xbf16>,
    %67 = vector.shape_cast %63 : vector<18x16x64xbf16> to vector<288x64xbf16>
    %c0_73 = arith.constant 0 : index
    %c128_74 = arith.constant 128 : index
    %68 = vector.load %arg14[%c0_73, %c128_74] : memref<288x192xbf16, #tpu.memory_space<vmem>>, vector<288x64xbf16>
    tpu.vector_store %arg14[%c0_73, %c128_74], %67 {strides = array<i32>} : memref<288x192xbf16, #tpu.memory_space<vmem>>, vector<288x64xbf16>,
    %c0_75 = arith.constant 0 : index
    %c0_76 = arith.constant 0 : index
    %69 = vector.load %arg14[%c0_75, %c0_76] : memref<288x192xbf16, #tpu.memory_space<vmem>>, vector<256x192xbf16>
    %c0_77 = arith.constant 0 : index
    %c0_78 = arith.constant 0 : index
    %c0_79 = arith.constant 0 : index
    %70 = vector.load %arg7[%c0_77, %c0_78, %c0_79] : memref<3x192x64xbf16, #tpu.memory_space<vmem>>, vector<1x192x64xbf16>
    %71 = vector.shape_cast %70 : vector<1x192x64xbf16> to vector<192x64xbf16>
    %cst_80 = arith.constant dense<0.000000e+00> : vector<256x64xf32>
    %72 = tpu.matmul %69, %71, %cst_80 {dimension_numbers = #tpu.dot_dimension_numbers<[1], [0], [0], [1], [0, 0, 1, 1], [], []>} : vector<256x192xbf16>, vector<192x64xbf16>, vector<256x64xf32> -> vector<256x64xf32>
    %c16_81 = arith.constant 16 : index
    %c0_82 = arith.constant 0 : index
    %73 = vector.load %arg14[%c16_81, %c0_82] : memref<288x192xbf16, #tpu.memory_space<vmem>>, vector<256x192xbf16>
    %c1_83 = arith.constant 1 : index
    %c0_84 = arith.constant 0 : index
    %c0_85 = arith.constant 0 : index
    %74 = vector.load %arg7[%c1_83, %c0_84, %c0_85] : memref<3x192x64xbf16, #tpu.memory_space<vmem>>, vector<1x192x64xbf16>
    %75 = vector.shape_cast %74 : vector<1x192x64xbf16> to vector<192x64xbf16>
    %cst_86 = arith.constant dense<0.000000e+00> : vector<256x64xf32>
    %76 = tpu.matmul %73, %75, %cst_86 {dimension_numbers = #tpu.dot_dimension_numbers<[1], [0], [0], [1], [0, 0, 1, 1], [], []>} : vector<256x192xbf16>, vector<192x64xbf16>, vector<256x64xf32> -> vector<256x64xf32>
    %77 = arith.addf %72, %76 : vector<256x64xf32>
    %c32_87 = arith.constant 32 : index
    %c0_88 = arith.constant 0 : index
    %78 = vector.load %arg14[%c32_87, %c0_88] : memref<288x192xbf16, #tpu.memory_space<vmem>>, vector<256x192xbf16>
    %c2_89 = arith.constant 2 : index
    %c0_90 = arith.constant 0 : index
    %c0_91 = arith.constant 0 : index
    %79 = vector.load %arg7[%c2_89, %c0_90, %c0_91] : memref<3x192x64xbf16, #tpu.memory_space<vmem>>, vector<1x192x64xbf16>
    %80 = vector.shape_cast %79 : vector<1x192x64xbf16> to vector<192x64xbf16>
    %cst_92 = arith.constant dense<0.000000e+00> : vector<256x64xf32>
    %81 = tpu.matmul %78, %80, %cst_92 {dimension_numbers = #tpu.dot_dimension_numbers<[1], [0], [0], [1], [0, 0, 1, 1], [], []>} : vector<256x192xbf16>, vector<192x64xbf16>, vector<256x64xf32> -> vector<256x64xf32>
    %82 = arith.addf %77, %81 : vector<256x64xf32>
    %c0_93 = arith.constant 0 : index
    %c0_94 = arith.constant 0 : index
    %83 = vector.load %arg8[%c0_93, %c0_94] : memref<1x64xf32, #tpu.memory_space<vmem>>, vector<1x64xf32>
    %84 = vector.broadcast %83 : vector<1x64xf32> to vector<256x64xf32>
    %85 = arith.addf %82, %84 : vector<256x64xf32>
    %86 = vector.shape_cast %85 : vector<256x64xf32> to vector<16x16x64xf32>
    %c0_95 = arith.constant 0 : index
    %c0_96 = arith.constant 0 : index
    %c0_97 = arith.constant 0 : index
    %c0_98 = arith.constant 0 : index
    %87 = vector.load %arg3[%c0_95, %c0_96, %c0_97, %c0_98] : memref<1x16x16x64xbf16, #tpu.memory_space<vmem>>, vector<1x16x16x64xbf16>
    %88 = vector.shape_cast %87 : vector<1x16x16x64xbf16> to vector<16x16x64xbf16>
    %89 = arith.extf %88 : vector<16x16x64xbf16> to vector<16x16x64xf32>
    %90 = arith.addf %86, %89 : vector<16x16x64xf32>
    %91 = vector.shape_cast %90 : vector<16x16x64xf32> to vector<1x16x16x64xf32>
    %92 = arith.truncf %91 : vector<1x16x16x64xf32> to vector<1x16x16x64xbf16>
    %c0_99 = arith.constant 0 : index
    %c0_100 = arith.constant 0 : index
    %c0_101 = arith.constant 0 : index
    %c0_102 = arith.constant 0 : index
    %93 = vector.load %arg10[%c0_99, %c0_100, %c0_101, %c0_102] : memref<1x16x16x64xbf16, #tpu.memory_space<vmem>>, vector<1x16x16x64xbf16>
    tpu.vector_store %arg10[%c0_99, %c0_100, %c0_101, %c0_102], %92 {strides = array<i32>} : memref<1x16x16x64xbf16, #tpu.memory_space<vmem>>, vector<1x16x16x64xbf16>,
    return
  }
  func.func @transform_0(%arg0: i32, %arg1: i32) -> (i32, i32, i32, i32) {
    %c8_i32 = arith.constant 8 : i32
    %0 = arith.muli %arg1, %c8_i32 : i32
    %c1_i32 = arith.constant 1 : i32
    %1 = arith.subi %0, %c1_i32 : i32
    %c0_i32 = arith.constant 0 : i32
    %2 = arith.maxsi %1, %c0_i32 : i32
    %c0_i32_0 = arith.constant 0 : i32
    %c0_i32_1 = arith.constant 0 : i32
    %c0_i32_2 = arith.constant 0 : i32
    return %arg0, %2, %c0_i32_0, %c0_i32_1 : i32, i32, i32, i32
  }
  func.func @transform_1(%arg0: i32, %arg1: i32) -> (i32, i32, i32, i32) {
    %c0_i32 = arith.constant 0 : i32
    %c0_i32_0 = arith.constant 0 : i32
    %c0_i32_1 = arith.constant 0 : i32
    return %arg0, %arg1, %c0_i32, %c0_i32_0 : i32, i32, i32, i32
  }
  func.func @transform_2(%arg0: i32, %arg1: i32) -> (i32, i32, i32, i32) {
    %c8_i32 = arith.constant 8 : i32
    %0 = arith.muli %arg1, %c8_i32 : i32
    %c8_i32_0 = arith.constant 8 : i32
    %1 = arith.addi %0, %c8_i32_0 : i32
    %c7_i32 = arith.constant 7 : i32
    %2 = arith.minsi %1, %c7_i32 : i32
    %c0_i32 = arith.constant 0 : i32
    %c0_i32_1 = arith.constant 0 : i32
    %c0_i32_2 = arith.constant 0 : i32
    return %arg0, %2, %c0_i32, %c0_i32_1 : i32, i32, i32, i32
  }
  func.func @transform_3(%arg0: i32, %arg1: i32) -> (i32, i32, i32) {
    %c0_i32 = arith.constant 0 : i32
    %c0_i32_0 = arith.constant 0 : i32
    %c0_i32_1 = arith.constant 0 : i32
    %c0_i32_2 = arith.constant 0 : i32
    return %c0_i32, %c0_i32_0, %c0_i32_1 : i32, i32, i32
  }
  func.func @transform_4(%arg0: i32, %arg1: i32) -> (i32, i32) {
    %c0_i32 = arith.constant 0 : i32
    %c0_i32_0 = arith.constant 0 : i32
    %c0_i32_1 = arith.constant 0 : i32
    return %c0_i32, %c0_i32_0 : i32, i32
  }
  func.func @transform_5(%arg0: i32, %arg1: i32) -> (i32, i32, i32) {
    %c0_i32 = arith.constant 0 : i32
    %c0_i32_0 = arith.constant 0 : i32
    %c0_i32_1 = arith.constant 0 : i32
    %c0_i32_2 = arith.constant 0 : i32
    return %c0_i32, %c0_i32_0, %c0_i32_1 : i32, i32, i32
  }
  func.func @transform_6(%arg0: i32, %arg1: i32) -> (i32, i32) {
    %c0_i32 = arith.constant 0 : i32
    %c0_i32_0 = arith.constant 0 : i32
    %c0_i32_1 = arith.constant 0 : i32
    return %c0_i32, %c0_i32_0 : i32, i32
  }
  func.func @transform_7(%arg0: i32, %arg1: i32) -> i32 {
    %c0_i32 = arith.constant 0 : i32
    %c0_i32_0 = arith.constant 0 : i32
    return %c0_i32 : i32
  }
  func.func @transform_8(%arg0: i32, %arg1: i32) -> (i32, i32, i32, i32) {
    %c0_i32 = arith.constant 0 : i32
    %c0_i32_0 = arith.constant 0 : i32
    %c0_i32_1 = arith.constant 0 : i32
    return %arg0, %arg1, %c0_i32, %c0_i32_0 : i32, i32, i32, i32
  }
}

</mosaic_0001>

<bundles_post_ra>
// kernel: conv_block_forward.1
= control target key start
LH: loop header
LB: loop body
LE: loop exit
PB: predicated region body
PF: predicated region fallthrough
CT: control target
= control target key end

     0   :  { %s7144_s27 = smov 0   ;;  %s7146_s28 = smov 0   ;;  %s9719_s0 = inlined_call_operand.vmem [shape: bf16[2,16,16,64], index: 0, kind: input, shape index: {}, may-alias: {0,1,2}]   ;;  %s9720_s1 = inlined_call_operand.vmem [shape: bf16[2,16,16,64], index: 1, kind: input, shape index: {}, may-alias: {0,1,2}]   ;;  %s9721_s2 = inlined_call_operand.vmem [shape: bf16[2,16,16,64], index: 2, kind: input, shape index: {}, may-alias: {0,1,2}]   ;;  %s9722_s3 = inlined_call_operand.vmem [shape: bf16[3,192,64], index: 3, kind: input, shape index: {}]   ;;  %s9723_s4 = inlined_call_operand.vmem [shape: f32[1,64], index: 4, kind: input, shape index: {}]   ;;  %s9724_s5 = inlined_call_operand.vmem [shape: bf16[3,192,64], index: 5, kind: input, shape index: {}]   ;;  %s9725_s6 = inlined_call_operand.vmem [shape: f32[1,64], index: 6, kind: input, shape index: {}]   ;;  %s9726_s7 = inlined_call_operand.<no memory space> [shape: f32[1], index: 7, kind: input, shape index: {}]   ;;  %s9727_s8 = inlined_call_operand.vmem [shape: bf16[2,16,16,64], index: 8, kind: output, shape index: {}]  }
   0x1   :  { %13 = sst [smem:[#allocation6]] %s9726_s7  ;;  %s7148_s29 = smov 0  }
   0x2 LB: > { %s31_s7 = sadd.s32 1, %s7088_s28  ;;  %p6202_p0 = scmp.ge.s32.totalorder %s7092_s29, 1  ;;  %s7092_s29 = sphi %s7148_s29, %s19_s29   ;;  %s7088_s28 = sphi %s7146_s28, %s9766_s28   ;;  %s7084_s27 = sphi %s7144_s27, %s9765_s27  }
   0x3   : > { %p33_p1 = scmp.ge.s32.totalorder %s31_s7, 2  ;;  %p353_p2 = scmp.lt.s32.totalorder %s7092_s29, 3 }
   0x5   : > { %s9768_s7 = smov (%p33_p1, %s31_s7), 0  ;;  %p354_p3 = pnand %p6202_p0, %p353_p2 }
   0x7   : > { %357 = sbr.rel (%p354_p3) target bundleno = 1252 (0x4e4), region = 52 }
   0xe   : > { %vm486_vm0 = vcmask 516096   ;;  %vm487_vm1 = vsmask.f32 256  ;;  %v492_v0 = vld [vmem:[#allocation2 + $0xc] sm:$0x1]  ;;  %vm966_vm4 = vcmask 519168  }
   0xf   : > { %vm7165_vm2 = vmand %vm486_vm0, %vm487_vm1  ;;  %vm549_vm3 = vsmask.f32 7938  ;;  %v554_v2 = vld [vmem:[#allocation2 + $0x14] sm:$0x1]  ;;  %v9728_v5 = vmov 0   ;;  %p445_p4 = scmp.lt.s32.totalorder %s7084_s27, 1 }
  0x10   : > { %v493_v3 = vsel %vm7165_vm2, 0, %v492_v0  ;;  %vm7172_vm5 = vmand %vm486_vm0, %vm549_vm3  ;;  %1095 = vst.msk [vmem:[#allocation2 + $0x10] sm:$0xf] %vm966_vm4, %v9728_v5  ;;  %2319 = vmatprep.subr.bf16.mxu0 %v9728_v5  ;;  %2571 = vmatprep.subr.bf16.mxu1 %v9728_v5  ;;  %v495_v7 = vld [vmem:[#allocation2 + $0x18] sm:$0x1]  ;;  %v6937_v16 = vld [vmem:[%s9722_s3 + $0x60] sm:$0xff]  }
  0x11   : > { %1088 = vst.msk [vmem:[#allocation2 + $0x4] sm:$0xf] %vm966_vm4, %v9728_v5  ;;  %1168 = vst.msk [vmem:[#allocation2 + $0xdc] sm:$0xf] %vm966_vm4, %v9728_v5  ;;  %v555_v6 = vsel %vm7172_vm5, 0, %v554_v2  ;;  %s9770_s27 = smov (!%p445_p4, %s7084_s27), 1  ;;  %2320 = vmatpush1.bf16.msra.mxu0 %v6937_v16 }
  0x12   : > { %1175 = vst.msk [vmem:[#allocation2 + $0xe8] sm:$0xf] %vm966_vm4, %v9728_v5  ;;  %494 = vst [vmem:[#allocation2 + $0xc] sm:$0x1] %v493_v3  ;;  %v557_v8 = vld [vmem:[#allocation2 + $0x20] sm:$0x1]  ;;  %2321 = vmatprep.subr.bf16.mxu0 %v9728_v5 }
  0x13   : > { %556 = vst [vmem:[#allocation2 + $0x14] sm:$0x1] %v555_v6  ;;  %v496_v9 = vsel %vm7165_vm2, 0, %v495_v7  ;;  %v558_v10 = vsel %vm7172_vm5, 0, %v557_v8  ;;  %v504_v11 = vld [vmem:[#allocation2 + $0x3c] sm:$0x1]  ;;  %vm7206_vm6 = vmand %vm966_vm4, %vm549_vm3 }
  0x14   : > { %497 = vst [vmem:[#allocation2 + $0x18] sm:$0x1] %v496_v9  ;;  %559 = vst [vmem:[#allocation2 + $0x20] sm:$0x1] %v558_v10  ;;  %v566_v12 = vld [vmem:[#allocation2 + $0x44] sm:$0x1] }
  0x15   : > { %s6706_s30 = sshll.u32 %s9770_s27, 7  ;;  %v505_v13 = vsel %vm7165_vm2, 0, %v504_v11  ;;  %v567_v14 = vsel %vm7172_vm5, 0, %v566_v12  ;;  %v510_v15 = vld [vmem:[#allocation2 + $0x54] sm:$0x1]  ;;  %v6938_v19 = vld [vmem:[%s9722_s3 + $0x68] sm:$0xff]  }
  0x16   : > { %s7215_s13 = scalar_lea.vmem %s9720_s1, %s6706_s30  ;;  %vm643_vm7 = vsmask.f32 4368  ;;  %506 = vst [vmem:[#allocation2 + $0x3c] sm:$0x1] %v505_v13  ;;  %568 = vst [vmem:[#allocation2 + $0x44] sm:$0x1] %v567_v14  ;;  %2322 = vmatpush1.bf16.msra.mxu0 %v6938_v19 }
  0x17   : > { %v511_v18 = vsel %vm7165_vm2, 0, %v510_v15  ;;  %vm1863_vm8 = vcmask 1042432   ;;  %vm1864_vm9 = vcmask 1046532   ;;  %v611_v20 = vld [vmem:[%s7215_s13] sm:$0xf]  ;;  %vm7240_vm10 = vmor %vm487_vm1, %vm643_vm7  ;;  %2323 = vmatprep.subr.bf16.mxu0 %v9728_v5  ;;  %vm1762_vm11 = vcmask 523264  }
  0x18   : > { %v612_v21 = vld [vmem:[%s7215_s13 + $0x4] sm:$0xf]  ;;  %v617_v22 = vld [vmem:[%s7215_s13 + $0x18] sm:$0xf]  ;;  %512 = vst [vmem:[#allocation2 + $0x54] sm:$0x1] %v511_v18  ;;  %vm7271_vm13 = vmor %vm1863_vm8, %vm1864_vm9 }
  0x19   : > { %v7225_v23 = vld [vmem:[#allocation2 + $0x10] sm:$0xf]  ;;  %v646_v24 = vshrl.u32 %v611_v20, 16  ;;  %v649_v25 = vshll.u32 %v611_v20, 16  ;;  %v654_v26 = vshrl.u32 %v612_v21, 16  ;;  %v657_v27 = vshll.u32 %v612_v21, 16 }
  0x1a   : > { %v572_v28 = vld [vmem:[#allocation2 + $0x5c] sm:$0x1]  ;;  %v1092_v29 = vld [vmem:[#allocation2 + $0xc] sm:$0xf]  ;;  %v1875_v30 = vrot.slane %v7225_v23, 5  ;;  %v697_v32 = vshrl.u32 %v617_v22, 16 }
  0x1b   : > { %v618_v31 = vld [vmem:[%s7215_s13 + $0x1c] sm:$0xf]  ;;  %v1093_v33 = vsel %vm7206_vm6, 0, %v1092_v29  ;;  %v1096_v34 = vld [vmem:[#allocation2 + $0x14] sm:$0x1]  ;;  %v648_v35 = vrot.slane %v646_v24, 7 }
  0x1c   : > { %v656_v36 = vrot.slane %v654_v26, 7  ;;  %v700_v37 = vshll.u32 %v617_v22, 16  ;;  %1094 = vst [vmem:[#allocation2 + $0xc] sm:$0xf] %v1093_v33  ;;  %v1097_v38 = vsel %vm7165_vm2, 0, %v1096_v34  ;;  %v7236_v39 = vrot.slane %v1875_v30, 4 }
  0x1d   : > { %v968_v41 = vld [vmem:[#allocation2 + $0x18] sm:$0xf]  ;;  %v973_v42 = vld [vmem:[#allocation2 + $0x20] sm:$0x1]  ;;  %1098 = vst [vmem:[#allocation2 + $0x14] sm:$0x1] %v1097_v38  ;;  %v651_v43 = vor.u32 %v649_v25, %v648_v35 }
  0x1e   : > { %v652_v44 = vrot.slane %v648_v35, 4  ;;  %v659_v45 = vor.u32 %v657_v27, %v656_v36  ;;  %v661_v46 = vrot.slane %v656_v36, 4  ;;  %v621_v47 = vld [vmem:[%s7215_s13 + $0x28] sm:$0xf]  ;;  %v498_v48 = vld [vmem:[#allocation2 + $0x24] sm:$0x1] }
  0x1f   : > { %v699_v49 = vrot.slane %v697_v32, 7  ;;  %v705_v50 = vshrl.u32 %v618_v31, 16  ;;  %v708_v51 = vshll.u32 %v618_v31, 16  ;;  %v573_v52 = vsel %vm7172_vm5, 0, %v572_v28  ;;  %v622_v53 = vld [vmem:[%s7215_s13 + $0x2c] sm:$0xf] }
  0x20   : > { %v660_v54 = vsel %vm7240_vm10, %v652_v44, %v659_v45  ;;  %v969_v55 = vsel %vm7206_vm6, %v651_v43, %v968_v41  ;;  %v974_v56 = vsel %vm7165_vm2, %v661_v46, %v973_v42  ;;  %v990_v57 = vld [vmem:[#allocation2 + $0x3c] sm:$0xf]  ;;  %v994_v58 = vld [vmem:[#allocation2 + $0x44] sm:$0x1]  ;;  %574 = vst [vmem:[#allocation2 + $0x5c] sm:$0x1] %v573_v52 }
  0x21   : > { %v731_v59 = vshrl.u32 %v621_v47, 16  ;;  %v6939_v60 = vld [vmem:[%s9722_s3 + $0x70] sm:$0xff]   ;;  %970 = vst [vmem:[#allocation2 + $0x18] sm:$0xf] %v969_v55  ;;  %972 = vst.msk [vmem:[#allocation2 + $0x1c] sm:$0xf] %vm966_vm4, %v660_v54  ;;  %v702_v61 = vor.u32 %v700_v37, %v699_v49 }
  0x22   : > { %975 = vst [vmem:[#allocation2 + $0x20] sm:$0x1] %v974_v56  ;;  %v703_v62 = vrot.slane %v699_v49, 4  ;;  %v707_v63 = vrot.slane %v705_v50, 7  ;;  %v734_v0 = vshll.u32 %v621_v47, 16  ;;  %v739_v6 = vshrl.u32 %v622_v53, 16  ;;  %2324 = vmatpush1.bf16.msra.mxu0 %v6939_v60 }
  0x23   : > { %v560_v2 = vld [vmem:[#allocation2 + $0x2c] sm:$0x1]  ;;  %vm1481_vm12 = vsmask.f32 7424  ;;  %v733_v3 = vrot.slane %v731_v59, 7  ;;  %v742_v7 = vshll.u32 %v622_v53, 16  ;;  %v991_v12 = vsel %vm7206_vm6, %v702_v61, %v990_v57  ;;  %2325 = vmatprep.subr.bf16.mxu0 %v9728_v5 }
  0x24   : > { %v499_v8 = vsel %vm7165_vm2, 0, %v498_v48  ;;  %v6940_v9 = vld [vmem:[%s9722_s3 + $0x78] sm:$0xff]   ;;  %v710_v10 = vor.u32 %v708_v51, %v707_v63  ;;  %v712_v11 = vrot.slane %v707_v63, 4  ;;  %v1004_v13 = vld [vmem:[#allocation2 + $0x54] sm:$0xf]  ;;  %v561_v14 = vsel %vm7172_vm5, 0, %v560_v2 }
  0x25   : > { %500 = vst [vmem:[#allocation2 + $0x24] sm:$0x1] %v499_v8  ;;  %v1243_v15 = vld [vmem:[#allocation2 + $0xc] sm:$0xf]  ;;  %992 = vst [vmem:[#allocation2 + $0x3c] sm:$0xf] %v991_v12  ;;  %v736_v19 = vor.u32 %v734_v0, %v733_v3 }
  0x26   : > { %v1302_v16 = vld [vmem:[#allocation2 + $0xc] sm:$0xe]  ;;  %v737_v20 = vrot.slane %v733_v3, 4  ;;  %v741_v21 = vrot.slane %v739_v6, 7  ;;  %562 = vst [vmem:[#allocation2 + $0x2c] sm:$0x1] %v561_v14  ;;  %v7276_v24 = vcombine.low %v1243_v15, %v7225_v23  ;;  %v711_v26 = vsel %vm7240_vm10, %v703_v62, %v710_v10  ;;  %2326 = vmatpush1.bf16.msra.mxu0 %v6940_v9 }
  0x27   : > { %v1282_v22 = vld [vmem:[#allocation2 + $0x14] sm:$0x1]  ;;  %v6252_v25 = vrot.slane %v1302_v16, 9  ;;  %v995_v27 = vsel %vm7165_vm2, %v712_v11, %v994_v58  ;;  %993 = vst.msk [vmem:[#allocation2 + $0x40] sm:$0xf] %vm966_vm4, %v711_v26  ;;  %v6943_v33 = vld [vmem:[%s9722_s3 + $0x80] sm:$0xff]   ;;  %v1005_v37 = vsel %vm7206_vm6, %v736_v19, %v1004_v13  ;;  %2327 = vmatprep.subr.bf16.mxu0 %v9728_v5 }
  0x28   : > { %v6232_v28 = vcombine.low %v1282_v22, %v1282_v22  ;;  %v1878_v29 = vrot.slane %v1282_v22, 5  ;;  %996 = vst [vmem:[#allocation2 + $0x44] sm:$0x1] %v995_v27  ;;  %v744_v31 = vor.u32 %v742_v7, %v741_v21  ;;  %v746_v32 = vrot.slane %v741_v21, 4  ;;  %v1008_v38 = vld [vmem:[#allocation2 + $0x5c] sm:$0x1] }
  0x29   : > { %v1495_v34 = vshrl.u32 %v7276_v24, 16  ;;  %v1497_v35 = vshll.u32 %v7276_v24, 16  ;;  %v1876_v36 = vsel %vm7271_vm13, %v6252_v25, %v1875_v30  ;;  %v7295_v41 = vld [vmem:[%s7215_s13 + $0x8] sm:$0xf]  ;;  %v1245_v44 = vld [vmem:[#allocation2 + $0x18] sm:$0xf] }
  0x2a   : > { %v1502_v42 = vshll.u32 %v6232_v28, 16  ;;  %v1879_v43 = vsel %vm7271_vm13, %v7236_v39, %v1878_v29  ;;  %v1246_v45 = vld [vmem:[#allocation2 + $0x1c] sm:$0xf]  ;;  %v745_v23 = vsel %vm7240_vm10, %v737_v20, %v744_v31  ;;  %1006 = vst [vmem:[#allocation2 + $0x54] sm:$0xf] %v1005_v37  ;;  %v1009_v30 = vsel %vm7165_vm2, %v746_v32, %v1008_v38  ;;  %2328 = vmatpush1.bf16.msra.mxu0 %v6943_v33  ;;  %v6944_v55 = vld [vmem:[%s9722_s3 + $0x88] sm:$0xff]  }
  0x2b   : > { %v1499_v46 = vrot.slane %v1497_v35, 1  ;;  %v6272_v47 = vcombine.low %v1876_v36, %v1879_v43  ;;  %v1283_v48 = vld [vmem:[#allocation2 + $0x20] sm:$0x1]  ;;  %v1303_v49 = vld [vmem:[#allocation2 + $0x18] sm:$0xe]  ;;  %v7305_v50 = vcombine.low %v1245_v44, %v1246_v45  ;;  %v1882_v51 = vrot.slane %v1246_v45, 5  ;;  %2329 = vmatprep.subr.bf16.mxu0 %v9728_v5 }
  0x2c   : > { %1007 = vst.msk [vmem:[#allocation2 + $0x58] sm:$0xf] %vm966_vm4, %v745_v23  ;;  %1010 = vst [vmem:[#allocation2 + $0x5c] sm:$0x1] %v1009_v30  ;;  %v1504_v39 = vrot.slane %v1502_v42, 1  ;;  %v6233_v52 = vcombine.low %v1283_v48, %v1283_v48  ;;  %v6253_v53 = vrot.slane %v1303_v49, 9 }
  0x2d   : > { %v1885_v54 = vrot.slane %v1283_v48, 5  ;;  %v1500_v56 = vor.u32 %v1499_v46, %v1495_v34  ;;  %2087 = vst.msk [vmem:[#allocation3 + $0x18] sm:$0xff] %vm1762_vm11, %v6272_v47  ;;  %v1507_v57 = vshrl.u32 %v7305_v50, 16  ;;  %v1509_v58 = vshll.u32 %v7305_v50, 16  ;;  %v1251_v60 = vld [vmem:[#allocation2 + $0x3c] sm:$0xf] }
  0x2e   : > { %v1884_v59 = vrot.slane %v1882_v51, 4  ;;  %v1514_v61 = vshll.u32 %v6233_v52, 16  ;;  %v1883_v62 = vsel %vm7271_vm13, %v6253_v53, %v1882_v51  ;;  %v1306_v63 = vld [vmem:[#allocation2 + $0x3c] sm:$0xe]  ;;  %v663_v0 = vshrl.u32 %v7295_v41, 16  ;;  %s7095_s0 = smov 64   ;;  %2330 = vmatpush1.bf16.msra.mxu0 %v6944_v55 }
  0x2f   : > { %v666_v2 = vshll.u32 %v7295_v41, 16  ;;  %v1505_v3 = vsel %vm1481_vm12, %v1500_v56, %v1504_v39  ;;  %v1511_v6 = vrot.slane %v1509_v58, 1  ;;  %v1252_v8 = vld [vmem:[#allocation2 + $0x40] sm:$0xf]  ;;  %v1286_v9 = vld [vmem:[#allocation2 + $0x44] sm:$0x1]  ;;  %2331 = vmatprep.subr.bf16.mxu0 %v9728_v5 }
  0x30   : > { %v1886_v7 = vsel %vm7271_vm13, %v1884_v59, %v1885_v54  ;;  %v6256_v10 = vrot.slane %v1306_v63, 9  ;;  %1724 = vrot.lane.b32.xlu0 %v1505_v3, %s7095_s0  ;;  %v1516_v11 = vrot.slane %v1514_v61, 1  ;;  %v7323_v13 = vcombine.low %v1251_v60, %v1252_v8  ;;  %v6945_v15 = vld [vmem:[%s9722_s3 + $0x90] sm:$0xff]   ;;  %v6951_v36 = vld [vmem:[%s9722_s3] sm:$0xff]   ;;  %v614_v44 = vld [vmem:[%s7215_s13 + $0xc] sm:$0xf] }
  0x31   : > { %v6273_v12 = vcombine.low %v1883_v62, %v1886_v7  ;;  %v6236_v14 = vcombine.low %v1286_v9, %v1286_v9  ;;  %v1512_v16 = vor.u32 %v1511_v6, %v1507_v57  ;;  %v1903_v19 = vrot.slane %v1252_v8, 5  ;;  %v1255_v21 = vld [vmem:[#allocation2 + $0x54] sm:$0xf]  ;;  %v6946_v45 = vld [vmem:[%s9722_s3 + $0x98] sm:$0xff]   ;;  %v516_v48 = vld [vmem:[#allocation2 + $0x6c] sm:$0x1]  ;;  %2572 = vmatpush1.bf16.msra.mxu1 %v6951_v36 }
  0x32   : > { %v1906_v20 = vrot.slane %v1286_v9, 5  ;;  %v1308_v22 = vld [vmem:[#allocation2 + $0x54] sm:$0xe]  ;;  %v1543_v25 = vshrl.u32 %v7323_v13, 16  ;;  %v1545_v26 = vshll.u32 %v7323_v13, 16  ;;  %2332 = vmatpush1.bf16.msra.mxu0 %v6945_v15  ;;  %2573 = vmatprep.subr.bf16.mxu1 %v9728_v5  ;;  %v6953_v55 = vld [vmem:[%s9722_s3 + $0x8] sm:$0xff]  }
  0x33   : > { %2088 = vst.msk [vmem:[#allocation3 + $0x28] sm:$0xff] %vm1762_vm11, %v6273_v12  ;;  %v1550_v27 = vshll.u32 %v6236_v14, 16  ;;  %v1256_v28 = vld [vmem:[#allocation2 + $0x58] sm:$0xf]  ;;  %v6258_v29 = vrot.slane %v1308_v22, 9  ;;  %v1517_v31 = vsel %vm1481_vm12, %v1512_v16, %v1516_v11  ;;  %v1904_v32 = vsel %vm7271_vm13, %v6256_v10, %v1903_v19  ;;  %2333 = vmatprep.subr.bf16.mxu0 %v9728_v5  ;;  %v6949_v7 = vld [vmem:[%s9722_s3 + $0xa0] sm:$0xff]  }
  0x34   : > { %v1905_v33 = vrot.slane %v1903_v19, 4  ;;  %v1288_v34 = vld [vmem:[#allocation2 + $0x5c] sm:$0x1]  ;;  %v7335_v35 = vcombine.low %v1255_v21, %v1256_v28  ;;  %1726 = vrot.lane.b32.xlu0 %v1517_v31, %s7095_s0  ;;  %v1547_v37 = vrot.slane %v1545_v26, 1  ;;  %v1917_v43 = vrot.slane %v1256_v28, 5  ;;  %v2109_v14 = vld [vmem:[#allocation3 + $0x18] sm:$0xff] }
  0x35   : > { %v1552_v38 = vrot.slane %v1550_v27, 1  ;;  %v6238_v42 = vcombine.low %v1288_v34, %v1288_v34  ;;  %v1920_v47 = vrot.slane %v1288_v34, 5  ;;  %v578_v53 = vld [vmem:[#allocation2 + $0x74] sm:$0x1]  ;;  %v625_v54 = vld [vmem:[%s7215_s13 + $0x38] sm:$0xf]  ;;  %2574 = vmatpush1.bf16.msra.mxu1 %v6953_v55  ;;  %6327 = vmatprep.mubr.msk.bf16.mxu0 %vm1762_vm11, %v2109_v14 }
  0x36   : > { %v1907_v23 = vsel %vm7271_vm13, %v1905_v33, %v1906_v20  ;;  %v1567_v30 = vshrl.u32 %v7335_v35, 16  ;;  %v1569_v46 = vshll.u32 %v7335_v35, 16  ;;  %v1548_v49 = vor.u32 %v1547_v37, %v1543_v25  ;;  %v7358_v60 = vld [vmem:[%s7215_s13 + $0x3c] sm:$0xf]  ;;  %v976_v3 = vld [vmem:[#allocation2 + $0x24] sm:$0xf]  ;;  %2334 = vmatpush1.bf16.msra.mxu0 %v6946_v45  ;;  %2575 = vmatprep.subr.bf16.mxu1 %v9728_v5 }
  0x37   : > { %v6276_v51 = vcombine.low %v1904_v32, %v1907_v23  ;;  %v1574_v39 = vshll.u32 %v6238_v42, 16  ;;  %v1918_v52 = vsel %vm7271_vm13, %v6258_v29, %v1917_v43  ;;  %v1919_v57 = vrot.slane %v1917_v43, 4  ;;  %v522_v11 = vld [vmem:[#allocation2 + $0x84] sm:$0x1]  ;;  %v584_v12 = vld [vmem:[#allocation2 + $0x8c] sm:$0x1]  ;;  %2335 = vmatprep.subr.bf16.mxu0 %v9728_v5 }
  0x38   : > { %v1571_v56 = vrot.slane %v1569_v46, 1  ;;  %v665_v58 = vrot.slane %v663_v0, 7  ;;  %v671_v59 = vshrl.u32 %v614_v44, 16  ;;  %v1553_v61 = vsel %vm1481_vm12, %v1548_v49, %v1552_v38  ;;  %v629_v21 = vld [vmem:[%s7215_s13 + $0x48] sm:$0xf]  ;;  %v6957_v41 = vld [vmem:[%s9722_s3 + $0x10] sm:$0xff]  }
  0x39   : > { %2091 = vst.msk [vmem:[#allocation3 + $0x58] sm:$0xff] %vm1762_vm11, %v6276_v51  ;;  %v1576_v62 = vrot.slane %v1574_v39, 1  ;;  %v674_v63 = vshll.u32 %v614_v44, 16  ;;  %v517_v6 = vsel %vm7165_vm2, 0, %v516_v48  ;;  %1732 = vrot.lane.b32.xlu0 %v1553_v61, %s7095_s0  ;;  %v1921_v8 = vsel %vm7271_vm13, %v1919_v57, %v1920_v47  ;;  %v980_v25 = vld [vmem:[#allocation2 + $0x2c] sm:$0x1]  ;;  %2576 = vmatpush1.bf16.msra.mxu1 %v6957_v41 }
  0x3a   : > { %v1572_v0 = vor.u32 %v1571_v56, %v1567_v30  ;;  %v668_v9 = vor.u32 %v666_v2, %v665_v58  ;;  %v669_v10 = vrot.slane %v665_v58, 4  ;;  %518 = vst [vmem:[#allocation2 + $0x6c] sm:$0x1] %v517_v6  ;;  %v6278_v15 = vcombine.low %v1918_v52, %v1921_v8  ;;  %v7385_v28 = vld [vmem:[%s7215_s13 + $0x4c] sm:$0xf]  ;;  %2336 = vmatpush1.bf16.msra.mxu0 %v6949_v7  ;;  %v6959_v49 = vld [vmem:[%s9722_s3 + $0x18] sm:$0xff]  }
  0x3b   : > { %v673_v16 = vrot.slane %v671_v59, 7  ;;  %v579_v19 = vsel %vm7172_vm5, 0, %v578_v53  ;;  %v765_v20 = vshrl.u32 %v625_v54, 16  ;;  %v768_v26 = vshll.u32 %v625_v54, 16  ;;  %v501_v34 = vld [vmem:[#allocation2 + $0x30] sm:$0x1]  ;;  %2337 = vmatprep.subr.bf16.mxu0 %v9728_v5  ;;  %2577 = vmatprep.subr.bf16.mxu1 %v9728_v5 }
  0x3c   : > { %v1577_v2 = vsel %vm1481_vm12, %v1572_v0, %v1576_v62  ;;  %v977_v22 = vsel %vm7206_vm6, %v668_v9, %v976_v3  ;;  %580 = vst [vmem:[#allocation2 + $0x74] sm:$0x1] %v579_v19  ;;  %v773_v27 = vshrl.u32 %v7358_v60, 16  ;;  %2093 = vst.msk [vmem:[#allocation3 + $0x78] sm:$0xff] %vm1762_vm11, %v6278_v15  ;;  %v776_v33 = vshll.u32 %v7358_v60, 16  ;;  %v6950_v36 = vld [vmem:[%s9722_s3 + $0xa8] sm:$0xff]  }
  0x3d   : > { %v676_v29 = vor.u32 %v674_v63, %v673_v16  ;;  %v678_v31 = vrot.slane %v673_v16, 4  ;;  %978 = vst [vmem:[#allocation2 + $0x24] sm:$0xf] %v977_v22  ;;  %v767_v32 = vrot.slane %v765_v20, 7  ;;  %1736 = vrot.lane.b32.xlu0 %v1577_v2, %s7095_s0  ;;  %v523_v38 = vsel %vm7165_vm2, 0, %v522_v11  ;;  %v6952_v55 = vld [vmem:[%s9722_s3 + $0xb0] sm:$0xff]   ;;  %2578 = vmatpush1.bf16.msra.mxu1 %v6959_v49 }
  0x3e   : > { %v775_v37 = vrot.slane %v773_v27, 7  ;;  %v585_v42 = vsel %vm7172_vm5, 0, %v584_v12  ;;  %v799_v43 = vshrl.u32 %v629_v21, 16  ;;  %v563_v44 = vld [vmem:[#allocation2 + $0x38] sm:$0x1]  ;;  %v802_v53 = vshll.u32 %v629_v21, 16  ;;  %2338 = vmatpush1.bf16.msra.mxu0 %v6950_v36  ;;  %2579 = vmatprep.subr.bf16.mxu1 %v9728_v5 }
  0x3f   : > { %v677_v45 = vsel %vm7240_vm10, %v669_v10, %v676_v29  ;;  %v981_v23 = vsel %vm7165_vm2, %v678_v31, %v980_v25  ;;  %v770_v30 = vor.u32 %v768_v26, %v767_v32  ;;  %v771_v46 = vrot.slane %v767_v32, 4  ;;  %524 = vst [vmem:[#allocation2 + $0x84] sm:$0x1] %v523_v38  ;;  %586 = vst [vmem:[#allocation2 + $0x8c] sm:$0x1] %v585_v42  ;;  %v6960_v7 = vld [vmem:[%s9722_s3 + $0x20] sm:$0xff]  }
  0x40   : > { %v615_v47 = vld [vmem:[%s7215_s13 + $0x10] sm:$0xf]  ;;  %v7405_v48 = vld [vmem:[%s7215_s13 + $0x14] sm:$0xf]  ;;  %979 = vst.msk [vmem:[#allocation2 + $0x28] sm:$0xf] %vm966_vm4, %v677_v45  ;;  %v778_v51 = vor.u32 %v776_v33, %v775_v37  ;;  %2339 = vmatprep.subr.bf16.mxu0 %v9728_v5 }
  0x41   : > { %982 = vst [vmem:[#allocation2 + $0x2c] sm:$0x1] %v981_v23  ;;  %v780_v39 = vrot.slane %v775_v37, 4  ;;  %v801_v52 = vrot.slane %v799_v43, 7  ;;  %v528_v54 = vld [vmem:[#allocation2 + $0x9c] sm:$0x1]  ;;  %2580 = vmatpush1.bf16.msra.mxu1 %v6960_v7 }
  0x42   : > { %v1018_v56 = vld [vmem:[#allocation2 + $0x6c] sm:$0xf]  ;;  %v807_v57 = vshrl.u32 %v7385_v28, 16  ;;  %v810_v58 = vshll.u32 %v7385_v28, 16  ;;  %v502_v59 = vsel %vm7165_vm2, 0, %v501_v34  ;;  %v564_v60 = vsel %vm7172_vm5, 0, %v563_v44  ;;  %2340 = vmatpush1.bf16.msra.mxu0 %v6952_v55  ;;  %2581 = vmatprep.subr.bf16.mxu1 %v9728_v5 }
  0x43   : > { %v779_v61 = vsel %vm7240_vm10, %v771_v46, %v778_v51  ;;  %v1019_v62 = vsel %vm7206_vm6, %v770_v30, %v1018_v56  ;;  %v804_v63 = vor.u32 %v802_v53, %v801_v52  ;;  %v805_v3 = vrot.slane %v801_v52, 4  ;;  %503 = vst [vmem:[#allocation2 + $0x30] sm:$0x1] %v502_v59  ;;  %565 = vst [vmem:[#allocation2 + $0x38] sm:$0x1] %v564_v60  ;;  %v6954_v22 = vld [vmem:[%s9722_s3 + $0xb8] sm:$0xff]  }
  0x44   : > { %v590_v6 = vld [vmem:[#allocation2 + $0xa4] sm:$0x1]  ;;  %1020 = vst [vmem:[#allocation2 + $0x6c] sm:$0xf] %v1019_v62  ;;  %1021 = vst.msk [vmem:[#allocation2 + $0x70] sm:$0xf] %vm966_vm4, %v779_v61  ;;  %2341 = vmatprep.subr.bf16.mxu0 %v9728_v5 }
  0x45   : > { %v1022_v0 = vld [vmem:[#allocation2 + $0x74] sm:$0x1]  ;;  %v809_v8 = vrot.slane %v807_v57, 7  ;;  %v680_v9 = vshrl.u32 %v615_v47, 16  ;;  %v683_v10 = vshll.u32 %v615_v47, 16  ;;  %v688_v11 = vshrl.u32 %v7405_v48, 16 }
  0x46   : > { %v1304_v12 = vld [vmem:[#allocation2 + $0x24] sm:$0xe]  ;;  %v1023_v14 = vsel %vm7165_vm2, %v780_v39, %v1022_v0  ;;  %v691_v15 = vshll.u32 %v7405_v48, 16  ;;  %v529_v16 = vsel %vm7165_vm2, 0, %v528_v54  ;;  %v1036_v26 = vld [vmem:[#allocation2 + $0x8c] sm:$0x1]  ;;  %2342 = vmatpush1.bf16.msra.mxu0 %v6954_v22 }
  0x47   : > { %v1247_v19 = vld [vmem:[#allocation2 + $0x24] sm:$0xf]  ;;  %v6254_v20 = vrot.slane %v1304_v12, 9  ;;  %1024 = vst [vmem:[#allocation2 + $0x74] sm:$0x1] %v1023_v14  ;;  %v812_v21 = vor.u32 %v810_v58, %v809_v8  ;;  %v814_v41 = vrot.slane %v809_v8, 4  ;;  %2935 = vmatprep.subr.bf16.mxu0 %v9728_v5 }
  0x48   : > { %v682_v2 = vrot.slane %v680_v9, 7  ;;  %530 = vst [vmem:[#allocation2 + $0x9c] sm:$0x1] %v529_v16  ;;  %v1032_v25 = vld [vmem:[#allocation2 + $0x84] sm:$0xf]  ;;  %v690_v27 = vrot.slane %v688_v11, 7 }
  0x49   : > { %v591_v28 = vsel %vm7172_vm5, 0, %v590_v6  ;;  %v1248_v29 = vld [vmem:[#allocation2 + $0x28] sm:$0xf]  ;;  %v1284_v31 = vld [vmem:[#allocation2 + $0x2c] sm:$0x1]  ;;  %v813_v32 = vsel %vm7240_vm10, %v805_v3, %v812_v21  ;;  %v1033_v33 = vsel %vm7206_vm6, %v804_v63, %v1032_v25  ;;  %v1037_v34 = vsel %vm7165_vm2, %v814_v41, %v1036_v26  ;;  %s3191_s24 = sld [smem:[#allocation6]] }
  0x4a   : > { %v685_v36 = vor.u32 %v683_v10, %v682_v2  ;;  %592 = vst [vmem:[#allocation2 + $0xa4] sm:$0x1] %v591_v28  ;;  %v7449_v37 = vcombine.low %v1247_v19, %v1248_v29  ;;  %v6234_v38 = vcombine.low %v1284_v31, %v1284_v31  ;;  %v1889_v42 = vrot.slane %v1248_v29, 5  ;;  %1034 = vst [vmem:[#allocation2 + $0x84] sm:$0xf] %v1033_v33  ;;  %v6961_v58 = vld [vmem:[%s9722_s3 + $0x28] sm:$0xff]  }
  0x4b   : > { %v1892_v43 = vrot.slane %v1284_v31, 5  ;;  %1035 = vst.msk [vmem:[#allocation2 + $0x88] sm:$0xf] %vm966_vm4, %v813_v32  ;;  %1038 = vst [vmem:[#allocation2 + $0x8c] sm:$0x1] %v1037_v34  ;;  %v686_v44 = vrot.slane %v682_v2, 4  ;;  %v693_v45 = vor.u32 %v691_v15, %v690_v27  ;;  %2582 = vmatpush1.bf16.msra.mxu1 %v6961_v58 }
  0x4c   : > { %v695_v23 = vrot.slane %v690_v27, 4  ;;  %v983_v30 = vld [vmem:[#allocation2 + $0x30] sm:$0xf]  ;;  %v987_v46 = vld [vmem:[#allocation2 + $0x38] sm:$0x1]  ;;  %v1519_v47 = vshrl.u32 %v7449_v37, 16  ;;  %v1890_v51 = vsel %vm7271_vm13, %v6254_v20, %v1889_v42  ;;  %2583 = vmatprep.subr.bf16.mxu1 %v9728_v5 }
  0x4d   : > { %v1521_v48 = vshll.u32 %v7449_v37, 16  ;;  %v1526_v49 = vshll.u32 %v6234_v38, 16  ;;  %v1259_v39 = vld [vmem:[#allocation2 + $0x6c] sm:$0xf]  ;;  %v1891_v52 = vrot.slane %v1889_v42, 4  ;;  %v694_v55 = vsel %vm7240_vm10, %v686_v44, %v693_v45 }
  0x4e   : > { %v1260_v53 = vld [vmem:[#allocation2 + $0x70] sm:$0xf]  ;;  %v1310_v54 = vld [vmem:[#allocation2 + $0x6c] sm:$0xe]  ;;  %v984_v56 = vsel %vm7206_vm6, %v685_v36, %v983_v30  ;;  %v988_v57 = vsel %vm7165_vm2, %v695_v23, %v987_v46  ;;  %v1290_v61 = vld [vmem:[#allocation2 + $0x74] sm:$0x1] }
  0x4f   : > { %v1523_v59 = vrot.slane %v1521_v48, 1  ;;  %v1528_v60 = vrot.slane %v1526_v49, 1  ;;  %v7467_v62 = vcombine.low %v1259_v39, %v1260_v53  ;;  %v6260_v63 = vrot.slane %v1310_v54, 9  ;;  %985 = vst [vmem:[#allocation2 + $0x30] sm:$0xf] %v984_v56  ;;  %v6965_v54 = vld [vmem:[%s9722_s3 + $0x30] sm:$0xff]  }
  0x50   : > { %986 = vst.msk [vmem:[#allocation2 + $0x34] sm:$0xf] %vm966_vm4, %v694_v55  ;;  %989 = vst [vmem:[#allocation2 + $0x38] sm:$0x1] %v988_v57  ;;  %v1893_v3 = vsel %vm7271_vm13, %v1891_v52, %v1892_v43  ;;  %v6240_v6 = vcombine.low %v1290_v61, %v1290_v61  ;;  %v1931_v7 = vrot.slane %v1260_v53, 5  ;;  %v1934_v0 = vrot.slane %v1290_v61, 5  ;;  %2584 = vmatpush1.bf16.msra.mxu1 %v6965_v54 }
  0x51   : > { %v1524_v8 = vor.u32 %v1523_v59, %v1519_v47  ;;  %v6274_v9 = vcombine.low %v1890_v51, %v1893_v3  ;;  %v1591_v10 = vshrl.u32 %v7467_v62, 16  ;;  %v1593_v11 = vshll.u32 %v7467_v62, 16  ;;  %v1263_v16 = vld [vmem:[#allocation2 + $0x84] sm:$0xf]  ;;  %v633_v31 = vld [vmem:[%s7215_s13 + $0x58] sm:$0xf]  ;;  %2585 = vmatprep.subr.bf16.mxu1 %v9728_v5 }
  0x52   : > { %v1598_v12 = vshll.u32 %v6240_v6, 16  ;;  %v1932_v14 = vsel %vm7271_vm13, %v6260_v63, %v1931_v7  ;;  %v1933_v15 = vrot.slane %v1931_v7, 4  ;;  %v1264_v19 = vld [vmem:[#allocation2 + $0x88] sm:$0xf]  ;;  %v1292_v41 = vld [vmem:[#allocation2 + $0x8c] sm:$0x1] }
  0x53   : > { %v1529_v20 = vsel %vm1481_vm12, %v1524_v8, %v1528_v60  ;;  %2089 = vst.msk [vmem:[#allocation3 + $0x38] sm:$0xff] %vm1762_vm11, %v6274_v9  ;;  %v1595_v21 = vrot.slane %v1593_v11, 1  ;;  %v1312_v2 = vld [vmem:[#allocation2 + $0x84] sm:$0xe]  ;;  %v7479_v22 = vcombine.low %v1263_v16, %v1264_v19  ;;  %v1945_v25 = vrot.slane %v1264_v19, 5 }
  0x54   : > { %1728 = vrot.lane.b32.xlu1 %v1529_v20, %s7095_s0  ;;  %v1600_v26 = vrot.slane %v1598_v12, 1  ;;  %v1935_v27 = vsel %vm7271_vm13, %v1933_v15, %v1934_v0  ;;  %v6242_v28 = vcombine.low %v1292_v41, %v1292_v41  ;;  %v6262_v29 = vrot.slane %v1312_v2, 9  ;;  %v634_v59 = vld [vmem:[%s7215_s13 + $0x5c] sm:$0xf]  ;;  %v534_v60 = vld [vmem:[#allocation2 + $0xb4] sm:$0x1] }
  0x55   : > { %v1596_v32 = vor.u32 %v1595_v21, %v1591_v10  ;;  %v6280_v33 = vcombine.low %v1932_v14, %v1935_v27  ;;  %v1615_v34 = vshrl.u32 %v7479_v22, 16  ;;  %v1617_v36 = vshll.u32 %v7479_v22, 16  ;;  %v596_v7 = vld [vmem:[#allocation2 + $0xbc] sm:$0x1]  ;;  %v637_v0 = vld [vmem:[%s7215_s13 + $0x68] sm:$0xf] }
  0x56   : > { %v1622_v38 = vshll.u32 %v6242_v28, 16  ;;  %v1946_v42 = vsel %vm7271_vm13, %v6262_v29, %v1945_v25  ;;  %v1947_v43 = vrot.slane %v1945_v25, 4  ;;  %v1948_v44 = vrot.slane %v1292_v41, 5  ;;  %v1249_v45 = vld [vmem:[#allocation2 + $0x30] sm:$0xf] }
  0x57   : > { %v1601_v23 = vsel %vm1481_vm12, %v1596_v32, %v1600_v26  ;;  %2095 = vst.msk [vmem:[#allocation3 + $0x98] sm:$0xff] %vm1762_vm11, %v6280_v33  ;;  %v1619_v30 = vrot.slane %v1617_v36, 1  ;;  %v1250_v46 = vld [vmem:[#allocation2 + $0x34] sm:$0xf]  ;;  %v1285_v47 = vld [vmem:[#allocation2 + $0x38] sm:$0x1] }
  0x58   : > { %v833_v48 = vshrl.u32 %v633_v31, 16  ;;  %1740 = vrot.lane.b32.xlu0 %v1601_v23, %s7095_s0  ;;  %v1624_v49 = vrot.slane %v1622_v38, 1  ;;  %v1949_v51 = vsel %vm7271_vm13, %v1947_v43, %v1948_v44  ;;  %v1305_v39 = vld [vmem:[#allocation2 + $0x30] sm:$0xe]  ;;  %v7494_v52 = vcombine.low %v1249_v45, %v1250_v46  ;;  %v638_v8 = vld [vmem:[%s7215_s13 + $0x6c] sm:$0xf] }
  0x59   : > { %v6235_v53 = vcombine.low %v1285_v47, %v1285_v47  ;;  %v1620_v55 = vor.u32 %v1619_v30, %v1615_v34  ;;  %v6282_v56 = vcombine.low %v1946_v42, %v1949_v51  ;;  %v6255_v57 = vrot.slane %v1305_v39, 9  ;;  %v1046_v14 = vld [vmem:[#allocation2 + $0x9c] sm:$0xf]  ;;  %v540_v21 = vld [vmem:[#allocation2 + $0xcc] sm:$0x1] }
  0x5a   : > { %v1896_v58 = vrot.slane %v1250_v46, 5  ;;  %v1531_v61 = vshrl.u32 %v7494_v52, 16  ;;  %v1533_v63 = vshll.u32 %v7494_v52, 16  ;;  %v1899_v6 = vrot.slane %v1285_v47, 5  ;;  %v1050_v26 = vld [vmem:[#allocation2 + $0xa4] sm:$0x1] }
  0x5b   : > { %v1538_v3 = vshll.u32 %v6235_v53, 16  ;;  %v1625_v9 = vsel %vm1481_vm12, %v1620_v55, %v1624_v49  ;;  %2097 = vst.msk [vmem:[#allocation3 + $0xb8] sm:$0xff] %vm1762_vm11, %v6282_v56  ;;  %v835_v12 = vrot.slane %v833_v48, 7  ;;  %v836_v19 = vshll.u32 %v633_v31, 16  ;;  %v602_v28 = vld [vmem:[#allocation2 + $0xd4] sm:$0x1] }
  0x5c   : > { %v1897_v10 = vsel %vm7271_vm13, %v6255_v57, %v1896_v58  ;;  %v1898_v11 = vrot.slane %v1896_v58, 4  ;;  %1744 = vrot.lane.b32.xlu0 %v1625_v9, %s7095_s0  ;;  %v1535_v15 = vrot.slane %v1533_v63, 1  ;;  %v841_v20 = vshrl.u32 %v634_v59, 16  ;;  %v641_v29 = vld [vmem:[%s7215_s13 + $0x78] sm:$0xf] }
  0x5d   : > { %v1540_v16 = vrot.slane %v1538_v3, 1  ;;  %v839_v2 = vrot.slane %v835_v12, 4  ;;  %v844_v25 = vshll.u32 %v634_v59, 16  ;;  %v535_v27 = vsel %vm7165_vm2, 0, %v534_v60  ;;  %v642_v44 = vld [vmem:[%s7215_s13 + $0x7c] sm:$0xf] }
  0x5e   : > { %v1900_v41 = vsel %vm7271_vm13, %v1898_v11, %v1899_v6  ;;  %v1536_v32 = vor.u32 %v1535_v15, %v1531_v61  ;;  %v838_v34 = vor.u32 %v836_v19, %v835_v12  ;;  %v843_v36 = vrot.slane %v841_v20, 7  ;;  %536 = vst [vmem:[#allocation2 + $0xb4] sm:$0x1] %v535_v27  ;;  %v489_v47 = vld [vmem:[#allocation2] sm:$0x1] }
  0x5f   : > { %v6275_v33 = vcombine.low %v1897_v10, %v1900_v41  ;;  %v597_v31 = vsel %vm7172_vm5, 0, %v596_v7  ;;  %v867_v38 = vshrl.u32 %v637_v0, 16  ;;  %v870_v42 = vshll.u32 %v637_v0, 16  ;;  %v551_v53 = vld [vmem:[#allocation2 + $0x8] sm:$0x1] }
  0x60   : > { %v875_v43 = vshrl.u32 %v638_v8, 16  ;;  %v1541_v45 = vsel %vm1481_vm12, %v1536_v32, %v1540_v16  ;;  %v846_v23 = vor.u32 %v844_v25, %v843_v36  ;;  %v848_v30 = vrot.slane %v843_v36, 4  ;;  %598 = vst [vmem:[#allocation2 + $0xbc] sm:$0x1] %v597_v31  ;;  %v507_v58 = vld [vmem:[#allocation2 + $0x48] sm:$0x1] }
  0x61   : > { %2090 = vst.msk [vmem:[#allocation3 + $0x48] sm:$0xff] %vm1762_vm11, %v6275_v33  ;;  %v1047_v46 = vsel %vm7206_vm6, %v838_v34, %v1046_v14  ;;  %1730 = vrot.lane.b32.xlu1 %v1541_v45, %s7095_s0  ;;  %v869_v48 = vrot.slane %v867_v38, 7  ;;  %v878_v51 = vshll.u32 %v638_v8, 16  ;;  %v541_v39 = vsel %vm7165_vm2, 0, %v540_v21  ;;  %v569_v59 = vld [vmem:[#allocation2 + $0x50] sm:$0x1] }
  0x62   : > { %1048 = vst [vmem:[#allocation2 + $0x9c] sm:$0xf] %v1047_v46  ;;  %v877_v49 = vrot.slane %v875_v43, 7  ;;  %v847_v54 = vsel %vm7240_vm10, %v839_v2, %v846_v23  ;;  %v1051_v55 = vsel %vm7165_vm2, %v848_v30, %v1050_v26  ;;  %542 = vst [vmem:[#allocation2 + $0xcc] sm:$0x1] %v541_v39  ;;  %v603_v56 = vsel %vm7172_vm5, 0, %v602_v28 }
  0x63   : > { %v901_v57 = vshrl.u32 %v641_v29, 16  ;;  %v7532_v60 = vld [vmem:[%s7215_s13 + $0x20] sm:$0xf]  ;;  %1049 = vst.msk [vmem:[#allocation2 + $0xa0] sm:$0xf] %vm966_vm4, %v847_v54  ;;  %v872_v61 = vor.u32 %v870_v42, %v869_v48  ;;  %v873_v63 = vrot.slane %v869_v48, 4 }
  0x64   : > { %1052 = vst [vmem:[#allocation2 + $0xa4] sm:$0x1] %v1051_v55  ;;  %v880_v3 = vor.u32 %v878_v51, %v877_v49  ;;  %v882_v6 = vrot.slane %v877_v49, 4  ;;  %604 = vst [vmem:[#allocation2 + $0xd4] sm:$0x1] %v603_v56  ;;  %v904_v0 = vshll.u32 %v641_v29, 16 }
  0x65   : > { %v903_v7 = vrot.slane %v901_v57, 7  ;;  %v909_v8 = vshrl.u32 %v642_v44, 16  ;;  %v912_v9 = vshll.u32 %v642_v44, 16  ;;  %v7535_v10 = vld [vmem:[#allocation2 + $0x4] sm:$0xf]  ;;  %v490_v14 = vsel %vm7165_vm2, 0, %v489_v47 }
  0x66   : > { %v881_v11 = vsel %vm7240_vm10, %v873_v63, %v880_v3  ;;  %v1060_v12 = vld [vmem:[#allocation2 + $0xb4] sm:$0xf]  ;;  %v552_v15 = vsel %vm7172_vm5, 0, %v551_v53  ;;  %v620_v16 = vld [vmem:[%s7215_s13 + $0x24] sm:$0xf]  ;;  %v1868_v25 = vrot.slane %v7535_v10, 5 }
  0x67   : > { %v1061_v19 = vsel %vm7206_vm6, %v872_v61, %v1060_v12  ;;  %1063 = vst.msk [vmem:[#allocation2 + $0xb8] sm:$0xf] %vm966_vm4, %v881_v11  ;;  %v906_v20 = vor.u32 %v904_v0, %v903_v7  ;;  %v907_v21 = vrot.slane %v903_v7, 4  ;;  %v911_v41 = vrot.slane %v909_v8, 7  ;;  %491 = vst [vmem:[#allocation2] sm:$0x1] %v490_v14 }
  0x68   : > { %553 = vst [vmem:[#allocation2 + $0x8] sm:$0x1] %v552_v15  ;;  %1062 = vst [vmem:[#allocation2 + $0xb4] sm:$0xf] %v1061_v19  ;;  %v1064_v2 = vld [vmem:[#allocation2 + $0xbc] sm:$0x1] }
  0x69   : > { %v508_v26 = vsel %vm7165_vm2, 0, %v507_v58  ;;  %v570_v27 = vsel %vm7172_vm5, 0, %v569_v59  ;;  %v714_v28 = vshrl.u32 %v7532_v60, 16  ;;  %v1267_v29 = vld [vmem:[#allocation2 + $0x9c] sm:$0xf]  ;;  %v1065_v33 = vsel %vm7165_vm2, %v882_v6, %v1064_v2 }
  0x6a   : > { %v1314_v32 = vld [vmem:[#allocation2 + $0x9c] sm:$0xe]  ;;  %v914_v34 = vor.u32 %v912_v9, %v911_v41  ;;  %v916_v36 = vrot.slane %v911_v41, 4  ;;  %509 = vst [vmem:[#allocation2 + $0x48] sm:$0x1] %v508_v26  ;;  %v717_v31 = vshll.u32 %v7532_v60, 16 }
  0x6b   : > { %571 = vst [vmem:[#allocation2 + $0x50] sm:$0x1] %v570_v27  ;;  %v6264_v38 = vrot.slane %v1314_v32, 9  ;;  %1066 = vst [vmem:[#allocation2 + $0xbc] sm:$0x1] %v1065_v33  ;;  %v716_v43 = vrot.slane %v714_v28, 7 }
  0x6c   : > { %v1074_v42 = vld [vmem:[#allocation2 + $0xcc] sm:$0xf]  ;;  %v722_v44 = vshrl.u32 %v620_v16, 16  ;;  %v725_v45 = vshll.u32 %v620_v16, 16  ;;  %v1268_v23 = vld [vmem:[#allocation2 + $0xa0] sm:$0xf]  ;;  %v915_v46 = vsel %vm7240_vm10, %v907_v21, %v914_v34 }
  0x6d   : > { %v1294_v30 = vld [vmem:[#allocation2 + $0xa4] sm:$0x1]  ;;  %v1075_v47 = vsel %vm7206_vm6, %v906_v20, %v1074_v42  ;;  %v1078_v48 = vld [vmem:[#allocation2 + $0xd4] sm:$0x1]  ;;  %v7560_v49 = vcombine.low %v1267_v29, %v1268_v23  ;;  %v1959_v39 = vrot.slane %v1268_v23, 5  ;;  %v7565_v53 = vrot.slane %v1868_v25, 4 }
  0x6e   : > { %v6244_v51 = vcombine.low %v1294_v30, %v1294_v30  ;;  %1076 = vst [vmem:[#allocation2 + $0xcc] sm:$0xf] %v1075_v47  ;;  %1077 = vst.msk [vmem:[#allocation2 + $0xd0] sm:$0xf] %vm966_vm4, %v915_v46  ;;  %v1962_v54 = vrot.slane %v1294_v30, 5  ;;  %v1079_v55 = vsel %vm7165_vm2, %v916_v36, %v1078_v48  ;;  %v720_v56 = vrot.slane %v716_v43, 4 }
  0x6f   : > { %v7569_v57 = vrot.slane %v722_v44, 7  ;;  %v1639_v58 = vshrl.u32 %v7560_v49, 16  ;;  %v1641_v59 = vshll.u32 %v7560_v49, 16  ;;  %v1272_v61 = vld [vmem:[#allocation2 + $0xb8] sm:$0xf]  ;;  %v719_v63 = vor.u32 %v717_v31, %v716_v43  ;;  %v6967_v20 = vld [vmem:[%s9722_s3 + $0x40] sm:$0xff]  }
  0x70   : > { %v1646_v60 = vshll.u32 %v6244_v51, 16  ;;  %1080 = vst [vmem:[#allocation2 + $0xd4] sm:$0x1] %v1079_v55  ;;  %v6966_v3 = vld [vmem:[%s9722_s3 + $0x38] sm:$0xff]   ;;  %v1960_v6 = vsel %vm7271_vm13, %v6264_v38, %v1959_v39  ;;  %v1961_v7 = vrot.slane %v1959_v39, 4  ;;  %v1973_v9 = vrot.slane %v1272_v61, 5 }
  0x71   : > { %v1271_v0 = vld [vmem:[#allocation2 + $0xb4] sm:$0xf]  ;;  %v727_v11 = vor.u32 %v725_v45, %v7569_v57  ;;  %v1643_v12 = vrot.slane %v1641_v59, 1  ;;  %v1085_v19 = vld [vmem:[#allocation2] sm:$0xf]  ;;  %2586 = vmatpush1.bf16.msra.mxu1 %v6966_v3 }
  0x72   : > { %v1316_v8 = vld [vmem:[#allocation2 + $0xb4] sm:$0xe]  ;;  %v1648_v14 = vrot.slane %v1646_v60, 1  ;;  %v7579_v15 = vcombine.low %v1271_v0, %v1272_v61  ;;  %v1963_v21 = vsel %vm7271_vm13, %v1961_v7, %v1962_v54  ;;  %v1296_v41 = vld [vmem:[#allocation2 + $0xbc] sm:$0x1]  ;;  %v1975_v2 = vrot.slane %v1973_v9, 4  ;;  %2587 = vmatprep.subr.bf16.mxu1 %v9728_v5 }
  0x73   : > { %v6266_v16 = vrot.slane %v1316_v8, 9  ;;  %v1086_v26 = vsel %vm7206_vm6, 0, %v1085_v19  ;;  %v728_v27 = vsel %vm7240_vm10, %v720_v56, %v727_v11  ;;  %v1644_v28 = vor.u32 %v1643_v12, %v1639_v58  ;;  %v1089_v34 = vld [vmem:[#allocation2 + $0x8] sm:$0x1]  ;;  %v513_v51 = vld [vmem:[#allocation2 + $0x60] sm:$0x1] }
  0x74   : > { %v6284_v29 = vcombine.low %v1960_v6, %v1963_v21  ;;  %v6246_v32 = vcombine.low %v1296_v41, %v1296_v41  ;;  %v1663_v33 = vshrl.u32 %v7579_v15, 16  ;;  %1087 = vst [vmem:[#allocation2] sm:$0xf] %v1086_v26  ;;  %v997_v36 = vld [vmem:[#allocation2 + $0x48] sm:$0xf]  ;;  %v1665_v31 = vshll.u32 %v7579_v15, 16 }
  0x75   : > { %1000 = vst.msk [vmem:[#allocation2 + $0x4c] sm:$0xf] %vm966_vm4, %v728_v27  ;;  %v1974_v38 = vsel %vm7271_vm13, %v6266_v16, %v1973_v9  ;;  %v1976_v42 = vrot.slane %v1296_v41, 5  ;;  %v1275_v43 = vld [vmem:[#allocation2 + $0xcc] sm:$0xf]  ;;  %v998_v45 = vsel %vm7206_vm6, %v719_v63, %v997_v36  ;;  %v1649_v23 = vsel %vm1481_vm12, %v1644_v28, %v1648_v14  ;;  %2588 = vmatpush1.bf16.msra.mxu1 %v6967_v20 }
  0x76   : > { %v1276_v44 = vld [vmem:[#allocation2 + $0xd0] sm:$0xf]  ;;  %2099 = vst.msk [vmem:[#allocation3 + $0xd8] sm:$0xff] %vm1762_vm11, %v6284_v29  ;;  %v1670_v30 = vshll.u32 %v6246_v32, 16  ;;  %v1318_v46 = vld [vmem:[#allocation2 + $0xcc] sm:$0xe]  ;;  %1748 = vrot.lane.b32.xlu0 %v1649_v23, %s7095_s0  ;;  %2589 = vmatprep.subr.bf16.mxu1 %v9728_v5 }
  0x77   : > { %v7600_v47 = vcombine.low %v1275_v43, %v1276_v44  ;;  %v1987_v48 = vrot.slane %v1276_v44, 5  ;;  %999 = vst [vmem:[#allocation2 + $0x48] sm:$0xf] %v998_v45  ;;  %v1667_v39 = vrot.slane %v1665_v31, 1  ;;  %v1977_v54 = vsel %vm7271_vm13, %v1975_v2, %v1976_v42  ;;  %v1298_v55 = vld [vmem:[#allocation2 + $0xd4] sm:$0x1] }
  0x78   : > { %v6268_v56 = vrot.slane %v1318_v46, 9  ;;  %v1090_v58 = vsel %vm7165_vm2, 0, %v1089_v34  ;;  %v1672_v59 = vrot.slane %v1670_v30, 1  ;;  %v6286_v60 = vcombine.low %v1974_v38, %v1977_v54  ;;  %v1001_v3 = vld [vmem:[#allocation2 + $0x50] sm:$0x1]  ;;  %v6969_v44 = vld [vmem:[%s9722_s3 + $0x48] sm:$0xff]  }
  0x79   : > { %v6248_v61 = vcombine.low %v1298_v55, %v1298_v55  ;;  %v1687_v63 = vshrl.u32 %v7600_v47, 16  ;;  %1091 = vst [vmem:[#allocation2 + $0x8] sm:$0x1] %v1090_v58  ;;  %v575_v6 = vld [vmem:[#allocation2 + $0x68] sm:$0x1]  ;;  %v1668_v7 = vor.u32 %v1667_v39, %v1663_v33  ;;  %v1689_v0 = vshll.u32 %v7600_v47, 16  ;;  %2590 = vmatpush1.bf16.msra.mxu1 %v6969_v44 }
  0x7a   : > { %v1988_v8 = vsel %vm7271_vm13, %v6268_v56, %v1987_v48  ;;  %v1989_v9 = vrot.slane %v1987_v48, 4  ;;  %2101 = vst.msk [vmem:[#allocation3 + $0xf8] sm:$0xff] %vm1762_vm11, %v6286_v60  ;;  %v1990_v12 = vrot.slane %v1298_v55, 5  ;;  %v729_v14 = vrot.slane %v7569_v57, 4  ;;  %v623_v19 = vld [vmem:[%s7215_s13 + $0x30] sm:$0xf]  ;;  %2591 = vmatprep.subr.bf16.mxu1 %v9728_v5 }
  0x7b   : > { %v1694_v11 = vshll.u32 %v6248_v61, 16  ;;  %v514_v16 = vsel %vm7165_vm2, 0, %v513_v51  ;;  %v1673_v20 = vsel %vm1481_vm12, %v1668_v7, %v1672_v59  ;;  %v1691_v21 = vrot.slane %v1689_v0, 1  ;;  %v1241_v41 = vld [vmem:[#allocation2] sm:$0xf] }
  0x7c   : > { %v1301_v2 = vld [vmem:[#allocation2] sm:$0xe]  ;;  %515 = vst [vmem:[#allocation2 + $0x60] sm:$0x1] %v514_v16  ;;  %v576_v26 = vsel %vm7172_vm5, 0, %v575_v6  ;;  %1752 = vrot.lane.b32.xlu0 %v1673_v20, %s7095_s0  ;;  %v1991_v57 = vsel %vm7271_vm13, %v1989_v9, %v1990_v12  ;;  %v7624_v28 = vcombine.low %v1241_v41, %v7535_v10  ;;  %v1002_v36 = vsel %vm7165_vm2, %v729_v14, %v1001_v3  ;;  %v6970_v10 = vld [vmem:[%s9722_s3 + $0x50] sm:$0xff]  }
  0x7d   : > { %v1696_v27 = vrot.slane %v1694_v11, 1  ;;  %v6251_v29 = vrot.slane %v1301_v2, 9  ;;  %v1254_v32 = vld [vmem:[#allocation2 + $0x4c] sm:$0xf]  ;;  %577 = vst [vmem:[#allocation2 + $0x68] sm:$0x1] %v576_v26  ;;  %v1692_v33 = vor.u32 %v1691_v21, %v1687_v63  ;;  %v6288_v34 = vcombine.low %v1988_v8, %v1991_v57  ;;  %2592 = vmatpush1.bf16.msra.mxu1 %v6970_v10 }
  0x7e   : > { %v1253_v31 = vld [vmem:[#allocation2 + $0x48] sm:$0xf]  ;;  %v1910_v42 = vrot.slane %v1254_v32, 5  ;;  %v624_v43 = vld [vmem:[%s7215_s13 + $0x34] sm:$0xf]  ;;  %v1483_v45 = vshrl.u32 %v7624_v28, 16  ;;  %2593 = vmatprep.subr.bf16.mxu1 %v9728_v5 }
  0x7f   : > { %v1307_v38 = vld [vmem:[#allocation2 + $0x48] sm:$0xe]  ;;  %v1485_v23 = vshll.u32 %v7624_v28, 16  ;;  %v1869_v30 = vsel %vm7271_vm13, %v6251_v29, %v1868_v25  ;;  %1003 = vst [vmem:[#allocation2 + $0x50] sm:$0x1] %v1002_v36  ;;  %v7638_v46 = vcombine.low %v1253_v31, %v1254_v32  ;;  %v1697_v48 = vsel %vm1481_vm12, %v1692_v33, %v1696_v27  ;;  %2103 = vst.msk [vmem:[#allocation3 + $0x118] sm:$0xff] %vm1762_vm11, %v6288_v34 }
  0x80   : > { %v1281_v51 = vld [vmem:[#allocation2 + $0x8] sm:$0x1]  ;;  %v6257_v39 = vrot.slane %v1307_v38, 9  ;;  %v1912_v54 = vrot.slane %v1910_v42, 4  ;;  %v748_v55 = vshrl.u32 %v623_v19, 16  ;;  %1756 = vrot.lane.b32.xlu0 %v1697_v48, %s7095_s0  ;;  %v751_v0 = vshll.u32 %v623_v19, 16 }
  0x81   : > { %v519_v56 = vld [vmem:[#allocation2 + $0x78] sm:$0x1]  ;;  %v6231_v25 = vcombine.low %v1281_v51, %v1281_v51  ;;  %v1487_v58 = vrot.slane %v1485_v23, 1  ;;  %v1871_v59 = vrot.slane %v1281_v51, 5  ;;  %v1555_v60 = vshrl.u32 %v7638_v46, 16 }
  0x82   : > { %v581_v61 = vld [vmem:[#allocation2 + $0x80] sm:$0x1]  ;;  %v1557_v3 = vshll.u32 %v7638_v46, 16  ;;  %v7652_v6 = vsel %vm7271_vm13, %v6257_v39, %v1910_v42  ;;  %v750_v7 = vrot.slane %v748_v55, 7  ;;  %v756_v12 = vshrl.u32 %v624_v43, 16  ;;  %v6971_v26 = vld [vmem:[%s9722_s3 + $0x58] sm:$0xff]  }
  0x83   : > { %v627_v63 = vld [vmem:[%s7215_s13 + $0x40] sm:$0xf]  ;;  %v1488_v8 = vor.u32 %v1487_v58, %v1483_v45  ;;  %v1490_v9 = vshll.u32 %v6231_v25, 16  ;;  %v1872_v11 = vsel %vm7271_vm13, %v7565_v53, %v1871_v59  ;;  %v7658_v16 = vld [vmem:[%s7215_s13 + $0x44] sm:$0xf]  ;;  %v759_v57 = vshll.u32 %v624_v43, 16  ;;  %2594 = vmatpush1.bf16.msra.mxu1 %v6971_v26 }
  0x84   : > { %v1011_v14 = vld [vmem:[#allocation2 + $0x60] sm:$0xf]  ;;  %v6271_v20 = vcombine.low %v1869_v30, %v1872_v11  ;;  %v1559_v21 = vrot.slane %v1557_v3, 1  ;;  %v753_v41 = vor.u32 %v751_v0, %v750_v7  ;;  %v754_v2 = vrot.slane %v750_v7, 4  ;;  %v525_v31 = vld [vmem:[#allocation2 + $0x90] sm:$0x1]  ;;  %4998 = vmatprep.subr.bf16.mxu1 %v9728_v5 }
  0x85   : > { %v1492_v19 = vrot.slane %v1490_v9, 1  ;;  %v758_v27 = vrot.slane %v756_v12, 7  ;;  %v520_v29 = vsel %vm7165_vm2, 0, %v519_v56  ;;  %v582_v34 = vsel %vm7172_vm5, 0, %v581_v61  ;;  %v587_v38 = vld [vmem:[#allocation2 + $0x98] sm:$0x1] }
  0x86   : > { %2086 = vst.msk [vmem:[#allocation3 + $0x8] sm:$0xff] %vm1762_vm11, %v6271_v20  ;;  %v1287_v53 = vld [vmem:[#allocation2 + $0x50] sm:$0x1]  ;;  %v1560_v32 = vor.u32 %v1559_v21, %v1555_v60  ;;  %v1012_v33 = vsel %vm7206_vm6, %v753_v41, %v1011_v14  ;;  %521 = vst [vmem:[#allocation2 + $0x78] sm:$0x1] %v520_v29  ;;  %v782_v36 = vshrl.u32 %v627_v63, 16 }
  0x87   : > { %v1493_v42 = vsel %vm1481_vm12, %v1488_v8, %v1492_v19  ;;  %v6237_v43 = vcombine.low %v1287_v53, %v1287_v53  ;;  %v1913_v44 = vrot.slane %v1287_v53, 5  ;;  %v761_v45 = vor.u32 %v759_v57, %v758_v27  ;;  %1013 = vst [vmem:[#allocation2 + $0x60] sm:$0xf] %v1012_v33  ;;  %v1015_v23 = vld [vmem:[#allocation2 + $0x68] sm:$0x1] }
  0x88   : > { %583 = vst [vmem:[#allocation2 + $0x80] sm:$0x1] %v582_v34  ;;  %v631_v30 = vld [vmem:[%s7215_s13 + $0x50] sm:$0xf]  ;;  %1722 = vrot.lane.b32.xlu0 %v1493_v42, %s7095_s0  ;;  %v763_v48 = vrot.slane %v758_v27, 4  ;;  %v784_v51 = vrot.slane %v782_v36, 7 }
  0x89   : > { %v785_v39 = vshll.u32 %v627_v63, 16  ;;  %v790_v55 = vshrl.u32 %v7658_v16, 16  ;;  %v632_v56 = vld [vmem:[%s7215_s13 + $0x54] sm:$0xf]  ;;  %v1562_v10 = vshll.u32 %v6237_v43, 16  ;;  %v1914_v25 = vsel %vm7271_vm13, %v1912_v54, %v1913_v44 }
  0x8a   : > { %v762_v58 = vsel %vm7240_vm10, %v754_v2, %v761_v45  ;;  %v793_v59 = vshll.u32 %v7658_v16, 16  ;;  %v531_v60 = vld [vmem:[#allocation2 + $0xa8] sm:$0x1]  ;;  %v6277_v61 = vcombine.low %v7652_v6, %v1914_v25  ;;  %v1016_v63 = vsel %vm7165_vm2, %v763_v48, %v1015_v23  ;;  %v593_v11 = vld [vmem:[#allocation2 + $0xb0] sm:$0x1] }
  0x8b   : > { %1014 = vst.msk [vmem:[#allocation2 + $0x64] sm:$0xf] %vm966_vm4, %v762_v58  ;;  %v787_v3 = vor.u32 %v785_v39, %v784_v51  ;;  %v788_v7 = vrot.slane %v784_v51, 4  ;;  %v1564_v54 = vrot.slane %v1562_v10, 1  ;;  %1017 = vst [vmem:[#allocation2 + $0x68] sm:$0x1] %v1016_v63 }
  0x8c   : > { %v792_v0 = vrot.slane %v790_v55, 7  ;;  %v526_v8 = vsel %vm7165_vm2, 0, %v525_v31  ;;  %v588_v9 = vsel %vm7172_vm5, 0, %v587_v38  ;;  %v7691_v12 = vld [vmem:[%s7215_s13 + $0x60] sm:$0xf]  ;;  %2092 = vst.msk [vmem:[#allocation3 + $0x68] sm:$0xff] %vm1762_vm11, %v6277_v61 }
  0x8d   : > { %527 = vst [vmem:[#allocation2 + $0x90] sm:$0x1] %v526_v8  ;;  %589 = vst [vmem:[#allocation2 + $0x98] sm:$0x1] %v588_v9  ;;  %v816_v6 = vshrl.u32 %v631_v30, 16  ;;  %v819_v14 = vshll.u32 %v631_v30, 16  ;;  %v1565_v41 = vsel %vm1481_vm12, %v1560_v32, %v1564_v54 }
  0x8e   : > { %v824_v16 = vshrl.u32 %v632_v56, 16  ;;  %v827_v20 = vshll.u32 %v632_v56, 16  ;;  %v7695_v21 = vld [vmem:[%s7215_s13 + $0x64] sm:$0xf]  ;;  %v795_v2 = vor.u32 %v793_v59, %v792_v0  ;;  %v797_v26 = vrot.slane %v792_v0, 4  ;;  %1734 = vrot.lane.b32.xlu1 %v1565_v41, %s7095_s0  ;;  %v2107_v39 = vld [vmem:[#allocation3 + $0x8] sm:$0xff] }
  0x8f   : > { %v1025_v19 = vld [vmem:[#allocation2 + $0x78] sm:$0xf]  ;;  %v532_v27 = vsel %vm7165_vm2, 0, %v531_v60  ;;  %v1257_v57 = vld [vmem:[#allocation2 + $0x60] sm:$0xf]  ;;  %v818_v31 = vrot.slane %v816_v6, 7  ;;  %6357 = vmatprep.mubr.msk.bf16.mxu1 %vm1762_vm11, %v2107_v39 }
  0x90   : > { %v1309_v29 = vld [vmem:[#allocation2 + $0x60] sm:$0xe]  ;;  %v1026_v53 = vsel %vm7206_vm6, %v787_v3, %v1025_v19  ;;  %v1029_v33 = vld [vmem:[#allocation2 + $0x80] sm:$0x1]  ;;  %533 = vst [vmem:[#allocation2 + $0xa8] sm:$0x1] %v532_v27  ;;  %v796_v36 = vsel %vm7240_vm10, %v788_v7, %v795_v2 }
  0x91   : > { %v6259_v34 = vrot.slane %v1309_v29, 9  ;;  %1027 = vst [vmem:[#allocation2 + $0x78] sm:$0xf] %v1026_v53  ;;  %v1030_v32 = vsel %vm7165_vm2, %v797_v26, %v1029_v33  ;;  %1028 = vst.msk [vmem:[#allocation2 + $0x7c] sm:$0xf] %vm966_vm4, %v796_v36  ;;  %v826_v38 = vrot.slane %v824_v16, 7  ;;  %v821_v23 = vor.u32 %v819_v14, %v818_v31 }
  0x92   : > { %1031 = vst [vmem:[#allocation2 + $0x80] sm:$0x1] %v1030_v32  ;;  %v594_v42 = vsel %vm7172_vm5, 0, %v593_v11  ;;  %v850_v43 = vshrl.u32 %v7691_v12, 16  ;;  %v853_v44 = vshll.u32 %v7691_v12, 16  ;;  %v822_v30 = vrot.slane %v818_v31, 4 }
  0x93   : > { %v1258_v45 = vld [vmem:[#allocation2 + $0x64] sm:$0xf]  ;;  %595 = vst [vmem:[#allocation2 + $0xb0] sm:$0x1] %v594_v42  ;;  %v858_v48 = vshrl.u32 %v7695_v21, 16  ;;  %v861_v51 = vshll.u32 %v7695_v21, 16  ;;  %v829_v25 = vor.u32 %v827_v20, %v826_v38 }
  0x94   : > { %v1289_v55 = vld [vmem:[#allocation2 + $0x68] sm:$0x1]  ;;  %v7714_v56 = vcombine.low %v1257_v57, %v1258_v45  ;;  %v1924_v10 = vrot.slane %v1258_v45, 5  ;;  %v831_v58 = vrot.slane %v826_v38, 4  ;;  %v1039_v61 = vld [vmem:[#allocation2 + $0x90] sm:$0xf] }
  0x95   : > { %v6239_v59 = vcombine.low %v1289_v55, %v1289_v55  ;;  %v1927_v60 = vrot.slane %v1289_v55, 5  ;;  %v1043_v63 = vld [vmem:[#allocation2 + $0x98] sm:$0x1]  ;;  %v852_v3 = vrot.slane %v850_v43, 7  ;;  %v537_v9 = vld [vmem:[#allocation2 + $0xc0] sm:$0x1]  ;;  %v830_v12 = vsel %vm7240_vm10, %v822_v30, %v829_v25 }
  0x96   : > { %v1579_v7 = vshrl.u32 %v7714_v56, 16  ;;  %v1581_v54 = vshll.u32 %v7714_v56, 16  ;;  %v1925_v0 = vsel %vm7271_vm13, %v6259_v34, %v1924_v10  ;;  %v1926_v8 = vrot.slane %v1924_v10, 4  ;;  %1042 = vst.msk [vmem:[#allocation2 + $0x94] sm:$0xf] %vm966_vm4, %v830_v12 }
  0x97   : > { %v1586_v11 = vshll.u32 %v6239_v59, 16  ;;  %v1040_v6 = vsel %vm7206_vm6, %v821_v23, %v1039_v61  ;;  %v1044_v14 = vsel %vm7165_vm2, %v831_v58, %v1043_v63  ;;  %v1053_v16 = vld [vmem:[#allocation2 + $0xa8] sm:$0xf]  ;;  %v855_v26 = vor.u32 %v853_v44, %v852_v3  ;;  %v639_v23 = vld [vmem:[%s7215_s13 + $0x70] sm:$0xf] }
  0x98   : > { %v1583_v20 = vrot.slane %v1581_v54, 1  ;;  %v1928_v21 = vsel %vm7271_vm13, %v1926_v8, %v1927_v60  ;;  %v1261_v41 = vld [vmem:[#allocation2 + $0x78] sm:$0xf]  ;;  %1041 = vst [vmem:[#allocation2 + $0x90] sm:$0xf] %v1040_v6  ;;  %v856_v19 = vrot.slane %v852_v3, 4 }
  0x99   : > { %v1311_v2 = vld [vmem:[#allocation2 + $0x78] sm:$0xe]  ;;  %1045 = vst [vmem:[#allocation2 + $0x98] sm:$0x1] %v1044_v14  ;;  %v1588_v27 = vrot.slane %v1586_v11, 1  ;;  %v6279_v57 = vcombine.low %v1925_v0, %v1928_v21  ;;  %v860_v43 = vrot.slane %v858_v48, 7  ;;  %v1054_v44 = vsel %vm7206_vm6, %v855_v26, %v1053_v16 }
  0x9a   : > { %v1262_v29 = vld [vmem:[#allocation2 + $0x7c] sm:$0xf]  ;;  %v1291_v53 = vld [vmem:[#allocation2 + $0x80] sm:$0x1]  ;;  %v6261_v33 = vrot.slane %v1311_v2, 9  ;;  %v1584_v34 = vor.u32 %v1583_v20, %v1579_v7  ;;  %v538_v45 = vsel %vm7165_vm2, 0, %v537_v9 }
  0x9b   : > { %v7730_v36 = vcombine.low %v1261_v41, %v1262_v29  ;;  %v6241_v32 = vcombine.low %v1291_v53, %v1291_v53  ;;  %v1938_v31 = vrot.slane %v1262_v29, 5  ;;  %v599_v38 = vld [vmem:[#allocation2 + $0xc8] sm:$0x1]  ;;  %2094 = vst.msk [vmem:[#allocation3 + $0x88] sm:$0xff] %vm1762_vm11, %v6279_v57  ;;  %v1941_v42 = vrot.slane %v1291_v53, 5 }
  0x9c   : > { %v1589_v30 = vsel %vm1481_vm12, %v1584_v34, %v1588_v27  ;;  %1055 = vst [vmem:[#allocation2 + $0xa8] sm:$0xf] %v1054_v44  ;;  %v1057_v25 = vld [vmem:[#allocation2 + $0xb0] sm:$0x1]  ;;  %539 = vst [vmem:[#allocation2 + $0xc0] sm:$0x1] %v538_v45  ;;  %v863_v59 = vor.u32 %v861_v51, %v860_v43 }
  0x9d   : > { %v1603_v39 = vshrl.u32 %v7730_v36, 16  ;;  %v1605_v55 = vshll.u32 %v7730_v36, 16  ;;  %v1610_v10 = vshll.u32 %v6241_v32, 16  ;;  %1738 = vrot.lane.b32.xlu1 %v1589_v30, %s7095_s0  ;;  %v1939_v48 = vsel %vm7271_vm13, %v6261_v33, %v1938_v31  ;;  %v1266_v8 = vld [vmem:[#allocation2 + $0x94] sm:$0xf] }
  0x9e   : > { %v1940_v58 = vrot.slane %v1938_v31, 4  ;;  %v865_v60 = vrot.slane %v860_v43, 4  ;;  %v600_v3 = vsel %vm7172_vm5, 0, %v599_v38  ;;  %v884_v7 = vshrl.u32 %v639_v23, 16  ;;  %v640_v21 = vld [vmem:[%s7215_s13 + $0x74] sm:$0xf] }
  0x9f   : > { %v1607_v61 = vrot.slane %v1605_v55, 1  ;;  %v1612_v63 = vrot.slane %v1610_v10, 1  ;;  %v1265_v0 = vld [vmem:[#allocation2 + $0x90] sm:$0xf]  ;;  %v864_v11 = vsel %vm7240_vm10, %v856_v19, %v863_v59  ;;  %601 = vst [vmem:[#allocation2 + $0xc8] sm:$0x1] %v600_v3 }
  0xa0   : > { %v1942_v54 = vsel %vm7271_vm13, %v1940_v58, %v1941_v42  ;;  %v1293_v9 = vld [vmem:[#allocation2 + $0x98] sm:$0x1]  ;;  %v1058_v51 = vsel %vm7165_vm2, %v865_v60, %v1057_v25  ;;  %v1313_v14 = vld [vmem:[#allocation2 + $0x90] sm:$0xe]  ;;  %v7752_v16 = vcombine.low %v1265_v0, %v1266_v8  ;;  %1056 = vst.msk [vmem:[#allocation2 + $0xac] sm:$0xf] %vm966_vm4, %v864_v11 }
  0xa1   : > { %v1608_v12 = vor.u32 %v1607_v61, %v1603_v39  ;;  %v6281_v6 = vcombine.low %v1939_v48, %v1942_v54  ;;  %v6243_v20 = vcombine.low %v1293_v9, %v1293_v9  ;;  %1059 = vst [vmem:[#allocation2 + $0xb0] sm:$0x1] %v1058_v51  ;;  %v6263_v41 = vrot.slane %v1313_v14, 9  ;;  %v543_v57 = vld [vmem:[#allocation2 + $0xd8] sm:$0x1] }
  0xa2   : > { %v1952_v2 = vrot.slane %v1266_v8, 5  ;;  %v1955_v26 = vrot.slane %v1293_v9, 5  ;;  %v886_v27 = vrot.slane %v884_v7, 7  ;;  %v605_v19 = vld [vmem:[#allocation2 + $0xe0] sm:$0x1]  ;;  %v1627_v53 = vshrl.u32 %v7752_v16, 16 }
  0xa3   : > { %v1613_v29 = vsel %vm1481_vm12, %v1608_v12, %v1612_v63  ;;  %2096 = vst.msk [vmem:[#allocation3 + $0xa8] sm:$0xff] %vm1762_vm11, %v6281_v6  ;;  %v1629_v33 = vshll.u32 %v7752_v16, 16  ;;  %v1634_v34 = vshll.u32 %v6243_v20, 16  ;;  %v1269_v38 = vld [vmem:[#allocation2 + $0xa8] sm:$0xf]  ;;  %v887_v43 = vshll.u32 %v639_v23, 16 }
  0xa4   : > { %1742 = vrot.lane.b32.xlu1 %v1613_v29, %s7095_s0  ;;  %v1953_v32 = vsel %vm7271_vm13, %v6263_v41, %v1952_v2  ;;  %v1954_v31 = vrot.slane %v1952_v2, 4  ;;  %v1315_v42 = vld [vmem:[#allocation2 + $0xa8] sm:$0xe]  ;;  %v1067_v39 = vld [vmem:[#allocation2 + $0xc0] sm:$0xf]  ;;  %v892_v25 = vshrl.u32 %v640_v21, 16 }
  0xa5   : > { %v1631_v44 = vrot.slane %v1629_v33, 1  ;;  %v1636_v45 = vrot.slane %v1634_v34, 1  ;;  %v6265_v30 = vrot.slane %v1315_v42, 9  ;;  %v889_v10 = vor.u32 %v887_v43, %v886_v27  ;;  %v6958_v2 = vld [vmem:[%s9722_s3 + $0xc0] sm:$0xff]   ;;  %v7787_v29 = vld [vmem:[#allocation3 + $0x28] sm:$0xff]  ;;  %v1725_v34 = vpop.permute.xlu0 %1724 }
  0xa6   : > { %v1956_v55 = vsel %vm7271_vm13, %v1954_v31, %v1955_v26  ;;  %v895_v48 = vshll.u32 %v640_v21, 16  ;;  %v1071_v60 = vld [vmem:[#allocation2 + $0xc8] sm:$0x1]  ;;  %v544_v61 = vsel %vm7165_vm2, 0, %v543_v57  ;;  %v606_v63 = vsel %vm7172_vm5, 0, %v605_v19 }
  0xa7   : > { %v1632_v58 = vor.u32 %v1631_v44, %v1627_v53  ;;  %v6283_v59 = vcombine.low %v1953_v32, %v1956_v55  ;;  %v1270_v23 = vld [vmem:[#allocation2 + $0xac] sm:$0xf]  ;;  %v890_v7 = vrot.slane %v886_v27, 4  ;;  %v894_v54 = vrot.slane %v892_v25, 7  ;;  %545 = vst [vmem:[#allocation2 + $0xd8] sm:$0x1] %v544_v61 }
  0xa8   : > { %v1295_v3 = vld [vmem:[#allocation2 + $0xb0] sm:$0x1]  ;;  %v1068_v0 = vsel %vm7206_vm6, %v889_v10, %v1067_v39  ;;  %607 = vst [vmem:[#allocation2 + $0xe0] sm:$0x1] %v606_v63  ;;  %v7773_v9 = vcombine.low %v1269_v38, %v1270_v23  ;;  %v1966_v51 = vrot.slane %v1270_v23, 5  ;;  %v7794_v31 = vsel %vm1762_vm11, %v7276_v24, %v1725_v34  ;;  %v6962_v38 = vld [vmem:[%s9722_s3 + $0xc8] sm:$0xff]  }
  0xa9   : > { %v1637_v8 = vsel %vm1481_vm12, %v1632_v58, %v1636_v45  ;;  %2098 = vst.msk [vmem:[#allocation3 + $0xc8] sm:$0xff] %vm1762_vm11, %v6283_v59  ;;  %v6245_v11 = vcombine.low %v1295_v3, %v1295_v3  ;;  %1069 = vst [vmem:[#allocation2 + $0xc0] sm:$0xf] %v1068_v0  ;;  %v1969_v12 = vrot.slane %v1295_v3, 5  ;;  %v897_v6 = vor.u32 %v895_v48, %v894_v54  ;;  %v1278_v55 = vld [vmem:[#allocation2 + $0xdc] sm:$0xf]  ;;  %v1727_v25 = vpop.permute.xlu0 %1726 }
  0xaa   : > { %1746 = vrot.lane.b32.xlu1 %v1637_v8, %s7095_s0  ;;  %v899_v14 = vrot.slane %v894_v54, 4  ;;  %v1651_v20 = vshrl.u32 %v7773_v9, 16  ;;  %v1653_v21 = vshll.u32 %v7773_v9, 16  ;;  %v1967_v26 = vsel %vm7271_vm13, %v6265_v30, %v1966_v51  ;;  %2352 = vmatmul.mubr.bf16.vlgmr.msra.gmra.mrb[0].mxu0 %v7794_v31  ;;  %v6968_v61 = vld [vmem:[%s9722_s3 + $0xd0] sm:$0xff]   ;;  %v7817_v63 = vld [vmem:[#allocation3 + $0x38] sm:$0xff] }
  0xab   : > { %v1658_v41 = vshll.u32 %v6245_v11, 16  ;;  %v1968_v27 = vrot.slane %v1966_v51, 4  ;;  %v898_v57 = vsel %vm7240_vm10, %v890_v7, %v897_v6  ;;  %2936 = vmatpush1.bf16.msra.mxu0 %v6958_v2  ;;  %6328 = vmatprep.mubr.msk.bf16.mxu0 %vm1762_vm11, %v7787_v29  ;;  %v7812_v58 = vsel %vm1762_vm11, %v7305_v50, %v1727_v25  ;;  %v6972_v6 = vld [vmem:[%s9722_s3 + $0xd8] sm:$0xff]  }
  0xac   : > { %v1072_v19 = vsel %vm7165_vm2, %v899_v14, %v1071_v60  ;;  %v1655_v53 = vrot.slane %v1653_v21, 1  ;;  %1070 = vst.msk [vmem:[#allocation2 + $0xc4] sm:$0xf] %vm966_vm4, %v898_v57  ;;  %2937 = vmatprep.subr.bf16.mxu0 %v9728_v5  ;;  %v1994_v60 = vrot.slane %v1278_v55, 5 }
  0xad   : > { %v1660_v33 = vrot.slane %v1658_v41, 1  ;;  %1073 = vst [vmem:[#allocation2 + $0xc8] sm:$0x1] %v1072_v19  ;;  %v1970_v32 = vsel %vm7271_vm13, %v1968_v27, %v1969_v12  ;;  %v1733_v50 = vpop.permute.xlu0 %1732 }
  0xae   : > { %v1656_v42 = vor.u32 %v1655_v53, %v1651_v20  ;;  %v6285_v43 = vcombine.low %v1967_v26, %v1970_v32  ;;  %v1165_v44 = vld [vmem:[#allocation2 + $0xd8] sm:$0xf]  ;;  %v7832_v21 = vsel %vm1762_vm11, %v7323_v13, %v1733_v50  ;;  %v1996_v26 = vrot.slane %v1994_v60, 4 }
  0xaf   : > { %v1169_v45 = vld [vmem:[#allocation2 + $0xe0] sm:$0x1]  ;;  %v1166_v39 = vsel %vm7206_vm6, 0, %v1165_v44  ;;  %2938 = vmatpush1.bf16.msra.mxu0 %v6962_v38 }
  0xb0   : > { %v1317_v30 = vld [vmem:[#allocation2 + $0xc0] sm:$0xe]  ;;  %v1170_v24 = vsel %vm7165_vm2, 0, %v1169_v45  ;;  %v1661_v10 = vsel %vm1481_vm12, %v1656_v42, %v1660_v33  ;;  %2100 = vst.msk [vmem:[#allocation3 + $0xe8] sm:$0xff] %vm1762_vm11, %v6285_v43  ;;  %1167 = vst [vmem:[#allocation2 + $0xd8] sm:$0xf] %v1166_v39  ;;  %2939 = vmatprep.subr.bf16.mxu0 %v9728_v5 }
  0xb1   : > { %v1273_v48 = vld [vmem:[#allocation2 + $0xc0] sm:$0xf]  ;;  %1171 = vst [vmem:[#allocation2 + $0xe0] sm:$0x1] %v1170_v24  ;;  %1750 = vrot.lane.b32.xlu1 %v1661_v10, %s7095_s0  ;;  %v6267_v59 = vrot.slane %v1317_v30, 9  ;;  %v1737_v13 = vpop.permute.xlu0 %1736 }
  0xb2   : > { %2360 = vmatmul.mubr.bf16.gmra.mrb[4].mxu0 %v7812_v58  ;;  %v7843_v44 = vsel %vm1762_vm11, %v7335_v35, %v1737_v13  ;;  %v6973_v30 = vld [vmem:[%s9722_s3 + $0xe0] sm:$0xff]  }
  0xb3   : > { %v1274_v23 = vld [vmem:[#allocation2 + $0xc4] sm:$0xf]  ;;  %6329 = vmatprep.mubr.msk.bf16.mxu0 %vm1762_vm11, %v7817_v63  ;;  %2940 = vmatpush1.bf16.msra.mxu0 %v6968_v61 }
  0xb4   : > { %v1297_v3 = vld [vmem:[#allocation2 + $0xc8] sm:$0x1]  ;;  %v7819_v7 = vcombine.low %v1273_v48, %v1274_v23  ;;  %v1980_v0 = vrot.slane %v1274_v23, 5  ;;  %2941 = vmatprep.subr.bf16.mxu0 %v9728_v5 }
  0xb5   : > { %v6247_v54 = vcombine.low %v1297_v3, %v1297_v3  ;;  %v1983_v8 = vrot.slane %v1297_v3, 5  ;;  %v6975_v3 = vld [vmem:[%s9722_s3 + $0xf0] sm:$0xff]  }
  0xb6   : > { %v1675_v11 = vshrl.u32 %v7819_v7, 16  ;;  %v1677_v51 = vshll.u32 %v7819_v7, 16  ;;  %v1981_v14 = vsel %vm7271_vm13, %v6267_v59, %v1980_v0  ;;  %v1982_v20 = vrot.slane %v1980_v0, 4  ;;  %v6977_v0 = vld [vmem:[%s9722_s3 + $0x100] sm:$0xff]  }
  0xb7   : > { %v1682_v12 = vshll.u32 %v6247_v54, 16  ;;  %v1277_v41 = vld [vmem:[#allocation2 + $0xd8] sm:$0xf]  ;;  %2942 = vmatpush1.bf16.msra.mxu0 %v6972_v6 }
  0xb8   : > { %v1299_v2 = vld [vmem:[#allocation2 + $0xe0] sm:$0x1]  ;;  %v1679_v27 = vrot.slane %v1677_v51, 1  ;;  %v1319_v19 = vld [vmem:[#allocation2 + $0xd8] sm:$0xe]  ;;  %v7836_v53 = vcombine.low %v1277_v41, %v1278_v55  ;;  %v1984_v34 = vsel %vm7271_vm13, %v1982_v20, %v1983_v8  ;;  %2943 = vmatprep.subr.bf16.mxu0 %v9728_v5  ;;  %v6978_v51 = vld [vmem:[%s9722_s3 + $0x108] sm:$0xff]  }
  0xb9   : > { %v1684_v57 = vrot.slane %v1682_v12, 1  ;;  %v6249_v33 = vcombine.low %v1299_v2, %v1299_v2  ;;  %v6269_v32 = vrot.slane %v1319_v19, 9  ;;  %v1997_v38 = vrot.slane %v1299_v2, 5  ;;  %v6976_v54 = vld [vmem:[%s9722_s3 + $0xf8] sm:$0xff]   ;;  %v7903_v2 = vld [vmem:[#allocation3 + $0x58] sm:$0xff] }
  0xba   : > { %v1680_v42 = vor.u32 %v1679_v27, %v1675_v11  ;;  %v6287_v43 = vcombine.low %v1981_v14, %v1984_v34  ;;  %v1699_v45 = vshrl.u32 %v7836_v53, 16  ;;  %v1701_v39 = vshll.u32 %v7836_v53, 16  ;;  %v7876_v8 = vld [vmem:[#allocation3 + $0x48] sm:$0xff]  ;;  %v6979_v14 = vld [vmem:[%s9722_s3 + $0x110] sm:$0xff]  }
  0xbb   : > { %v1706_v24 = vshll.u32 %v6249_v33, 16  ;;  %v1995_v55 = vsel %vm7271_vm13, %v6269_v32, %v1994_v60  ;;  %v1998_v10 = vsel %vm7271_vm13, %v1996_v26, %v1997_v38  ;;  %v6974_v60 = vld [vmem:[%s9722_s3 + $0xe8] sm:$0xff]   ;;  %2944 = vmatpush1.bf16.msra.mxu0 %v6973_v30  ;;  %v7915_v26 = vld [vmem:[#allocation3 + $0x68] sm:$0xff] }
  0xbc   : > { %v1685_v25 = vsel %vm1481_vm12, %v1680_v42, %v1684_v57  ;;  %2102 = vst.msk [vmem:[#allocation3 + $0x108] sm:$0xff] %vm1762_vm11, %v6287_v43  ;;  %v6289_v35 = vcombine.low %v1995_v55, %v1998_v10  ;;  %v1703_v48 = vrot.slane %v1701_v39, 1  ;;  %2945 = vmatprep.subr.bf16.mxu0 %v9728_v5  ;;  %v608_v57 = vld [vmem:[#allocation2 + $0xec] sm:$0x1]  ;;  %v1280_v30 = vld [vmem:[#allocation2 + $0xe8] sm:$0xf] }
  0xbd   : > { %1754 = vrot.lane.b32.xlu1 %v1685_v25, %s7095_s0  ;;  %v1708_v59 = vrot.slane %v1706_v24, 1  ;;  %v609_v19 = vsel %vm7172_vm5, 0, %v608_v57  ;;  %v2001_v24 = vrot.slane %v1280_v30, 5 }
  0xbe   : > { %2104 = vst.msk [vmem:[#allocation3 + $0x128] sm:$0xff] %vm1762_vm11, %v6289_v35  ;;  %v1704_v61 = vor.u32 %v1703_v48, %v1699_v45  ;;  %610 = vst [vmem:[#allocation2 + $0xec] sm:$0x1] %v609_v19 }
  0xbf   : > { %2946 = vmatpush1.bf16.msra.mxu0 %v6974_v60 }
  0xc0   : > { %v1709_v23 = vsel %vm1481_vm12, %v1704_v61, %v1708_v59  ;;  %2947 = vmatprep.subr.bf16.mxu0 %v9728_v5  ;;  %v2003_v59 = vrot.slane %v2001_v24, 4 }
  0xc1   : > { %1758 = vrot.lane.b32.xlu1 %v1709_v23, %s7095_s0 }
  0xc3   : > { %2948 = vmatpush1.bf16.msra.mxu0 %v6975_v3 }
  0xc4   : > { %2949 = vmatprep.subr.bf16.mxu0 %v9728_v5 }
  0xc5   : > { %v1176_v38 = vld [vmem:[#allocation2 + $0xec] sm:$0x1] }
  0xc6   : > { %v1729_v50 = vpop.permute.xlu1 %1728  ;;  %v1177_v42 = vsel %vm7165_vm2, 0, %v1176_v38 }
  0xc7   : > { %2950 = vmatpush1.bf16.msra.mxu0 %v6976_v54  ;;  %v7881_v11 = vsel %vm1762_vm11, %v7449_v37, %v1729_v50  ;;  %1178 = vst [vmem:[#allocation2 + $0xec] sm:$0x1] %v1177_v42 }
  0xc8   : > { %2951 = vmatprep.subr.bf16.mxu0 %v9728_v5  ;;  %2368 = vmatmul.mubr.bf16.gmra.mrb[8].mxu0 %v7881_v11 }
  0xc9   : > { %6330 = vmatprep.mubr.msk.bf16.mxu0 %vm1762_vm11, %v7876_v8 }
  0xca   : > { %v1741_v12 = vpop.permute.xlu0 %1740 }
  0xcb   : > { %2952 = vmatpush1.bf16.msra.mxu0 %v6977_v0  ;;  %v7892_v6 = vsel %vm1762_vm11, %v7467_v62, %v1741_v12 }
  0xcc   : > { %2953 = vmatprep.subr.bf16.mxu0 %v9728_v5 }
  0xce   : > { %v1745_v37 = vpop.permute.xlu0 %1744  ;;  %v1300_v48 = vld [vmem:[#allocation2 + $0xec] sm:$0x1] }
  0xcf   : > { %2954 = vmatpush1.bf16.msra.mxu0 %v6978_v51  ;;  %v7900_v20 = vsel %vm1762_vm11, %v7479_v22, %v1745_v37  ;;  %v6980_v22 = vld [vmem:[%s9722_s3 + $0x118] sm:$0xff]   ;;  %v6250_v60 = vcombine.low %v1300_v48, %v1300_v48  ;;  %v2004_v3 = vrot.slane %v1300_v48, 5 }
  0xd0   : > { %2955 = vmatprep.subr.bf16.mxu0 %v9728_v5  ;;  %v8071_v48 = vld [vmem:[#allocation3 + $0x128] sm:$0xff] }
  0xd1   : > { %v1718_v0 = vshll.u32 %v6250_v60, 16  ;;  %v2005_v50 = vsel %vm7271_vm13, %v2003_v59, %v2004_v3 }
  0xd3   : > { %2956 = vmatpush1.bf16.msra.mxu0 %v6979_v14  ;;  %v1731_v41 = vpop.permute.xlu1 %1730  ;;  %v1720_v37 = vrot.slane %v1718_v0, 1 }
  0xd4   : > { %2957 = vmatprep.subr.bf16.mxu0 %v9728_v5  ;;  %v7907_v62 = vsel %vm1762_vm11, %v7494_v52, %v1731_v41  ;;  %v546_v52 = vld [vmem:[#allocation2 + $0xe4] sm:$0x1]  ;;  %v7055_v41 = vld [vmem:[#allocation3 + $0x18] sm:$0xff] }
  0xd5   : > { %2376 = vmatmul.mubr.bf16.gmra.mrb[12].mxu0 %v7907_v62  ;;  %v547_v27 = vsel %vm7165_vm2, 0, %v546_v52 }
  0xd6   : > { %6331 = vmatprep.mubr.msk.bf16.mxu0 %vm1762_vm11, %v7903_v2  ;;  %548 = vst [vmem:[#allocation2 + $0xe4] sm:$0x1] %v547_v27  ;;  %v7955_v27 = vld [vmem:[#allocation3 + $0x78] sm:$0xff] }
  0xd7   : > { %2958 = vmatpush1.bf16.msra.mxu0 %v6980_v22 }
  0xd8   : > { %5572 = vmatprep.subr.bf16.mxu0 %v9728_v5 }
  0xdd   : > { %2384 = vmatmul.mubr.bf16.gmra.mrb[16].mxu0 %v7832_v21  ;;  %v1172_v13 = vld [vmem:[#allocation2 + $0xe4] sm:$0xf] }
  0xde   : > { %6332 = vmatprep.mubr.msk.bf16.mxu0 %vm1762_vm11, %v7915_v26  ;;  %v1173_v32 = vsel %vm7206_vm6, 0, %v1172_v13 }
  0xdf   : > { %1174 = vst [vmem:[#allocation2 + $0xe4] sm:$0xf] %v1173_v32  ;;  %v7991_v32 = vld [vmem:[#allocation3 + $0xa8] sm:$0xff] }
  0xe6   : > { %v1279_v55 = vld [vmem:[#allocation2 + $0xe4] sm:$0xf] }
  0xe7   : > { %v1320_v10 = vld [vmem:[#allocation2 + $0xe4] sm:$0xe]  ;;  %v7941_v25 = vcombine.low %v1279_v55, %v1280_v30 }
  0xe8   : > { %v1749_v33 = vpop.permute.xlu0 %1748  ;;  %v6270_v35 = vrot.slane %v1320_v10, 9  ;;  %v8039_v10 = vld [vmem:[#allocation3 + $0xe8] sm:$0xff] }
  0xe9   : > { %v7927_v34 = vsel %vm1762_vm11, %v7560_v49, %v1749_v33  ;;  %v1711_v61 = vshrl.u32 %v7941_v25, 16 }
  0xea   : > { %v2002_v23 = vsel %vm7271_vm13, %v6270_v35, %v2001_v24  ;;  %v8063_v35 = vld [vmem:[#allocation3 + $0x118] sm:$0xff] }
  0xeb   : > { %v6290_v14 = vcombine.low %v2002_v23, %v2005_v50 }
  0xed   : > { %2105 = vst.msk [vmem:[#allocation3 + $0x138] sm:$0xff] %vm1762_vm11, %v6290_v14  ;;  %v3304_v14 = vld [vmem:[#allocation4 + $0xc] sm:$0x1] }
  0xee   : > { %v1753_v43 = vpop.permute.xlu0 %1752 }
  0xef   : > { %v7935_v45 = vsel %vm1762_vm11, %v7579_v15, %v1753_v43  ;;  %v1713_v15 = vshll.u32 %v7941_v25, 16 }
  0xf1   : > { %v1715_v54 = vrot.slane %v1713_v15, 1 }
  0xf2   : > { %v1757_v39 = vpop.permute.xlu0 %1756 }
  0xf3   : > { %v7939_v49 = vsel %vm1762_vm11, %v7600_v47, %v1757_v39  ;;  %v1716_v12 = vor.u32 %v1715_v54, %v1711_v61  ;;  %v8027_v39 = vld [vmem:[#allocation3 + $0xd8] sm:$0xff] }
  0xf5   : > { %v1721_v22 = vsel %vm1481_vm12, %v1716_v12, %v1720_v37  ;;  %v3355_v12 = vld [vmem:[#allocation4 + $0x8] sm:$0x1] }
  0xf6   : > { %1760 = vrot.lane.b32.xlu1 %v1721_v22, %s7095_s0  ;;  %v3356_v37 = vsel %vm7172_vm5, 0, %v3355_v12 }
  0xf7   : > { %3357 = vst [vmem:[#allocation4 + $0x8] sm:$0x1] %v3356_v37 }
  0xfa   : > { %v1723_v47 = vpop.permute.xlu0 %1722 }
  0xfb   : > { %v1764_v51 = vsel %vm1762_vm11, %v7624_v28, %v1723_v47  ;;  %v7967_v28 = vld [vmem:[#allocation3 + $0x88] sm:$0xff] }
  0xfc   : > { %2604 = vmatmul.mubr.bf16.vlgmr.msra.gmra.mrb[0].mxu1 %v1764_v51 }
  0xfd   : > { %6358 = vmatprep.mubr.msk.bf16.mxu1 %vm1762_vm11, %v7055_v41  ;;  %v3358_v41 = vld [vmem:[#allocation4 + $0x14] sm:$0x1] }
  0xfe   : > { %v3359_v22 = vsel %vm7172_vm5, 0, %v3358_v41 }
  0xff   : > { %3360 = vst [vmem:[#allocation4 + $0x14] sm:$0x1] %v3359_v22  ;;  %v3316_v22 = vld [vmem:[#allocation4 + $0x3c] sm:$0x1] }
 0x100   : > { %v1735_v52 = vpop.permute.xlu1 %1734 }
 0x101   : > { %v7959_v57 = vsel %vm1762_vm11, %v7638_v46, %v1735_v52 }
 0x102   : > { %2392 = vmatmul.mubr.bf16.gmra.mrb[20].mxu0 %v7959_v57 }
 0x103   : > { %6333 = vmatprep.mubr.msk.bf16.mxu0 %vm1762_vm11, %v7955_v27 }
 0x104   : > { %2612 = vmatmul.mubr.bf16.gmra.mrb[4].mxu1 %v7794_v31  ;;  %v7979_v31 = vld [vmem:[#allocation3 + $0x98] sm:$0xff] }
 0x105   : > { %6359 = vmatprep.mubr.msk.bf16.mxu1 %vm1762_vm11, %v7787_v29 }
 0x10a   : > { %2400 = vmatmul.mubr.bf16.gmra.mrb[24].mxu0 %v7843_v44 }
 0x10b   : > { %6334 = vmatprep.mubr.msk.bf16.mxu0 %vm1762_vm11, %v7967_v28 }
 0x10c   : > { %2620 = vmatmul.mubr.bf16.gmra.mrb[8].mxu1 %v7812_v58 }
 0x10d   : > { %6360 = vmatprep.mubr.msk.bf16.mxu1 %vm1762_vm11, %v7817_v63 }
 0x10f   : > { %v1739_v46 = vpop.permute.xlu1 %1738 }
 0x110   : > { %v7977_v19 = vsel %vm1762_vm11, %v7714_v56, %v1739_v46 }
 0x112   : > { %2408 = vmatmul.mubr.bf16.gmra.mrb[28].mxu0 %v7977_v19 }
 0x113   : > { %6335 = vmatprep.mubr.msk.bf16.mxu0 %vm1762_vm11, %v7979_v31 }
 0x114   : > { %2628 = vmatmul.mubr.bf16.gmra.mrb[12].mxu1 %v7881_v11 }
 0x115   : > { %6361 = vmatprep.mubr.msk.bf16.mxu1 %vm1762_vm11, %v7876_v8 }
 0x116   : > { %v1743_v33 = vpop.permute.xlu1 %1742 }
 0x117   : > { %v7987_v13 = vsel %vm1762_vm11, %v7730_v36, %v1743_v33  ;;  %v8003_v36 = vld [vmem:[#allocation3 + $0xb8] sm:$0xff] }
 0x11a   : > { %2416 = vmatmul.mubr.bf16.gmra.mrb[32].mxu0 %v7892_v6 }
 0x11b   : > { %6336 = vmatprep.mubr.msk.bf16.mxu0 %vm1762_vm11, %v7991_v32 }
 0x11c   : > { %v1747_v56 = vpop.permute.xlu1 %1746  ;;  %2636 = vmatmul.mubr.bf16.gmra.mrb[16].mxu1 %v7907_v62 }
 0x11d   : > { %v7996_v38 = vsel %vm1762_vm11, %v7752_v16, %v1747_v56  ;;  %6362 = vmatprep.mubr.msk.bf16.mxu1 %vm1762_vm11, %v7903_v2  ;;  %v8015_v16 = vld [vmem:[#allocation3 + $0xc8] sm:$0xff]  ;;  %v3361_v56 = vld [vmem:[#allocation4 + $0x20] sm:$0x1] }
 0x122   : > { %2424 = vmatmul.mubr.bf16.gmra.mrb[36].mxu0 %v7987_v13 }
 0x123   : > { %v1751_v42 = vpop.permute.xlu1 %1750  ;;  %6337 = vmatprep.mubr.msk.bf16.mxu0 %vm1762_vm11, %v8003_v36 }
 0x124   : > { %v8008_v43 = vsel %vm1762_vm11, %v7773_v9, %v1751_v42  ;;  %2644 = vmatmul.mubr.bf16.gmra.mrb[20].mxu1 %v7832_v21 }
 0x125   : > { %6363 = vmatprep.mubr.msk.bf16.mxu1 %vm1762_vm11, %v7915_v26 }
 0x12a   : > { %2432 = vmatmul.mubr.bf16.gmra.mrb[40].mxu0 %v7900_v20 }
 0x12b   : > { %6338 = vmatprep.mubr.msk.bf16.mxu0 %vm1762_vm11, %v8015_v16 }
 0x12c   : > { %2652 = vmatmul.mubr.bf16.gmra.mrb[24].mxu1 %v7959_v57 }
 0x12d   : > { %6364 = vmatprep.mubr.msk.bf16.mxu1 %vm1762_vm11, %v7955_v27 }
 0x12f   : > { %v1755_v9 = vpop.permute.xlu1 %1754 }
 0x130   : > { %v8025_v30 = vsel %vm1762_vm11, %v7819_v7, %v1755_v9  ;;  %v8047_v7 = vld [vmem:[#allocation3 + $0xf8] sm:$0xff] }
 0x132   : > { %2440 = vmatmul.mubr.bf16.gmra.mrb[44].mxu0 %v7996_v38 }
 0x133   : > { %v1759_v24 = vpop.permute.xlu1 %1758  ;;  %6339 = vmatprep.mubr.msk.bf16.mxu0 %vm1762_vm11, %v8027_v39 }
 0x134   : > { %v8034_v55 = vsel %vm1762_vm11, %v7836_v53, %v1759_v24  ;;  %2660 = vmatmul.mubr.bf16.gmra.mrb[28].mxu1 %v7843_v44  ;;  %v8055_v53 = vld [vmem:[#allocation3 + $0x108] sm:$0xff] }
 0x135   : > { %6365 = vmatprep.mubr.msk.bf16.mxu1 %vm1762_vm11, %v7967_v28 }
 0x13a   : > { %2448 = vmatmul.mubr.bf16.gmra.mrb[48].mxu0 %v7927_v34 }
 0x13b   : > { %6340 = vmatprep.mubr.msk.bf16.mxu0 %vm1762_vm11, %v8039_v10 }
 0x13c   : > { %2668 = vmatmul.mubr.bf16.gmra.mrb[32].mxu1 %v7977_v19 }
 0x13d   : > { %6366 = vmatprep.mubr.msk.bf16.mxu1 %vm1762_vm11, %v7979_v31 }
 0x142   : > { %2456 = vmatmul.mubr.bf16.gmra.mrb[52].mxu0 %v8008_v43 }
 0x143   : > { %6341 = vmatprep.mubr.msk.bf16.mxu0 %vm1762_vm11, %v8047_v7 }
 0x144   : > { %2676 = vmatmul.mubr.bf16.gmra.mrb[36].mxu1 %v7892_v6 }
 0x145   : > { %6367 = vmatprep.mubr.msk.bf16.mxu1 %vm1762_vm11, %v7991_v32 }
 0x14a   : > { %2464 = vmatmul.mubr.bf16.gmra.mrb[56].mxu0 %v7935_v45 }
 0x14b   : > { %6342 = vmatprep.mubr.msk.bf16.mxu0 %vm1762_vm11, %v8055_v53 }
 0x14c   : > { %2684 = vmatmul.mubr.bf16.gmra.mrb[40].mxu1 %v7987_v13 }
 0x14d   : > { %6368 = vmatprep.mubr.msk.bf16.mxu1 %vm1762_vm11, %v8003_v36 }
 0x152   : > { %2472 = vmatmul.mubr.bf16.gmra.mrb[60].mxu0 %v8025_v30 }
 0x153   : > { %6343 = vmatprep.mubr.msk.bf16.mxu0 %vm1762_vm11, %v8063_v35 }
 0x154   : > { %2692 = vmatmul.mubr.bf16.gmra.mrb[44].mxu1 %v7900_v20 }
 0x155   : > { %6369 = vmatprep.mubr.msk.bf16.mxu1 %vm1762_vm11, %v8015_v16 }
 0x15a   : > { %2480 = vmatmul.mubr.bf16.gmra.mrb[64].mxu0 %v7939_v49 }
 0x15b   : > { %6344 = vmatprep.mubr.msk.bf16.mxu0 %vm1762_vm11, %v8071_v48 }
 0x15c   : > { %2700 = vmatmul.mubr.bf16.gmra.mrb[48].mxu1 %v7996_v38 }
 0x15d   : > { %6370 = vmatprep.mubr.msk.bf16.mxu1 %vm1762_vm11, %v8027_v39 }
 0x162   : > { %2488 = vmatmul.mubr.bf16.gmra.mrb[68].mxu0 %v8034_v55 }
 0x163   : > { %6411 = vmatprep.mubr.msk.bf16.mxu0 %vm1762_vm11, %v7787_v29 }
 0x164   : > { %2708 = vmatmul.mubr.bf16.gmra.mrb[52].mxu1 %v7927_v34 }
 0x165   : > { %6371 = vmatprep.mubr.msk.bf16.mxu1 %vm1762_vm11, %v8039_v10 }
 0x168   : > { %v1761_v59 = vpop.permute.xlu1 %1760 }
 0x169   : > { %v8093_v60 = vsel %vm1762_vm11, %v7941_v25, %v1761_v59 }
 0x16a   : > { %2968 = vmatmul.mubr.bf16.vlgmr.msra.gmra.mrb[72].mxu0 %v7812_v58 }
 0x16b   : > { %6412 = vmatprep.mubr.msk.bf16.mxu0 %vm1762_vm11, %v7817_v63 }
 0x16c   : > { %2716 = vmatmul.mubr.bf16.gmra.mrb[56].mxu1 %v8008_v43 }
 0x16d   : > { %6372 = vmatprep.mubr.msk.bf16.mxu1 %vm1762_vm11, %v8047_v7 }
 0x172   : > { %2976 = vmatmul.mubr.bf16.gmra.mrb[76].mxu0 %v7881_v11 }
 0x173   : > { %6413 = vmatprep.mubr.msk.bf16.mxu0 %vm1762_vm11, %v7876_v8 }
 0x174   : > { %2724 = vmatmul.mubr.bf16.gmra.mrb[60].mxu1 %v7935_v45 }
 0x175   : > { %6373 = vmatprep.mubr.msk.bf16.mxu1 %vm1762_vm11, %v8055_v53 }
 0x17a   : > { %2984 = vmatmul.mubr.bf16.gmra.mrb[80].mxu0 %v7907_v62 }
 0x17b   : > { %6414 = vmatprep.mubr.msk.bf16.mxu0 %vm1762_vm11, %v7903_v2 }
 0x17c   : > { %2732 = vmatmul.mubr.bf16.gmra.mrb[64].mxu1 %v8025_v30 }
 0x17d   : > { %6374 = vmatprep.mubr.msk.bf16.mxu1 %vm1762_vm11, %v8063_v35  ;;  %v2353_v29 = vpop.f32.mrb[0].mxu0 }
 0x17e   : > { %v2355_v58 = vpop.f32.mrb[1].mxu0 }
 0x17f   : > { %v2356_v63 = vpop.f32.mrb[2].mxu0 }
 0x180   : > { %v2358_v8 = vpop.f32.mrb[3].mxu0 }
 0x182   : > { %2992 = vmatmul.mubr.bf16.gmra.mrb[84].mxu0 %v7832_v21 }
 0x183   : > { %6415 = vmatprep.mubr.msk.bf16.mxu0 %vm1762_vm11, %v7915_v26 }
 0x184   : > { %2740 = vmatmul.mubr.bf16.gmra.mrb[68].mxu1 %v7939_v49 }
 0x185   : > { %v8111_v11 = vpop.f32.mrb[4].mxu0 }
 0x186   : > { %v2363_v62 = vpop.f32.mrb[5].mxu0 }
 0x187   : > { %v8113_v2 = vpop.f32.mrb[6].mxu0 }
 0x188   : > { %v2366_v25 = vpop.f32.mrb[7].mxu0 }
 0x18a   : > { %3000 = vmatmul.mubr.bf16.gmra.mrb[88].mxu0 %v7959_v57 }
 0x18b   : > { %6416 = vmatprep.mubr.msk.bf16.mxu0 %vm1762_vm11, %v7955_v27 }
 0x192   : > { %3008 = vmatmul.mubr.bf16.gmra.mrb[92].mxu0 %v7843_v44 }
 0x193   : > { %6417 = vmatprep.mubr.msk.bf16.mxu0 %vm1762_vm11, %v7967_v28 }
 0x19a   : > { %3016 = vmatmul.mubr.bf16.gmra.mrb[96].mxu0 %v7977_v19 }
 0x19b   : > { %6418 = vmatprep.mubr.msk.bf16.mxu0 %vm1762_vm11, %v7979_v31  ;;  %v8124_v21 = vpop.f32.mrb[8].mxu0  ;;  %v3307_v31 = vld [vmem:[#allocation4 + $0x18] sm:$0x1] }
 0x19c   : > { %v2371_v26 = vpop.f32.mrb[9].mxu0 }
 0x19d   : > { %v8126_v61 = vpop.f32.mrb[10].mxu0 }
 0x19e   : > { %v2374_v15 = vpop.f32.mrb[11].mxu0 }
 0x19f   : > { %v3313_v15 = vld [vmem:[#allocation4 + $0x30] sm:$0x1] }
 0x1a2   : > { %3024 = vmatmul.mubr.bf16.gmra.mrb[100].mxu0 %v7892_v6 }
 0x1a3   : > { %6419 = vmatprep.mubr.msk.bf16.mxu0 %vm1762_vm11, %v7991_v32 }
 0x1a8   : > { %v8134_v44 = vpop.f32.mrb[12].mxu0 }
 0x1a9   : > { %v2379_v23 = vpop.f32.mrb[13].mxu0 }
 0x1aa   : > { %3032 = vmatmul.mubr.bf16.gmra.mrb[104].mxu0 %v7987_v13  ;;  %v8136_v3 = vpop.f32.mrb[14].mxu0  ;;  %v3308_v13 = vsel %vm7165_vm2, 0, %v3307_v31  ;;  %v3370_v31 = vld [vmem:[#allocation4 + $0x44] sm:$0x1] }
 0x1ab   : > { %6420 = vmatprep.mubr.msk.bf16.mxu0 %vm1762_vm11, %v8003_v36  ;;  %v2382_v54 = vpop.f32.mrb[15].mxu0  ;;  %3309 = vst [vmem:[#allocation4 + $0x18] sm:$0x1] %v3308_v13 }
 0x1b0   : > { %v8141_v6 = vpop.f32.mrb[16].mxu0 }
 0x1b1   : > { %v2387_v0 = vpop.f32.mrb[17].mxu0 }
 0x1b2   : > { %3040 = vmatmul.mubr.bf16.gmra.mrb[108].mxu0 %v7900_v20  ;;  %v8143_v47 = vpop.f32.mrb[18].mxu0  ;;  %v3301_v20 = vld [vmem:[#allocation4] sm:$0x1]  ;;  %v6983_v0 = vld [vmem:[%s9724_s5 + $0x60] sm:$0xff]  }
 0x1b3   : > { %6421 = vmatprep.mubr.msk.bf16.mxu0 %vm1762_vm11, %v8015_v16  ;;  %v2390_v50 = vpop.f32.mrb[19].mxu0  ;;  %v3302_v51 = vsel %vm7165_vm2, 0, %v3301_v20  ;;  %4999 = vmatpush1.bf16.msra.mxu1 %v6983_v0 }
 0x1b4   : > { %3303 = vst [vmem:[#allocation4] sm:$0x1] %v3302_v51  ;;  %v3367_v51 = vld [vmem:[#allocation4 + $0x38] sm:$0x1]  ;;  %5000 = vmatprep.subr.bf16.mxu1 %v9728_v5 }
 0x1b5   : > { %v3368_v37 = vsel %vm7172_vm5, 0, %v3367_v51 }
 0x1b6   : > { %3369 = vst [vmem:[#allocation4 + $0x38] sm:$0x1] %v3368_v37 }
 0x1ba   : > { %3048 = vmatmul.mubr.bf16.gmra.mrb[112].mxu0 %v7996_v38 }
 0x1bb   : > { %6422 = vmatprep.mubr.msk.bf16.mxu0 %vm1762_vm11, %v8027_v39 }
 0x1c2   : > { %3056 = vmatmul.mubr.bf16.gmra.mrb[116].mxu0 %v7927_v34  ;;  %v3305_v34 = vsel %vm7165_vm2, 0, %v3304_v14 }
 0x1c3   : > { %6423 = vmatprep.mubr.msk.bf16.mxu0 %vm1762_vm11, %v8039_v10  ;;  %3306 = vst [vmem:[#allocation4 + $0xc] sm:$0x1] %v3305_v34  ;;  %v3310_v10 = vld [vmem:[#allocation4 + $0x24] sm:$0x1] }
 0x1ca   : > { %3064 = vmatmul.mubr.bf16.gmra.mrb[120].mxu0 %v8008_v43 }
 0x1cb   : > { %6424 = vmatprep.mubr.msk.bf16.mxu0 %vm1762_vm11, %v8047_v7 }
 0x1cf   : > { %v2605_v52 = vpop.f32.mrb[0].mxu1 }
 0x1d0   : > { %v8162_v27 = vadd.f32 %v2605_v52, %v2353_v29  ;;  %v2607_v57 = vpop.f32.mrb[1].mxu1 }
 0x1d1   : > { %v2608_v28 = vpop.f32.mrb[2].mxu1 }
 0x1d2   : > { %3072 = vmatmul.mubr.bf16.gmra.mrb[124].mxu0 %v7935_v45  ;;  %v8165_v46 = vadd.f32 %v2608_v28, %v2356_v63  ;;  %v2610_v19 = vpop.f32.mrb[3].mxu1  ;;  %v3362_v45 = vsel %vm7172_vm5, 0, %v3361_v56  ;;  %v3317_v28 = vsel %vm7165_vm2, 0, %v3316_v22 }
 0x1d3   : > { %6425 = vmatprep.mubr.msk.bf16.mxu0 %vm1762_vm11, %v8055_v53  ;;  %3363 = vst [vmem:[#allocation4 + $0x20] sm:$0x1] %v3362_v45  ;;  %v3311_v53 = vsel %vm7165_vm2, 0, %v3310_v10  ;;  %3318 = vst [vmem:[#allocation4 + $0x3c] sm:$0x1] %v3317_v28  ;;  %v6984_v45 = vld [vmem:[%s9724_s5 + $0x68] sm:$0xff]  }
 0x1d4   : > { %3312 = vst [vmem:[#allocation4 + $0x24] sm:$0x1] %v3311_v53  ;;  %5001 = vmatpush1.bf16.msra.mxu1 %v6984_v45 }
 0x1d5   : > { %v8169_v33 = vpop.f32.mrb[20].mxu0  ;;  %5002 = vmatprep.subr.bf16.mxu1 %v9728_v5 }
 0x1d6   : > { %v2395_v32 = vpop.f32.mrb[21].mxu0 }
 0x1d7   : > { %v8173_v38 = vpop.f32.mrb[22].mxu0  ;;  %v2613_v36 = vpop.f32.mrb[4].mxu1  ;;  %v3371_v32 = vsel %vm7172_vm5, 0, %v3370_v31  ;;  %v3325_v31 = vld [vmem:[#allocation4 + $0x60] sm:$0x1] }
 0x1d8   : > { %v2398_v42 = vpop.f32.mrb[23].mxu0  ;;  %v8178_v43 = vadd.f32 %v2613_v36, %v8111_v11  ;;  %v2615_v16 = vpop.f32.mrb[5].mxu1  ;;  %v3364_v11 = vld [vmem:[#allocation4 + $0x2c] sm:$0x1]  ;;  %3372 = vst [vmem:[#allocation4 + $0x44] sm:$0x1] %v3371_v32 }
 0x1d9   : > { %v2616_v9 = vpop.f32.mrb[6].mxu1 }
 0x1da   : > { %3080 = vmatmul.mubr.bf16.gmra.mrb[128].mxu0 %v8025_v30  ;;  %v8182_v39 = vadd.f32 %v2616_v9, %v8113_v2  ;;  %v2618_v24 = vpop.f32.mrb[7].mxu1 }
 0x1db   : > { %6426 = vmatprep.mubr.msk.bf16.mxu0 %vm1762_vm11, %v8063_v35  ;;  %v3365_v35 = vsel %vm7172_vm5, 0, %v3364_v11 }
 0x1dc   : > { %3366 = vst [vmem:[#allocation4 + $0x2c] sm:$0x1] %v3365_v35 }
 0x1dd   : > { %v8186_v7 = vpop.f32.mrb[24].mxu0 }
 0x1de   : > { %v2403_v59 = vpop.f32.mrb[25].mxu0 }
 0x1df   : > { %v8190_v29 = vpop.f32.mrb[26].mxu0  ;;  %v2621_v58 = vpop.f32.mrb[8].mxu1 }
 0x1e0   : > { %v2406_v63 = vpop.f32.mrb[27].mxu0  ;;  %v8193_v30 = vadd.f32 %v2621_v58, %v8124_v21  ;;  %v2623_v8 = vpop.f32.mrb[9].mxu1  ;;  %v3319_v58 = vld [vmem:[#allocation4 + $0x48] sm:$0x1] }
 0x1e1   : > { %v2624_v62 = vpop.f32.mrb[10].mxu1  ;;  %v3320_v63 = vsel %vm7165_vm2, 0, %v3319_v58  ;;  %v3379_v58 = vld [vmem:[#allocation4 + $0x68] sm:$0x1] }
 0x1e2   : > { %3088 = vmatmul.mubr.bf16.gmra.mrb[132].mxu0 %v7939_v49  ;;  %v8199_v2 = vadd.f32 %v2624_v62, %v8126_v61  ;;  %v2626_v25 = vpop.f32.mrb[11].mxu1  ;;  %v3314_v49 = vsel %vm7165_vm2, 0, %v3313_v15  ;;  %3321 = vst [vmem:[#allocation4 + $0x48] sm:$0x1] %v3320_v63 }
 0x1e3   : > { %6427 = vmatprep.mubr.msk.bf16.mxu0 %vm1762_vm11, %v8071_v48  ;;  %v2783_v48 = vld [vmem:[#allocation3 + $0x138] sm:$0xff]  ;;  %3315 = vst [vmem:[#allocation4 + $0x30] sm:$0x1] %v3314_v49  ;;  %v3373_v25 = vld [vmem:[#allocation4 + $0x50] sm:$0x1] }
 0x1e5   : > { %v8203_v26 = vpop.f32.mrb[28].mxu0 }
 0x1e6   : > { %v2411_v21 = vpop.f32.mrb[29].mxu0 }
 0x1e7   : > { %v8205_v23 = vpop.f32.mrb[30].mxu0  ;;  %v2629_v54 = vpop.f32.mrb[12].mxu1 }
 0x1e8   : > { %v2414_v61 = vpop.f32.mrb[31].mxu0  ;;  %v8213_v50 = vadd.f32 %v2629_v54, %v8134_v44  ;;  %v2631_v20 = vpop.f32.mrb[13].mxu1  ;;  %v3374_v54 = vsel %vm7172_vm5, 0, %v3373_v25 }
 0x1e9   : > { %v2632_v12 = vpop.f32.mrb[14].mxu1  ;;  %3375 = vst [vmem:[#allocation4 + $0x50] sm:$0x1] %v3374_v54  ;;  %v3322_v20 = vld [vmem:[#allocation4 + $0x54] sm:$0x1] }
 0x1ea   : > { %3096 = vmatmul.mubr.bf16.gmra.mrb[136].mxu0 %v8034_v55  ;;  %v8219_v14 = vadd.f32 %v2632_v12, %v8136_v3  ;;  %v2634_v34 = vpop.f32.mrb[15].mxu1 }
 0x1eb   : > { %6428 = vmatprep.mubr.msk.bf16.mxu0 %vm1762_vm11, %v2783_v48  ;;  %v3323_v48 = vsel %vm7165_vm2, 0, %v3322_v20 }
 0x1ec   : > { %3324 = vst [vmem:[#allocation4 + $0x54] sm:$0x1] %v3323_v48 }
 0x1ed   : > { %v8223_v44 = vpop.f32.mrb[32].mxu0 }
 0x1ee   : > { %v2419_v41 = vpop.f32.mrb[33].mxu0 }
 0x1ef   : > { %v8225_v52 = vpop.f32.mrb[34].mxu0  ;;  %v2637_v57 = vpop.f32.mrb[16].mxu1 }
 0x1f0   : > { %v2422_v55 = vpop.f32.mrb[35].mxu0  ;;  %v8230_v3 = vadd.f32 %v2637_v57, %v8141_v6  ;;  %v2639_v19 = vpop.f32.mrb[17].mxu1 }
 0x1f1   : > { %v2640_v13 = vpop.f32.mrb[18].mxu1  ;;  %v3376_v55 = vld [vmem:[#allocation4 + $0x5c] sm:$0x1]  ;;  %v6990_v19 = vld [vmem:[%s9724_s5 + $0x78] sm:$0xff]  }
 0x1f2   : > { %3104 = vmatmul.mubr.bf16.gmra.mrb[140].mxu0 %v8093_v60  ;;  %v8236_v56 = vadd.f32 %v2640_v13, %v8143_v47  ;;  %v2642_v36 = vpop.f32.mrb[19].mxu1  ;;  %v3377_v32 = vsel %vm7172_vm5, 0, %v3376_v55 }
 0x1f3   : > { %3378 = vst [vmem:[#allocation4 + $0x5c] sm:$0x1] %v3377_v32 }
 0x1f5   : > { %v8241_v6 = vpop.f32.mrb[36].mxu0 }
 0x1f6   : > { %v2427_v42 = vpop.f32.mrb[37].mxu0 }
 0x1f7   : > { %v8244_v16 = vpop.f32.mrb[38].mxu0  ;;  %v2645_v9 = vpop.f32.mrb[20].mxu1 }
 0x1f8   : > { %v2430_v24 = vpop.f32.mrb[39].mxu0  ;;  %v8247_v60 = vadd.f32 %v2645_v9, %v8169_v33  ;;  %v2647_v47 = vpop.f32.mrb[21].mxu1  ;;  %v6987_v33 = vld [vmem:[%s9724_s5 + $0x70] sm:$0xff]  }
 0x1f9   : > { %v2648_v10 = vpop.f32.mrb[22].mxu1  ;;  %5003 = vmatpush1.bf16.msra.mxu1 %v6987_v33  ;;  %v3328_v33 = vld [vmem:[#allocation4 + $0x6c] sm:$0x1] }
 0x1fa   : > { %v8250_v53 = vadd.f32 %v2648_v10, %v8173_v38  ;;  %v2650_v59 = vpop.f32.mrb[23].mxu1  ;;  %5004 = vmatprep.subr.bf16.mxu1 %v9728_v5 }
 0x1fd   : > { %v8254_v8 = vpop.f32.mrb[40].mxu0  ;;  %5005 = vmatpush1.bf16.msra.mxu1 %v6990_v19 }
 0x1fe   : > { %v2435_v11 = vpop.f32.mrb[41].mxu0  ;;  %5006 = vmatprep.subr.bf16.mxu1 %v9728_v5 }
 0x1ff   : > { %v8256_v62 = vpop.f32.mrb[42].mxu0  ;;  %v2653_v35 = vpop.f32.mrb[24].mxu1  ;;  %v3380_v11 = vsel %vm7172_vm5, 0, %v3379_v58 }
 0x200   : > { %v2438_v21 = vpop.f32.mrb[43].mxu0  ;;  %v8262_v38 = vadd.f32 %v2653_v35, %v8186_v7  ;;  %v2655_v15 = vpop.f32.mrb[25].mxu1  ;;  %3381 = vst [vmem:[#allocation4 + $0x68] sm:$0x1] %v3380_v11  ;;  %v3385_v11 = vld [vmem:[#allocation4 + $0x80] sm:$0x1] }
 0x201   : > { %v2656_v0 = vpop.f32.mrb[26].mxu1 }
 0x202   : > { %v8267_v49 = vadd.f32 %v2656_v0, %v8190_v29  ;;  %v2658_v61 = vpop.f32.mrb[27].mxu1 }
 0x205   : > { %v8272_v7 = vpop.f32.mrb[44].mxu0 }
 0x206   : > { %v2443_v51 = vpop.f32.mrb[45].mxu0 }
 0x207   : > { %v8274_v12 = vpop.f32.mrb[46].mxu0  ;;  %v2661_v37 = vpop.f32.mrb[28].mxu1 }
 0x208   : > { %v2446_v34 = vpop.f32.mrb[47].mxu0  ;;  %v8277_v41 = vadd.f32 %v2661_v37, %v8203_v26  ;;  %v2663_v29 = vpop.f32.mrb[29].mxu1  ;;  %v3326_v26 = vsel %vm7165_vm2, 0, %v3325_v31  ;;  %v6995_v37 = vld [vmem:[%s9724_s5 + $0x80] sm:$0xff]  }
 0x209   : > { %v2664_v22 = vpop.f32.mrb[30].mxu1  ;;  %3327 = vst [vmem:[#allocation4 + $0x60] sm:$0x1] %v3326_v26  ;;  %v3382_v34 = vld [vmem:[#allocation4 + $0x74] sm:$0x1]  ;;  %5007 = vmatpush1.bf16.msra.mxu1 %v6995_v37 }
 0x20a   : > { %v8280_v57 = vadd.f32 %v2664_v22, %v8205_v23  ;;  %v2666_v28 = vpop.f32.mrb[31].mxu1  ;;  %5008 = vmatprep.subr.bf16.mxu1 %v9728_v5  ;;  %v3331_v26 = vld [vmem:[#allocation4 + $0x78] sm:$0x1] }
 0x20d   : > { %v8285_v13 = vpop.f32.mrb[48].mxu0 }
 0x20e   : > { %v2451_v36 = vpop.f32.mrb[49].mxu0 }
 0x20f   : > { %v8291_v23 = vpop.f32.mrb[50].mxu0  ;;  %v2669_v45 = vpop.f32.mrb[32].mxu1  ;;  %v3332_v36 = vsel %vm7165_vm2, 0, %v3331_v26 }
 0x210   : > { %v2454_v42 = vpop.f32.mrb[51].mxu0  ;;  %v8295_v9 = vadd.f32 %v2669_v45, %v8223_v44  ;;  %v2671_v24 = vpop.f32.mrb[33].mxu1  ;;  %v3329_v44 = vsel %vm7165_vm2, 0, %v3328_v33  ;;  %3333 = vst [vmem:[#allocation4 + $0x78] sm:$0x1] %v3332_v36 }
 0x211   : > { %v2672_v47 = vpop.f32.mrb[34].mxu1  ;;  %3330 = vst [vmem:[#allocation4 + $0x6c] sm:$0x1] %v3329_v44  ;;  %v6998_v44 = vld [vmem:[%s9724_s5 + $0x88] sm:$0xff]  }
 0x212   : > { %v8298_v10 = vadd.f32 %v2672_v47, %v8225_v52  ;;  %v2674_v59 = vpop.f32.mrb[35].mxu1  ;;  %5009 = vmatpush1.bf16.msra.mxu1 %v6998_v44  ;;  %v8377_v44 = vld [vmem:[%s9723_s4] ss:$0 sm:$0xff] }
 0x213   : > { %5010 = vmatprep.subr.bf16.mxu1 %v9728_v5 }
 0x215   : > { %v8300_v63 = vpop.f32.mrb[52].mxu0 }
 0x216   : > { %v2459_v35 = vpop.f32.mrb[53].mxu0 }
 0x217   : > { %v8304_v25 = vpop.f32.mrb[54].mxu0  ;;  %v2677_v21 = vpop.f32.mrb[36].mxu1  ;;  %v3386_v35 = vsel %vm7172_vm5, 0, %v3385_v11 }
 0x218   : > { %v2462_v15 = vpop.f32.mrb[55].mxu0  ;;  %v8309_v52 = vadd.f32 %v2677_v21, %v8241_v6  ;;  %v2679_v54 = vpop.f32.mrb[37].mxu1  ;;  %v3383_v6 = vsel %vm7172_vm5, 0, %v3382_v34  ;;  %3387 = vst [vmem:[#allocation4 + $0x80] sm:$0x1] %v3386_v35 }
 0x219   : > { %v2680_v0 = vpop.f32.mrb[38].mxu1  ;;  %3384 = vst [vmem:[#allocation4 + $0x74] sm:$0x1] %v3383_v6  ;;  %v3334_v15 = vld [vmem:[#allocation4 + $0x84] sm:$0x1] }
 0x21a   : > { %v8312_v61 = vadd.f32 %v2680_v0, %v8244_v16  ;;  %v2682_v20 = vpop.f32.mrb[39].mxu1 }
 0x21d   : > { %v8314_v48 = vpop.f32.mrb[56].mxu0 }
 0x21e   : > { %v2467_v51 = vpop.f32.mrb[57].mxu0 }
 0x21f   : > { %v8319_v29 = vpop.f32.mrb[58].mxu0  ;;  %v2685_v22 = vpop.f32.mrb[40].mxu1 }
 0x220   : > { %v2470_v28 = vpop.f32.mrb[59].mxu0  ;;  %v8324_v55 = vadd.f32 %v2685_v22, %v8254_v8  ;;  %v2687_v16 = vpop.f32.mrb[41].mxu1 }
 0x221   : > { %v2688_v19 = vpop.f32.mrb[42].mxu1  ;;  %v3388_v16 = vld [vmem:[#allocation4 + $0x8c] sm:$0x1] }
 0x222   : > { %v8328_v31 = vadd.f32 %v2688_v19, %v8256_v62  ;;  %v2690_v32 = vpop.f32.mrb[43].mxu1  ;;  %v3337_v19 = vld [vmem:[#allocation4 + $0x90] sm:$0x1]  ;;  %v3389_v26 = vsel %vm7172_vm5, 0, %v3388_v16 }
 0x223   : > { %v3338_v36 = vsel %vm7165_vm2, 0, %v3337_v19  ;;  %3390 = vst [vmem:[#allocation4 + $0x8c] sm:$0x1] %v3389_v26  ;;  %v3340_v26 = vld [vmem:[#allocation4 + $0x9c] sm:$0x1] }
 0x224   : > { %3339 = vst [vmem:[#allocation4 + $0x90] sm:$0x1] %v3338_v36 }
 0x225   : > { %v8332_v45 = vpop.f32.mrb[60].mxu0 }
 0x226   : > { %v2475_v42 = vpop.f32.mrb[61].mxu0 }
 0x227   : > { %v8334_v8 = vpop.f32.mrb[62].mxu0  ;;  %v2693_v24 = vpop.f32.mrb[44].mxu1 }
 0x228   : > { %v2478_v47 = vpop.f32.mrb[63].mxu0  ;;  %v8337_v59 = vadd.f32 %v2693_v24, %v8272_v7  ;;  %v2695_v58 = vpop.f32.mrb[45].mxu1  ;;  %v3335_v7 = vsel %vm7165_vm2, 0, %v3334_v15 }
 0x229   : > { %v2696_v62 = vpop.f32.mrb[46].mxu1  ;;  %3336 = vst [vmem:[#allocation4 + $0x84] sm:$0x1] %v3335_v7 }
 0x22a   : > { %v8342_v33 = vadd.f32 %v2696_v62, %v8274_v12  ;;  %v2698_v21 = vpop.f32.mrb[47].mxu1 }
 0x22d   : > { %v8347_v54 = vpop.f32.mrb[64].mxu0 }
 0x22e   : > { %v2483_v0 = vpop.f32.mrb[65].mxu0 }
 0x22f   : > { %v8351_v20 = vpop.f32.mrb[66].mxu0  ;;  %v2701_v51 = vpop.f32.mrb[48].mxu1  ;;  %v3391_v0 = vld [vmem:[#allocation4 + $0x98] sm:$0x1] }
 0x230   : > { %v2486_v12 = vpop.f32.mrb[67].mxu0  ;;  %v8355_v37 = vadd.f32 %v2701_v51, %v8285_v13  ;;  %v2703_v34 = vpop.f32.mrb[49].mxu1  ;;  %v8383_v51 = vstv %s3191_s24 }
 0x231   : > { %v2704_v22 = vpop.f32.mrb[50].mxu1  ;;  %v3392_v34 = vsel %vm7172_vm5, 0, %v3391_v0  ;;  %v3394_v0 = vld [vmem:[#allocation4 + $0xa4] sm:$0x1] }
 0x232   : > { %v8358_v6 = vadd.f32 %v2704_v22, %v8291_v23  ;;  %v2706_v28 = vpop.f32.mrb[51].mxu1  ;;  %3393 = vst [vmem:[#allocation4 + $0x98] sm:$0x1] %v3392_v34 }
 0x235   : > { %v8360_v32 = vpop.f32.mrb[68].mxu0 }
 0x236   : > { %v2491_v42 = vpop.f32.mrb[69].mxu0 }
 0x237   : > { %v8366_v13 = vpop.f32.mrb[70].mxu0  ;;  %v2709_v24 = vpop.f32.mrb[52].mxu1  ;;  %v3341_v42 = vsel %vm7165_vm2, 0, %v3340_v26 }
 0x238   : > { %v2494_v23 = vpop.f32.mrb[71].mxu0  ;;  %v8369_v47 = vadd.f32 %v2709_v24, %v8300_v63  ;;  %v2711_v58 = vpop.f32.mrb[53].mxu1  ;;  %v7003_v63 = vld [vmem:[%s9724_s5 + $0x90] sm:$0xff]   ;;  %3342 = vst [vmem:[#allocation4 + $0x9c] sm:$0x1] %v3341_v42 }
 0x239   : > { %v2712_v11 = vpop.f32.mrb[54].mxu1  ;;  %5011 = vmatpush1.bf16.msra.mxu1 %v7003_v63 }
 0x23a   : > { %v8372_v62 = vadd.f32 %v2712_v11, %v8304_v25  ;;  %v2714_v35 = vpop.f32.mrb[55].mxu1  ;;  %5012 = vmatprep.subr.bf16.mxu1 %v9728_v5 }
 0x23d   : > { %v2969_v21 = vpop.f32.mrb[72].mxu0 }
 0x23e   : > { %v3112_v15 = vadd.f32 %v2969_v21, %v8162_v27  ;;  %v2971_v7 = vpop.f32.mrb[73].mxu0 }
 0x23f   : > { %v2972_v12 = vpop.f32.mrb[74].mxu0  ;;  %v2717_v25 = vpop.f32.mrb[56].mxu1 }
 0x240   : > { %v3155_v22 = vadd.f32 %v8377_v44, %v3112_v15  ;;  %v3113_v28 = vadd.f32 %v2972_v12, %v8165_v46  ;;  %v2974_v16 = vpop.f32.mrb[75].mxu0  ;;  %v8390_v27 = vadd.f32 %v2717_v25, %v8314_v48  ;;  %v2719_v19 = vpop.f32.mrb[57].mxu1 }
 0x241   : > { %v2720_v36 = vpop.f32.mrb[58].mxu1 }
 0x242   : > { %vm3192_vm14 = vcmp.ge.f32.partialorder %v3155_v22, 0.0  ;;  %v3229_v24 = vmul.f32 %v8383_v51, %v3155_v22  ;;  %v3156_v23 = vadd.f32 %v8377_v44, %v3113_v28  ;;  %v8398_v46 = vadd.f32 %v2720_v36, %v8319_v29  ;;  %v2722_v48 = vpop.f32.mrb[59].mxu1 }
 0x243   : > { %v3395_v36 = vsel %vm7172_vm5, 0, %v3394_v0 }
 0x244   : > { %v3265_v58 = vsel %vm3192_vm14, %v3155_v22, %v3229_v24  ;;  %vm3193_vm15 = vcmp.ge.f32.partialorder %v3156_v23, 0.0  ;;  %v3230_v11 = vmul.f32 %v8383_v51, %v3156_v23  ;;  %v3877_v24 = vld [vmem:[#allocation4] sm:$0xf]  ;;  %3396 = vst [vmem:[#allocation4 + $0xa4] sm:$0x1] %v3395_v36 }
 0x245   : > { %v6710_v35 = vpack.c.bf16 %v3265_v58, %v3265_v58  ;;  %v2977_v21 = vpop.f32.mrb[76].mxu0 }
 0x246   : > { %v3266_v15 = vsel %vm3193_vm15, %v3156_v23, %v3230_v11  ;;  %v3114_v7 = vadd.f32 %v2977_v21, %v8178_v43  ;;  %v2979_v63 = vpop.f32.mrb[77].mxu0  ;;  %v7006_v21 = vld [vmem:[%s9724_s5 + $0x98] sm:$0xff]  }
 0x247   : > { %v3518_v12 = vshrl.u32 %v6710_v35, 16  ;;  %v6711_v25 = vpack.c.bf16 %v3266_v15, %v3266_v15  ;;  %v2980_v34 = vpop.f32.mrb[78].mxu0  ;;  %v2725_v28 = vpop.f32.mrb[60].mxu1  ;;  %v3521_v43 = vshll.u32 %v6710_v35, 16  ;;  %v3343_v15 = vld [vmem:[#allocation4 + $0xa8] sm:$0x1]  ;;  %5013 = vmatpush1.bf16.msra.mxu1 %v7006_v21 }
 0x248   : > { %v3157_v29 = vadd.f32 %v8377_v44, %v3114_v7  ;;  %v3115_v16 = vadd.f32 %v2980_v34, %v8182_v39  ;;  %v2982_v19 = vpop.f32.mrb[79].mxu0  ;;  %v8405_v22 = vadd.f32 %v2725_v28, %v8332_v45  ;;  %v2727_v26 = vpop.f32.mrb[61].mxu1  ;;  %v3344_v0 = vsel %vm7165_vm2, 0, %v3343_v15  ;;  %v3881_v34 = vld [vmem:[#allocation4 + $0x8] sm:$0x1]  ;;  %5014 = vmatprep.subr.bf16.mxu1 %v9728_v5 }
 0x249   : > { %v3520_v42 = vrot.slane %v3518_v12, 7  ;;  %v3526_v23 = vshrl.u32 %v6711_v25, 16  ;;  %v2728_v48 = vpop.f32.mrb[62].mxu1  ;;  %v3529_v63 = vshll.u32 %v6711_v25, 16  ;;  %3345 = vst [vmem:[#allocation4 + $0xa8] sm:$0x1] %v3344_v0 }
 0x24a   : > { %vm3194_vm0 = vcmp.ge.f32.partialorder %v3157_v29, 0.0  ;;  %v3231_v58 = vmul.f32 %v8383_v51, %v3157_v29  ;;  %v3158_v11 = vadd.f32 %v8377_v44, %v3115_v16  ;;  %v8412_v39 = vadd.f32 %v2728_v48, %v8334_v8  ;;  %v2730_v45 = vpop.f32.mrb[63].mxu1 }
 0x24b   : > { %v3523_v7 = vor.u32 %v3521_v43, %v3520_v42  ;;  %v3528_v35 = vrot.slane %v3526_v23, 7  ;;  %v3524_v12 = vrot.slane %v3520_v42, 4 }
 0x24c   : > { %v3267_v28 = vsel %vm3194_vm0, %v3157_v29, %v3231_v58  ;;  %vm3195_vm1 = vcmp.ge.f32.partialorder %v3158_v11, 0.0  ;;  %v3232_v16 = vmul.f32 %v8383_v51, %v3158_v11 }
 0x24d   : > { %v3878_v8 = vsel %vm7206_vm6, %v3523_v7, %v3877_v24  ;;  %v3531_v19 = vor.u32 %v3529_v63, %v3528_v35  ;;  %v3533_v26 = vrot.slane %v3528_v35, 4  ;;  %v6712_v36 = vpack.c.bf16 %v3267_v28, %v3267_v28  ;;  %v2985_v43 = vpop.f32.mrb[80].mxu0 }
 0x24e   : > { %3879 = vst [vmem:[#allocation4] sm:$0xf] %v3878_v8  ;;  %v3268_v25 = vsel %vm3195_vm1, %v3158_v11, %v3232_v16  ;;  %v3116_v42 = vadd.f32 %v2985_v43, %v8193_v30  ;;  %v2987_v23 = vpop.f32.mrb[81].mxu0 }
 0x24f   : > { %v3532_v29 = vsel %vm7240_vm10, %v3524_v12, %v3531_v19  ;;  %v3882_v48 = vsel %vm7165_vm2, %v3533_v26, %v3881_v34  ;;  %v3535_v58 = vshrl.u32 %v6712_v36, 16  ;;  %v2988_v45 = vpop.f32.mrb[82].mxu0  ;;  %v2733_v24 = vpop.f32.mrb[64].mxu1  ;;  %v6713_v21 = vpack.c.bf16 %v3268_v25, %v3268_v25  ;;  %v3884_v12 = vld [vmem:[#allocation4 + $0xc] sm:$0xf] }
 0x250   : > { %3880 = vst.msk [vmem:[#allocation4 + $0x4] sm:$0xf] %vm966_vm4, %v3532_v29  ;;  %3883 = vst [vmem:[#allocation4 + $0x8] sm:$0x1] %v3882_v48  ;;  %v3159_v15 = vadd.f32 %v8377_v44, %v3116_v42  ;;  %v3117_v11 = vadd.f32 %v2988_v45, %v8199_v2  ;;  %v2990_v7 = vpop.f32.mrb[83].mxu0  ;;  %v8432_v30 = vadd.f32 %v2733_v24, %v8347_v54  ;;  %v2735_v35 = vpop.f32.mrb[65].mxu1 }
 0x251   : > { %4009 = vst.msk [vmem:[#allocation4 + $0x4] sm:$0xf] %vm966_vm4, %v9728_v5  ;;  %v3537_v63 = vrot.slane %v3535_v58, 7  ;;  %v3538_v0 = vshll.u32 %v6712_v36, 16  ;;  %v2736_v34 = vpop.f32.mrb[66].mxu1  ;;  %v3543_v28 = vshrl.u32 %v6713_v21, 16 }
 0x252   : > { %vm3196_vm3 = vcmp.ge.f32.partialorder %v3159_v15, 0.0  ;;  %v3233_v16 = vmul.f32 %v8383_v51, %v3159_v15  ;;  %v2738_v8 = vpop.f32.mrb[67].mxu1  ;;  %v3397_v19 = vld [vmem:[#allocation4 + $0xb0] sm:$0x1]  ;;  %v3546_v2 = vshll.u32 %v6713_v21, 16  ;;  %v3160_v43 = vadd.f32 %v8377_v44, %v3117_v11 }
 0x253   : > { %v3540_v26 = vor.u32 %v3538_v0, %v3537_v63  ;;  %v8439_v54 = vadd.f32 %v2736_v34, %v8351_v20  ;;  %v3541_v25 = vrot.slane %v3537_v63, 4  ;;  %v3545_v42 = vrot.slane %v3543_v28, 7  ;;  %v3888_v58 = vld [vmem:[#allocation4 + $0x14] sm:$0x1] }
 0x254   : > { %v3269_v23 = vsel %vm3196_vm3, %v3159_v15, %v3233_v16  ;;  %v3398_v36 = vsel %vm7172_vm5, 0, %v3397_v19  ;;  %vm3197_vm7 = vcmp.ge.f32.partialorder %v3160_v43, 0.0  ;;  %v3234_v24 = vmul.f32 %v8383_v51, %v3160_v43  ;;  %v3346_v63 = vld [vmem:[#allocation4 + $0xb4] sm:$0x1] }
 0x255   : > { %v4006_v29 = vld [vmem:[#allocation4] sm:$0xf]  ;;  %v3885_v48 = vsel %vm7206_vm6, %v3540_v26, %v3884_v12  ;;  %v6714_v45 = vpack.c.bf16 %v3269_v23, %v3269_v23  ;;  %v2993_v21 = vpop.f32.mrb[84].mxu0  ;;  %3399 = vst [vmem:[#allocation4 + $0xb0] sm:$0x1] %v3398_v36  ;;  %v3548_v11 = vor.u32 %v3546_v2, %v3545_v42  ;;  %v3550_v15 = vrot.slane %v3545_v42, 4 }
 0x256   : > { %v4007_v20 = vsel %vm7206_vm6, 0, %v4006_v29  ;;  %3886 = vst [vmem:[#allocation4 + $0xc] sm:$0xf] %v3885_v48  ;;  %v3118_v7 = vadd.f32 %v2993_v21, %v8213_v50  ;;  %v2995_v35 = vpop.f32.mrb[85].mxu0  ;;  %v3270_v28 = vsel %vm3197_vm7, %v3160_v43, %v3234_v24 }
 0x257   : > { %4008 = vst [vmem:[#allocation4] sm:$0xf] %v4007_v20  ;;  %v4010_v0 = vld [vmem:[#allocation4 + $0x8] sm:$0x1]  ;;  %v3552_v12 = vshrl.u32 %v6714_v45, 16  ;;  %v3555_v34 = vshll.u32 %v6714_v45, 16  ;;  %v3549_v26 = vsel %vm7240_vm10, %v3541_v25, %v3548_v11  ;;  %v3889_v2 = vsel %vm7165_vm2, %v3550_v15, %v3888_v58 }
 0x258   : > { %v2996_v16 = vpop.f32.mrb[86].mxu0  ;;  %v2741_v8 = vpop.f32.mrb[68].mxu1  ;;  %v4011_v19 = vsel %vm7165_vm2, 0, %v4010_v0  ;;  %v6715_v42 = vpack.c.bf16 %v3270_v28, %v3270_v28  ;;  %3887 = vst.msk [vmem:[#allocation4 + $0x10] sm:$0xf] %vm966_vm4, %v3549_v26  ;;  %v3161_v43 = vadd.f32 %v8377_v44, %v3118_v7  ;;  %v3347_v20 = vsel %vm7165_vm2, 0, %v3346_v63 }
 0x259   : > { %v2998_v50 = vpop.f32.mrb[87].mxu0  ;;  %v2743_v23 = vpop.f32.mrb[69].mxu1  ;;  %4012 = vst [vmem:[#allocation4 + $0x8] sm:$0x1] %v4011_v19  ;;  %3890 = vst [vmem:[#allocation4 + $0x14] sm:$0x1] %v3889_v2  ;;  %v3119_v29 = vadd.f32 %v2996_v16, %v8219_v14  ;;  %v8459_v48 = vadd.f32 %v2741_v8, %v8360_v32 }
 0x25a   : > { %v3554_v36 = vrot.slane %v3552_v12, 7  ;;  %v2744_v45 = vpop.f32.mrb[70].mxu1  ;;  %v3891_v25 = vld [vmem:[#allocation4 + $0x18] sm:$0xf]  ;;  %v3560_v24 = vshrl.u32 %v6715_v42, 16  ;;  %v7014_v11 = vld [vmem:[%s9724_s5 + $0xc0] sm:$0xff]   ;;  %v3235_v14 = vmul.f32 %v8383_v51, %v3161_v43 }
 0x25b   : > { %v8462_v58 = vadd.f32 %v2744_v45, %v8366_v13  ;;  %v2746_v21 = vpop.f32.mrb[71].mxu1  ;;  %vm3198_vm8 = vcmp.ge.f32.partialorder %v3161_v43, 0.0  ;;  %3348 = vst [vmem:[#allocation4 + $0xb4] sm:$0x1] %v3347_v20  ;;  %v3563_v7 = vshll.u32 %v6715_v42, 16  ;;  %v3162_v35 = vadd.f32 %v8377_v44, %v3119_v29  ;;  %5573 = vmatpush1.bf16.msra.mxu0 %v7014_v11  ;;  %v7011_v2 = vld [vmem:[%s9724_s5 + $0xa0] sm:$0xff]  }
 0x25c   : > { %v3557_v15 = vor.u32 %v3555_v34, %v3554_v36  ;;  %v3562_v32 = vrot.slane %v3560_v24, 7  ;;  %v3558_v13 = vrot.slane %v3554_v36, 4  ;;  %v3895_v12 = vld [vmem:[#allocation4 + $0x20] sm:$0x1]  ;;  %v3271_v63 = vsel %vm3198_vm8, %v3161_v43, %v3235_v14  ;;  %5574 = vmatprep.subr.bf16.mxu0 %v9728_v5  ;;  %v3400_v42 = vld [vmem:[#allocation4 + $0xbc] sm:$0x1]  ;;  %5015 = vmatpush1.bf16.msra.mxu1 %v7011_v2 }
 0x25d   : > { %v3001_v28 = vpop.f32.mrb[88].mxu0  ;;  %v8473_v16 = vld [vmem:[#allocation4 + $0xc] sm:$0xe]  ;;  %v6716_v19 = vpack.c.bf16 %v3271_v63, %v3271_v63  ;;  %vm3199_vm9 = vcmp.ge.f32.partialorder %v3162_v35, 0.0  ;;  %v3236_v50 = vmul.f32 %v8383_v51, %v3162_v35  ;;  %v3401_v45 = vsel %vm7172_vm5, 0, %v3400_v42  ;;  %5016 = vmatprep.subr.bf16.mxu1 %v9728_v5 }
 0x25e   : > { %v3892_v0 = vsel %vm7206_vm6, %v3557_v15, %v3891_v25  ;;  %v3565_v34 = vor.u32 %v3563_v7, %v3562_v32  ;;  %v3567_v8 = vrot.slane %v3562_v32, 4  ;;  %v3003_v26 = vpop.f32.mrb[89].mxu0  ;;  %v3120_v23 = vadd.f32 %v3001_v28, %v8230_v3  ;;  %v4023_v43 = vld [vmem:[#allocation4 + $0xc] sm:$0xf]  ;;  %3402 = vst [vmem:[#allocation4 + $0xbc] sm:$0x1] %v3401_v45 }
 0x25f   : > { %3893 = vst [vmem:[#allocation4 + $0x18] sm:$0xf] %v3892_v0  ;;  %v3004_v36 = vpop.f32.mrb[90].mxu0  ;;  %v6503_v29 = vrot.slane %v8473_v16, 9  ;;  %v3569_v21 = vshrl.u32 %v6716_v19, 16  ;;  %v3572_v20 = vshll.u32 %v6716_v19, 16  ;;  %v3272_v3 = vsel %vm3199_vm9, %v3162_v35, %v3236_v50 }
 0x260   : > { %v3566_v25 = vsel %vm7240_vm10, %v3558_v13, %v3565_v34  ;;  %v3896_v24 = vsel %vm7165_vm2, %v3567_v8, %v3895_v12  ;;  %v3006_v11 = vpop.f32.mrb[91].mxu0  ;;  %v8488_v15 = vld [vmem:[#allocation4 + $0x10] sm:$0xf]  ;;  %v3163_v14 = vadd.f32 %v8377_v44, %v3120_v23  ;;  %v3121_v32 = vadd.f32 %v3004_v36, %v8236_v56  ;;  %v8494_v7 = vld [vmem:[#allocation4 + $0x14] sm:$0x1]  ;;  %v7018_v0 = vld [vmem:[%s9724_s5 + $0xc8] sm:$0xff]  }
 0x261   : > { %3894 = vst.msk [vmem:[#allocation4 + $0x1c] sm:$0xf] %vm966_vm4, %v3566_v25  ;;  %3897 = vst [vmem:[#allocation4 + $0x20] sm:$0x1] %v3896_v24  ;;  %v8497_v13 = vcombine.low %v4023_v43, %v8488_v15  ;;  %v3571_v12 = vrot.slane %v3569_v21, 7  ;;  %v6717_v63 = vpack.c.bf16 %v3272_v3, %v3272_v3  ;;  %v6485_v35 = vcombine.low %v8494_v7, %v8494_v7  ;;  %v7019_v45 = vld [vmem:[%s9724_s5 + $0xd0] sm:$0xff]  }
 0x262   : > { %v4588_v28 = vrot.slane %v8488_v15, 5  ;;  %v3898_v16 = vld [vmem:[#allocation4 + $0x24] sm:$0xf]  ;;  %vm3200_vm14 = vcmp.ge.f32.partialorder %v3163_v14, 0.0  ;;  %v3237_v56 = vmul.f32 %v8383_v51, %v3163_v14  ;;  %v3164_v34 = vadd.f32 %v8377_v44, %v3121_v32  ;;  %5575 = vmatpush1.bf16.msra.mxu0 %v7018_v0  ;;  %v3902_v15 = vld [vmem:[#allocation4 + $0x2c] sm:$0x1] }
 0x263   : > { %v4250_v8 = vshrl.u32 %v8497_v13, 16  ;;  %v3574_v19 = vor.u32 %v3572_v20, %v3571_v12  ;;  %v3575_v26 = vrot.slane %v3571_v12, 4  ;;  %v3577_v2 = vshrl.u32 %v6717_v63, 16  ;;  %5576 = vmatprep.subr.bf16.mxu0 %v9728_v5 }
 0x264   : > { %v3580_v42 = vshll.u32 %v6717_v63, 16  ;;  %v3273_v50 = vsel %vm3200_vm14, %v3163_v14, %v3237_v56  ;;  %vm3201_vm15 = vcmp.ge.f32.partialorder %v3164_v34, 0.0  ;;  %v3238_v23 = vmul.f32 %v8383_v51, %v3164_v34 }
 0x265   : > { %v3009_v36 = vpop.f32.mrb[92].mxu0  ;;  %v4252_v43 = vshll.u32 %v8497_v13, 16  ;;  %v3899_v25 = vsel %vm7206_vm6, %v3574_v19, %v3898_v16  ;;  %v3579_v24 = vrot.slane %v3577_v2, 7  ;;  %v6718_v21 = vpack.c.bf16 %v3273_v50, %v3273_v50 }
 0x266   : > { %v3122_v20 = vadd.f32 %v3009_v36, %v8247_v60  ;;  %v3011_v11 = vpop.f32.mrb[93].mxu0  ;;  %3900 = vst [vmem:[#allocation4 + $0x24] sm:$0xf] %v3899_v25  ;;  %v3274_v3 = vsel %vm3201_vm15, %v3164_v34, %v3238_v23  ;;  %v4257_v0 = vshll.u32 %v6485_v35, 16  ;;  %v8520_v12 = vsel %vm7271_vm13, %v6503_v29, %v4588_v28  ;;  %5577 = vmatpush1.bf16.msra.mxu0 %v7019_v45  ;;  %v3905_v45 = vld [vmem:[#allocation4 + $0x30] sm:$0xf] }
 0x267   : > { %v3012_v14 = vpop.f32.mrb[94].mxu0  ;;  %v4254_v32 = vrot.slane %v4252_v43, 1  ;;  %v3582_v63 = vor.u32 %v3580_v42, %v3579_v24  ;;  %v3584_v56 = vrot.slane %v3579_v24, 4  ;;  %v3586_v5 = vshrl.u32 %v6718_v21, 16  ;;  %v7015_v43 = vld [vmem:[%s9724_s5 + $0xa8] sm:$0xff]  }
 0x268   : > { %v3589_v16 = vshll.u32 %v6718_v21, 16  ;;  %v3014_v19 = vpop.f32.mrb[95].mxu0  ;;  %v9740_v2 = vmov 0   ;;  %v6719_v60 = vpack.c.bf16 %v3274_v3, %v3274_v3  ;;  %v3165_v50 = vadd.f32 %v8377_v44, %v3122_v20  ;;  %5017 = vmatpush1.bf16.msra.mxu1 %v7015_v43  ;;  %v7022_v20 = vld [vmem:[%s9724_s5 + $0xd8] sm:$0xff]  }
 0x269   : > { %5578 = vmatprep.subr.bf16.mxu0 %v9740_v2  ;;  %v3123_v34 = vadd.f32 %v3012_v14, %v8250_v53  ;;  %v4255_v23 = vor.u32 %v4254_v32, %v4250_v8  ;;  %v3583_v35 = vsel %vm7240_vm10, %v3575_v26, %v3582_v63  ;;  %v3903_v29 = vsel %vm7165_vm2, %v3584_v56, %v3902_v15  ;;  %v3909_v63 = vld [vmem:[#allocation4 + $0x38] sm:$0x1] }
 0x26a   : > { %v3588_v36 = vrot.slane %v3586_v5, 7  ;;  %v4259_v42 = vrot.slane %v4257_v0, 1  ;;  %3901 = vst.msk [vmem:[#allocation4 + $0x28] sm:$0xf] %vm966_vm4, %v3583_v35  ;;  %3904 = vst [vmem:[#allocation4 + $0x2c] sm:$0x1] %v3903_v29  ;;  %v3239_v53 = vmul.f32 %v8383_v51, %v3165_v50  ;;  %5018 = vmatprep.subr.bf16.mxu1 %v9740_v2  ;;  %5579 = vmatpush1.bf16.msra.mxu0 %v7022_v20 }
 0x26b   : > { %v3594_v25 = vshrl.u32 %v6719_v60, 16  ;;  %v3597_v24 = vshll.u32 %v6719_v60, 16  ;;  %vm3202_vm0 = vcmp.ge.f32.partialorder %v3165_v50, 0.0  ;;  %v3166_v21 = vadd.f32 %v8377_v44, %v3123_v34  ;;  %v8550_v35 = vld [vmem:[#allocation4 + $0x20] sm:$0x1]  ;;  %5580 = vmatprep.subr.bf16.mxu0 %v9740_v2 }
 0x26c   : > { %v3591_v8 = vor.u32 %v3589_v16, %v3588_v36  ;;  %v3592_v26 = vrot.slane %v3588_v36, 4  ;;  %v4260_v5 = vsel %vm1481_vm12, %v4255_v23, %v4259_v42  ;;  %v3275_v15 = vsel %vm3202_vm0, %v3165_v50, %v3239_v53  ;;  %v8548_v23 = vld [vmem:[#allocation4 + $0x1c] sm:$0xf] }
 0x26d   : > { %v3596_v11 = vrot.slane %v3594_v25, 7  ;;  %v4590_v3 = vrot.slane %v4588_v28, 4  ;;  %v4591_v14 = vrot.slane %v8494_v7, 5  ;;  %4455 = vrot.lane.b32.xlu0 %v4260_v5, %s7095_s0  ;;  %v3017_v32 = vpop.f32.mrb[96].mxu0  ;;  %v6720_v56 = vpack.c.bf16 %v3275_v15, %v3275_v15  ;;  %v7024_v25 = vld [vmem:[%s9724_s5 + $0xe0] sm:$0xff]  }
 0x26e   : > { %v3906_v0 = vsel %vm7206_vm6, %v3591_v8, %v3905_v45  ;;  %vm3203_vm1 = vcmp.ge.f32.partialorder %v3166_v21, 0.0  ;;  %v3240_v16 = vmul.f32 %v8383_v51, %v3166_v21  ;;  %v3019_v19 = vpop.f32.mrb[97].mxu0  ;;  %v3124_v50 = vadd.f32 %v3017_v32, %v8262_v38  ;;  %v4025_v5 = vld [vmem:[#allocation4 + $0x18] sm:$0xf]  ;;  %5581 = vmatpush1.bf16.msra.mxu0 %v7024_v25 }
 0x26f   : > { %3907 = vst [vmem:[#allocation4 + $0x30] sm:$0xf] %v3906_v0  ;;  %v3599_v60 = vor.u32 %v3597_v24, %v3596_v11  ;;  %v3601_v28 = vrot.slane %v3596_v11, 4  ;;  %v4592_v7 = vsel %vm7271_vm13, %v4590_v3, %v4591_v14  ;;  %v3020_v34 = vpop.f32.mrb[98].mxu0  ;;  %v3603_v29 = vshrl.u32 %v6720_v56, 16  ;;  %5582 = vmatprep.subr.bf16.mxu0 %v9740_v2 }
 0x270   : > { %v3606_v36 = vshll.u32 %v6720_v56, 16  ;;  %v3276_v42 = vsel %vm3203_vm1, %v3166_v21, %v3240_v16  ;;  %v6521_v43 = vcombine.low %v8520_v12, %v4592_v7  ;;  %v3022_v45 = vpop.f32.mrb[99].mxu0  ;;  %v3167_v8 = vadd.f32 %v8377_v44, %v3124_v50  ;;  %v3912_v11 = vld [vmem:[#allocation4 + $0x3c] sm:$0xf] }
 0x271   : > { %v3600_v38 = vsel %vm7240_vm10, %v3592_v26, %v3599_v60  ;;  %v3910_v24 = vsel %vm7165_vm2, %v3601_v28, %v3909_v63  ;;  %v6721_v53 = vpack.c.bf16 %v3276_v42, %v3276_v42  ;;  %v3605_v21 = vrot.slane %v3603_v29, 7  ;;  %v7027_v56 = vld [vmem:[%s9724_s5 + $0xe8] sm:$0xff]   ;;  %v3916_v29 = vld [vmem:[#allocation4 + $0x44] sm:$0x1] }
 0x272   : > { %3908 = vst.msk [vmem:[#allocation4 + $0x34] sm:$0xf] %vm966_vm4, %v3600_v38  ;;  %3911 = vst [vmem:[#allocation4 + $0x38] sm:$0x1] %v3910_v24  ;;  %v3125_v12 = vadd.f32 %v3020_v34, %v8267_v49  ;;  %v8566_v20 = vcombine.low %v4025_v5, %v8548_v23  ;;  %v6486_v26 = vcombine.low %v8550_v35, %v8550_v35  ;;  %vm3204_vm3 = vcmp.ge.f32.partialorder %v3167_v8, 0.0 }
 0x273   : > { %4778 = vst.msk [vmem:[#allocation5 + $0x18] sm:$0xff] %vm1762_vm11, %v6521_v43  ;;  %v3611_v15 = vshrl.u32 %v6721_v53, 16  ;;  %v3614_v3 = vshll.u32 %v6721_v53, 16  ;;  %v3241_v14 = vmul.f32 %v8383_v51, %v3167_v8  ;;  %v3608_v32 = vor.u32 %v3606_v36, %v3605_v21  ;;  %v4077_v60 = vld [vmem:[#allocation4 + $0x18] sm:$0xe]  ;;  %5583 = vmatpush1.bf16.msra.mxu0 %v7027_v56 }
 0x274   : > { %v3609_v0 = vrot.slane %v3605_v21, 4  ;;  %v3168_v63 = vadd.f32 %v8377_v44, %v3125_v12  ;;  %v4262_v49 = vshrl.u32 %v8566_v20, 16  ;;  %v4264_v28 = vshll.u32 %v8566_v20, 16  ;;  %5584 = vmatprep.subr.bf16.mxu0 %v9740_v2 }
 0x275   : > { %v3613_v16 = vrot.slane %v3611_v15, 7  ;;  %v3277_v19 = vsel %vm3204_vm3, %v3167_v8, %v3241_v14  ;;  %v4269_v7 = vshll.u32 %v6486_v26, 16  ;;  %v3025_v50 = vpop.f32.mrb[100].mxu0  ;;  %v3913_v34 = vsel %vm7206_vm6, %v3608_v32, %v3912_v11  ;;  %v7028_v11 = vld [vmem:[%s9724_s5 + $0xf0] sm:$0xff]   ;;  %v3919_v14 = vld [vmem:[#allocation4 + $0x48] sm:$0xf] }
 0x276   : > { %v6722_v36 = vpack.c.bf16 %v3277_v19, %v3277_v19  ;;  %vm3205_vm7 = vcmp.ge.f32.partialorder %v3168_v63, 0.0  ;;  %v3242_v42 = vmul.f32 %v8383_v51, %v3168_v63  ;;  %v3027_v43 = vpop.f32.mrb[101].mxu0  ;;  %3914 = vst [vmem:[#allocation4 + $0x3c] sm:$0xf] %v3913_v34  ;;  %v4266_v38 = vrot.slane %v4264_v28, 1 }
 0x277   : > { %v3616_v45 = vor.u32 %v3614_v3, %v3613_v16  ;;  %v3618_v25 = vrot.slane %v3613_v16, 4  ;;  %v4271_v24 = vrot.slane %v4269_v7, 1  ;;  %v3028_v53 = vpop.f32.mrb[102].mxu0  ;;  %v6504_v12 = vrot.slane %v4077_v60, 9  ;;  %v8589_v19 = vld [vmem:[#allocation4 + $0x24] sm:$0xe]  ;;  %5585 = vmatpush1.bf16.msra.mxu0 %v7028_v11 }
 0x278   : > { %v3620_v8 = vshrl.u32 %v6722_v36, 16  ;;  %v3623_v5 = vshll.u32 %v6722_v36, 16  ;;  %v3278_v21 = vsel %vm3205_vm7, %v3168_v63, %v3242_v42  ;;  %v3030_v26 = vpop.f32.mrb[103].mxu0  ;;  %v4267_v16 = vor.u32 %v4266_v38, %v4262_v49  ;;  %v8596_v7 = vld [vmem:[#allocation4 + $0x28] sm:$0xf]  ;;  %v7023_v43 = vld [vmem:[%s9724_s5 + $0xb0] sm:$0xff]   ;;  %5586 = vmatprep.subr.bf16.mxu0 %v9740_v2 }
 0x279   : > { %v3617_v15 = vsel %vm7240_vm10, %v3609_v0, %v3616_v45  ;;  %v3917_v3 = vsel %vm7165_vm2, %v3618_v25, %v3916_v29  ;;  %v6723_v32 = vpack.c.bf16 %v3278_v21, %v3278_v21  ;;  %v4595_v60 = vrot.slane %v8548_v23, 5  ;;  %v8600_v42 = vld [vmem:[#allocation4 + $0x2c] sm:$0x1]  ;;  %v4027_v45 = vld [vmem:[#allocation4 + $0x24] sm:$0xf]  ;;  %5019 = vmatpush1.bf16.msra.mxu1 %v7023_v43 }
 0x27a   : > { %v4798_v56 = vld [vmem:[#allocation5 + $0x18] sm:$0xff]  ;;  %3915 = vst.msk [vmem:[#allocation4 + $0x40] sm:$0xf] %vm966_vm4, %v3617_v15  ;;  %3918 = vst [vmem:[#allocation4 + $0x44] sm:$0x1] %v3917_v3  ;;  %v3622_v63 = vrot.slane %v3620_v8, 7  ;;  %v3126_v0 = vadd.f32 %v3025_v50, %v8277_v41  ;;  %v4272_v49 = vsel %vm1481_vm12, %v4267_v16, %v4271_v24  ;;  %v3127_v36 = vadd.f32 %v3028_v53, %v8280_v57 }
 0x27b   : > { %6574 = vmatprep.mubr.msk.bf16.mxu1 %vm1762_vm11, %v4798_v56  ;;  %v4598_v28 = vrot.slane %v8550_v35, 5  ;;  %v3628_v34 = vshrl.u32 %v6723_v32, 16  ;;  %v3631_v29 = vshll.u32 %v6723_v32, 16  ;;  %v4596_v41 = vsel %vm7271_vm13, %v6504_v12, %v4595_v60  ;;  %4457 = vrot.lane.b32.xlu1 %v4272_v49, %s7095_s0  ;;  %v7032_v57 = vld [vmem:[%s9724_s5 + $0xf8] sm:$0xff]   ;;  %v3923_v12 = vld [vmem:[#allocation4 + $0x50] sm:$0x1] }
 0x27c   : > { %v3625_v23 = vor.u32 %v3623_v5, %v3622_v63  ;;  %v3626_v35 = vrot.slane %v3622_v63, 4  ;;  %v4597_v50 = vrot.slane %v4595_v60, 4  ;;  %v3169_v38 = vadd.f32 %v8377_v44, %v3126_v0  ;;  %v7029_v5 = vld [vmem:[%s9724_s5 + $0xb8] sm:$0xff]   ;;  %5020 = vmatprep.subr.bf16.mxu1 %v9740_v2  ;;  %5587 = vmatpush1.bf16.msra.mxu0 %v7032_v57  ;;  %v7035_v0 = vld [vmem:[%s9724_s5 + $0x100] sm:$0xff]  }
 0x27d   : > { %v3630_v25 = vrot.slane %v3628_v34, 7  ;;  %v3170_v24 = vadd.f32 %v8377_v44, %v3127_v36  ;;  %v8615_v53 = vcombine.low %v4027_v45, %v8596_v7  ;;  %v3033_v8 = vpop.f32.mrb[104].mxu0  ;;  %v6487_v11 = vcombine.low %v8600_v42, %v8600_v42  ;;  %5588 = vmatprep.subr.bf16.mxu0 %v9740_v2  ;;  %5021 = vmatpush1.bf16.msra.mxu1 %v7029_v5 }
 0x27e   : > { %v3920_v21 = vsel %vm7206_vm6, %v3625_v23, %v3919_v14  ;;  %v4599_v26 = vsel %vm7271_vm13, %v4597_v50, %v4598_v28  ;;  %v6505_v15 = vrot.slane %v8589_v19, 9  ;;  %v3035_v3 = vpop.f32.mrb[105].mxu0  ;;  %vm3206_vm8 = vcmp.ge.f32.partialorder %v3169_v38, 0.0  ;;  %5234 = vmatprep.subr.bf16.mxu1 %v9740_v2 }
 0x27f   : > { %3921 = vst [vmem:[#allocation4 + $0x48] sm:$0xf] %v3920_v21  ;;  %v3633_v32 = vor.u32 %v3631_v29, %v3630_v25  ;;  %v3635_v56 = vrot.slane %v3630_v25, 4  ;;  %v6522_v16 = vcombine.low %v4596_v41, %v4599_v26  ;;  %v3036_v63 = vpop.f32.mrb[106].mxu0  ;;  %v3243_v14 = vmul.f32 %v8383_v51, %v3169_v38 }
 0x280   : > { %vm3207_vm9 = vcmp.ge.f32.partialorder %v3170_v24, 0.0  ;;  %v3244_v60 = vmul.f32 %v8383_v51, %v3170_v24  ;;  %v4274_v28 = vshrl.u32 %v8615_v53, 16  ;;  %v3038_v19 = vpop.f32.mrb[107].mxu0  ;;  %v4276_v49 = vshll.u32 %v8615_v53, 16  ;;  %5589 = vmatpush1.bf16.msra.mxu0 %v7035_v0 }
 0x281   : > { %v3634_v34 = vsel %vm7240_vm10, %v3626_v35, %v3633_v32  ;;  %v3924_v29 = vsel %vm7165_vm2, %v3635_v56, %v3923_v12  ;;  %4779 = vst.msk [vmem:[#allocation5 + $0x28] sm:$0xff] %vm1762_vm11, %v6522_v16  ;;  %v4281_v36 = vshll.u32 %v6487_v11, 16  ;;  %v3279_v43 = vsel %vm3206_vm8, %v3169_v38, %v3243_v14  ;;  %5590 = vmatprep.subr.bf16.mxu0 %v9740_v2  ;;  %v3926_v56 = vld [vmem:[#allocation4 + $0x54] sm:$0xf]  ;;  %v7040_v14 = vld [vmem:[%s9724_s5 + $0x110] sm:$0xff]  }
 0x282   : > { %3922 = vst.msk [vmem:[#allocation4 + $0x4c] sm:$0xf] %vm966_vm4, %v3634_v34  ;;  %3925 = vst [vmem:[#allocation4 + $0x50] sm:$0x1] %v3924_v29  ;;  %v3280_v23 = vsel %vm3207_vm9, %v3170_v24, %v3244_v60  ;;  %v4602_v41 = vrot.slane %v8596_v7, 5  ;;  %v4605_v50 = vrot.slane %v8600_v42, 5  ;;  %v6724_v35 = vpack.c.bf16 %v3279_v43, %v3279_v43 }
 0x283   : > { %v6725_v45 = vpack.c.bf16 %v3280_v23, %v3280_v23  ;;  %v4278_v57 = vrot.slane %v4276_v49, 1  ;;  %v4283_v25 = vrot.slane %v4281_v36, 1  ;;  %v3128_v38 = vadd.f32 %v3033_v8, %v8295_v9  ;;  %v8651_v7 = vld [vmem:[#allocation4 + $0x34] sm:$0xf]  ;;  %v7038_v42 = vld [vmem:[%s9724_s5 + $0x108] sm:$0xff]  }
 0x284   : > { %v4603_v5 = vsel %vm7271_vm13, %v6505_v15, %v4602_v41  ;;  %v4604_v21 = vrot.slane %v4602_v41, 4  ;;  %v3129_v24 = vadd.f32 %v3036_v63, %v8298_v10  ;;  %v3637_v12 = vshrl.u32 %v6724_v35, 16  ;;  %v4029_v8 = vld [vmem:[#allocation4 + $0x30] sm:$0xf]  ;;  %5591 = vmatpush1.bf16.msra.mxu0 %v7038_v42  ;;  %v8663_v34 = vld [vmem:[#allocation4 + $0x38] sm:$0x1] }
 0x285   : > { %v3640_v26 = vshll.u32 %v6724_v35, 16  ;;  %v3645_v11 = vshrl.u32 %v6725_v45, 16  ;;  %v3648_v3 = vshll.u32 %v6725_v45, 16  ;;  %v3041_v32 = vpop.f32.mrb[108].mxu0  ;;  %v4279_v16 = vor.u32 %v4278_v57, %v4274_v28  ;;  %5592 = vmatprep.subr.bf16.mxu0 %v9740_v2  ;;  %v3930_v49 = vld [vmem:[#allocation4 + $0x5c] sm:$0x1] }
 0x286   : > { %v4606_v15 = vsel %vm7271_vm13, %v4604_v21, %v4605_v50  ;;  %v3171_v9 = vadd.f32 %v8377_v44, %v3128_v38  ;;  %v3172_v10 = vadd.f32 %v8377_v44, %v3129_v24  ;;  %v3043_v63 = vpop.f32.mrb[109].mxu0  ;;  %v3639_v60 = vrot.slane %v3637_v12, 7  ;;  %v7041_v42 = vld [vmem:[%s9724_s5 + $0x118] sm:$0xff]  }
 0x287   : > { %v3647_v19 = vrot.slane %v3645_v11, 7  ;;  %v6523_v0 = vcombine.low %v4603_v5, %v4606_v15  ;;  %v8666_v28 = vcombine.low %v4029_v8, %v8651_v7  ;;  %v3044_v29 = vpop.f32.mrb[110].mxu0  ;;  %v4284_v43 = vsel %vm1481_vm12, %v4279_v16, %v4283_v25  ;;  %v4079_v5 = vld [vmem:[#allocation4 + $0x30] sm:$0xe] }
 0x288   : > { %v5396_v36 = vld [vmem:[#allocation5 + $0x28] sm:$0xff]  ;;  %vm3208_vm14 = vcmp.ge.f32.partialorder %v3171_v9, 0.0  ;;  %v3245_v23 = vmul.f32 %v8383_v51, %v3171_v9  ;;  %vm3209_vm15 = vcmp.ge.f32.partialorder %v3172_v10, 0.0  ;;  %v3046_v41 = vpop.f32.mrb[111].mxu0  ;;  %v3642_v50 = vor.u32 %v3640_v26, %v3639_v60  ;;  %4459 = vrot.lane.b32.xlu0 %v4284_v43, %s7095_s0  ;;  %5593 = vmatpush1.bf16.msra.mxu0 %v7040_v14 }
 0x289   : > { %v3643_v35 = vrot.slane %v3639_v60, 4  ;;  %v3650_v45 = vor.u32 %v3648_v3, %v3647_v19  ;;  %v3652_v57 = vrot.slane %v3647_v19, 4  ;;  %6654 = vmatprep.mubr.msk.bf16.mxu0 %vm1762_vm11, %v5396_v36  ;;  %4780 = vst.msk [vmem:[#allocation5 + $0x38] sm:$0xff] %vm1762_vm11, %v6523_v0  ;;  %v3246_v38 = vmul.f32 %v8383_v51, %v3172_v10  ;;  %5594 = vmatprep.subr.bf16.mxu0 %v9740_v2 }
 0x28a   : > { %v3281_v21 = vsel %vm3208_vm14, %v3171_v9, %v3245_v23  ;;  %v6488_v25 = vcombine.low %v8663_v34, %v8663_v34  ;;  %v4286_v24 = vshrl.u32 %v8666_v28, 16  ;;  %v3927_v12 = vsel %vm7206_vm6, %v3642_v50, %v3926_v56  ;;  %v8696_v23 = vld [vmem:[#allocation4 + $0x40] sm:$0xf] }
 0x28b   : > { %v3651_v26 = vsel %vm7240_vm10, %v3643_v35, %v3650_v45  ;;  %v3931_v11 = vsel %vm7165_vm2, %v3652_v57, %v3930_v49  ;;  %v6726_v3 = vpack.c.bf16 %v3281_v21, %v3281_v21  ;;  %3928 = vst [vmem:[#allocation4 + $0x54] sm:$0xf] %v3927_v12  ;;  %v3282_v16 = vsel %vm3209_vm15, %v3172_v10, %v3246_v38 }
 0x28c   : > { %3929 = vst.msk [vmem:[#allocation4 + $0x58] sm:$0xf] %vm966_vm4, %v3651_v26  ;;  %3932 = vst [vmem:[#allocation4 + $0x5c] sm:$0x1] %v3931_v11  ;;  %v4288_v15 = vshll.u32 %v8666_v28, 16  ;;  %v4293_v9 = vshll.u32 %v6488_v25, 16  ;;  %v6727_v14 = vpack.c.bf16 %v3282_v16, %v3282_v16  ;;  %v3130_v43 = vadd.f32 %v3041_v32, %v8309_v52  ;;  %5595 = vmatpush1.bf16.msra.mxu0 %v7041_v42 }
 0x28d   : > { %v6506_v8 = vrot.slane %v4079_v5, 9  ;;  %v3654_v56 = vshrl.u32 %v6726_v3, 16  ;;  %v3657_v63 = vshll.u32 %v6726_v3, 16  ;;  %v4609_v60 = vrot.slane %v8651_v7, 5  ;;  %v8692_v19 = vpop.f32.mrb[112].mxu0 }
 0x28e   : > { %v4290_v0 = vrot.slane %v4288_v15, 1  ;;  %v4295_v49 = vrot.slane %v4293_v9, 1  ;;  %v4612_v36 = vrot.slane %v8663_v34, 5  ;;  %v3051_v10 = vpop.f32.mrb[113].mxu0  ;;  %v3662_v50 = vshrl.u32 %v6727_v14, 16 }
 0x28f   : > { %v3656_v41 = vrot.slane %v3654_v56, 7  ;;  %v3665_v35 = vshll.u32 %v6727_v14, 16  ;;  %v4610_v45 = vsel %vm7271_vm13, %v6506_v8, %v4609_v60  ;;  %v3052_v57 = vpop.f32.mrb[114].mxu0  ;;  %v3933_v7 = vld [vmem:[#allocation4 + $0x60] sm:$0xf]  ;;  %v4611_v21 = vrot.slane %v4609_v60, 4 }
 0x290   : > { %v4291_v5 = vor.u32 %v4290_v0, %v4286_v24  ;;  %v3173_v38 = vadd.f32 %v8377_v44, %v3130_v43  ;;  %v3131_v34 = vadd.f32 %v3044_v29, %v8312_v61  ;;  %v4031_v25 = vld [vmem:[#allocation4 + $0x3c] sm:$0xf]  ;;  %v3054_v52 = vpop.f32.mrb[115].mxu0  ;;  %v3664_v26 = vrot.slane %v3662_v50, 7  ;;  %v4062_v42 = vld [vmem:[#allocation4 + $0x44] sm:$0x1] }
 0x291   : > { %v3659_v32 = vor.u32 %v3657_v63, %v3656_v41  ;;  %v3660_v12 = vrot.slane %v3656_v41, 4  ;;  %v8703_v11 = vcombine.low %v4031_v25, %v8696_v23  ;;  %v3937_v3 = vld [vmem:[#allocation4 + $0x68] sm:$0x1]  ;;  %v4613_v24 = vsel %vm7271_vm13, %v4611_v21, %v4612_v36  ;;  %v4080_v8 = vld [vmem:[#allocation4 + $0x3c] sm:$0xe] }
 0x292   : > { %v4296_v16 = vsel %vm1481_vm12, %v4291_v5, %v4295_v49  ;;  %vm3210_vm0 = vcmp.ge.f32.partialorder %v3173_v38, 0.0  ;;  %v3247_v44 = vmul.f32 %v8383_v51, %v3173_v38  ;;  %v3667_v29 = vor.u32 %v3665_v35, %v3664_v26  ;;  %v8715_v63 = vld [vmem:[%s9723_s4] ss:$0 sm:$0xff] }
 0x293   : > { %v3934_v61 = vsel %vm7206_vm6, %v3659_v32, %v3933_v7  ;;  %v3669_v15 = vrot.slane %v3664_v26, 4  ;;  %v6524_v9 = vcombine.low %v4610_v45, %v4613_v24  ;;  %4461 = vrot.lane.b32.xlu1 %v4296_v16, %s7095_s0  ;;  %v3174_v14 = vadd.f32 %v8715_v63, %v3131_v34  ;;  %v8729_v7 = vld [vmem:[#allocation4 + $0x4c] sm:$0xf] }
 0x294   : > { %3935 = vst [vmem:[#allocation4 + $0x60] sm:$0xf] %v3934_v61  ;;  %v3283_v56 = vsel %vm3210_vm0, %v3173_v38, %v3247_v44  ;;  %v6489_v60 = vcombine.low %v4062_v42, %v4062_v42  ;;  %v4298_v0 = vshrl.u32 %v8703_v11, 16  ;;  %v3668_v49 = vsel %vm7240_vm10, %v3660_v12, %v3667_v29 }
 0x295   : > { %v3938_v36 = vsel %vm7165_vm2, %v3669_v15, %v3937_v3  ;;  %4781 = vst.msk [vmem:[#allocation5 + $0x48] sm:$0xff] %vm1762_vm11, %v6524_v9  ;;  %v6728_v43 = vpack.c.bf16 %v3283_v56, %v3283_v56  ;;  %v4300_v10 = vshll.u32 %v8703_v11, 16  ;;  %v8725_v41 = vpop.f32.mrb[116].mxu0  ;;  %vm3211_vm1 = vcmp.ge.f32.partialorder %v3174_v14, 0.0  ;;  %v4033_v15 = vld [vmem:[#allocation4 + $0x48] sm:$0xf] }
 0x296   : > { %3936 = vst.msk [vmem:[#allocation4 + $0x64] sm:$0xf] %vm966_vm4, %v3668_v49  ;;  %3939 = vst [vmem:[#allocation4 + $0x68] sm:$0x1] %v3938_v36  ;;  %v3248_v50 = vmul.f32 %v8383_v51, %v3174_v14  ;;  %v4305_v35 = vshll.u32 %v6489_v60, 16  ;;  %v6507_v45 = vrot.slane %v4080_v8, 9  ;;  %v3132_v3 = vadd.f32 %v8692_v19, %v8324_v55 }
 0x297   : > { %v3059_v5 = vpop.f32.mrb[117].mxu0  ;;  %v3671_v21 = vshrl.u32 %v6728_v43, 16  ;;  %v3674_v38 = vshll.u32 %v6728_v43, 16  ;;  %v4302_v34 = vrot.slane %v4300_v10, 1  ;;  %v4616_v25 = vrot.slane %v8696_v23, 5 }
 0x298   : > { %v8732_v52 = vpop.f32.mrb[118].mxu0  ;;  %v3284_v32 = vsel %vm3211_vm1, %v3174_v14, %v3248_v50  ;;  %v4307_v12 = vrot.slane %v4305_v35, 1  ;;  %v4619_v26 = vrot.slane %v4062_v42, 5  ;;  %v3940_v9 = vld [vmem:[#allocation4 + $0x6c] sm:$0xf]  ;;  %v3175_v23 = vadd.f32 %v8715_v63, %v3132_v3 }
 0x299   : > { %v3062_v16 = vpop.f32.mrb[119].mxu0  ;;  %v3673_v24 = vrot.slane %v3671_v21, 7  ;;  %v6729_v44 = vpack.c.bf16 %v3284_v32, %v3284_v32  ;;  %v4303_v61 = vor.u32 %v4302_v34, %v4298_v0  ;;  %v4617_v29 = vsel %vm7271_vm13, %v6507_v45, %v4616_v25  ;;  %v4063_v49 = vld [vmem:[#allocation4 + $0x50] sm:$0x1]  ;;  %v4081_v35 = vld [vmem:[#allocation4 + $0x48] sm:$0xe] }
 0x29a   : > { %v4618_v8 = vrot.slane %v4616_v25, 4  ;;  %v3133_v56 = vadd.f32 %v3052_v57, %v8328_v31  ;;  %v8741_v14 = vcombine.low %v4033_v15, %v8729_v7  ;;  %vm3212_vm3 = vcmp.ge.f32.partialorder %v3175_v23, 0.0  ;;  %v3944_v5 = vld [vmem:[#allocation4 + $0x74] sm:$0x1] }
 0x29b   : > { %v3676_v42 = vor.u32 %v3674_v38, %v3673_v24  ;;  %v3677_v60 = vrot.slane %v3673_v24, 4  ;;  %v3679_v55 = vshrl.u32 %v6729_v44, 16  ;;  %v3682_v19 = vshll.u32 %v6729_v44, 16 }
 0x29c   : > { %v4308_v0 = vsel %vm1481_vm12, %v4303_v61, %v4307_v12  ;;  %v4620_v36 = vsel %vm7271_vm13, %v4618_v8, %v4619_v26  ;;  %v3249_v43 = vmul.f32 %v8383_v51, %v3175_v23  ;;  %v3176_v50 = vadd.f32 %v8715_v63, %v3133_v56  ;;  %v9123_v18 = vld [vmem:[#allocation5 + $0x48] sm:$0xff] }
 0x29d   : > { %v3941_v10 = vsel %vm7206_vm6, %v3676_v42, %v3940_v9  ;;  %v3681_v31 = vrot.slane %v3679_v55, 7  ;;  %v6525_v57 = vcombine.low %v4617_v29, %v4620_v36  ;;  %4463 = vrot.lane.b32.xlu0 %v4308_v0, %s7095_s0  ;;  %v8751_v45 = vpop.f32.mrb[120].mxu0  ;;  %v6490_v38 = vcombine.low %v4063_v49, %v4063_v49 }
 0x29e   : > { %3942 = vst [vmem:[#allocation4 + $0x6c] sm:$0xf] %v3941_v10  ;;  %v3285_v21 = vsel %vm3212_vm3, %v3175_v23, %v3249_v43  ;;  %v4310_v34 = vshrl.u32 %v8741_v14, 16  ;;  %v4312_v25 = vshll.u32 %v8741_v14, 16  ;;  %v3067_v32 = vpop.f32.mrb[121].mxu0  ;;  %vm3213_vm7 = vcmp.ge.f32.partialorder %v3176_v50, 0.0 }
 0x29f   : > { %v3684_v12 = vor.u32 %v3682_v19, %v3681_v31  ;;  %v3686_v26 = vrot.slane %v3681_v31, 4  ;;  %4782 = vst.msk [vmem:[#allocation5 + $0x58] sm:$0xff] %vm1762_vm11, %v6525_v57  ;;  %v6730_v3 = vpack.c.bf16 %v3285_v21, %v3285_v21  ;;  %v8756_v16 = vpop.f32.mrb[122].mxu0  ;;  %v3250_v24 = vmul.f32 %v8383_v51, %v3176_v50  ;;  %v3947_v57 = vld [vmem:[#allocation4 + $0x78] sm:$0xf] }
 0x2a0   : > { %v4314_v44 = vrot.slane %v4312_v25, 1  ;;  %v4317_v61 = vshll.u32 %v6490_v38, 16  ;;  %v6508_v29 = vrot.slane %v4081_v35, 9  ;;  %v3070_v15 = vpop.f32.mrb[123].mxu0  ;;  %v4623_v0 = vrot.slane %v8729_v7, 5 }
 0x2a1   : > { %v3685_v9 = vsel %vm7240_vm10, %v3677_v60, %v3684_v12  ;;  %v3945_v8 = vsel %vm7165_vm2, %v3686_v26, %v3944_v5  ;;  %v3688_v23 = vshrl.u32 %v6730_v3, 16  ;;  %v3691_v56 = vshll.u32 %v6730_v3, 16  ;;  %v4036_v60 = vld [vmem:[#allocation4 + $0x58] sm:$0xf]  ;;  %v8772_v38 = vld [vmem:[#allocation4 + $0x5c] sm:$0x1] }
 0x2a2   : > { %3943 = vst.msk [vmem:[#allocation4 + $0x70] sm:$0xf] %vm966_vm4, %v3685_v9  ;;  %3946 = vst [vmem:[#allocation4 + $0x74] sm:$0x1] %v3945_v8  ;;  %v3286_v42 = vsel %vm3213_vm7, %v3176_v50, %v3250_v24  ;;  %v4315_v55 = vor.u32 %v4314_v44, %v4310_v34  ;;  %v4319_v19 = vrot.slane %v4317_v61, 1  ;;  %v4626_v10 = vrot.slane %v4063_v49, 5 }
 0x2a3   : > { %v3690_v36 = vrot.slane %v3688_v23, 7  ;;  %v6731_v43 = vpack.c.bf16 %v3286_v42, %v3286_v42  ;;  %v3134_v31 = vadd.f32 %v8725_v41, %v8337_v59  ;;  %v4624_v5 = vsel %vm7271_vm13, %v6508_v29, %v4623_v0  ;;  %v4035_v59 = vld [vmem:[#allocation4 + $0x54] sm:$0xf]  ;;  %v3951_v9 = vld [vmem:[#allocation4 + $0x80] sm:$0x1] }
 0x2a4   : > { %v4320_v35 = vsel %vm1481_vm12, %v4315_v55, %v4319_v19  ;;  %v4625_v21 = vrot.slane %v4623_v0, 4  ;;  %v3135_v50 = vadd.f32 %v8732_v52, %v8342_v33  ;;  %v8781_v3 = vcombine.low %v4035_v59, %v4036_v60  ;;  %v4082_v61 = vld [vmem:[#allocation4 + $0x54] sm:$0xe] }
 0x2a5   : > { %v3693_v7 = vor.u32 %v3691_v56, %v3690_v36  ;;  %v3694_v34 = vrot.slane %v3690_v36, 4  ;;  %v3696_v25 = vshrl.u32 %v6731_v43, 16  ;;  %v3699_v49 = vshll.u32 %v6731_v43, 16  ;;  %4465 = vrot.lane.b32.xlu1 %v4320_v35, %s7095_s0  ;;  %v8775_v41 = vpop.f32.mrb[124].mxu0 }
 0x2a6   : > { %v4627_v32 = vsel %vm7271_vm13, %v4625_v21, %v4626_v10  ;;  %v3177_v12 = vadd.f32 %v8715_v63, %v3134_v31  ;;  %v3178_v26 = vadd.f32 %v8715_v63, %v3135_v50  ;;  %v3075_v33 = vpop.f32.mrb[125].mxu0  ;;  %v6491_v29 = vcombine.low %v8772_v38, %v8772_v38  ;;  %v8798_v50 = vld [vmem:[#allocation4 + $0x64] sm:$0xf] }
 0x2a7   : > { %v3948_v52 = vsel %vm7206_vm6, %v3693_v7, %v3947_v57  ;;  %v3698_v24 = vrot.slane %v3696_v25, 7  ;;  %v6526_v44 = vcombine.low %v4624_v5, %v4627_v32  ;;  %v8787_v15 = vpop.f32.mrb[126].mxu0  ;;  %v4322_v19 = vshrl.u32 %v8781_v3, 16  ;;  %v8802_v32 = vld [vmem:[#allocation4 + $0x68] sm:$0x1] }
 0x2a8   : > { %3949 = vst [vmem:[#allocation4 + $0x78] sm:$0xf] %v3948_v52  ;;  %vm3214_vm8 = vcmp.ge.f32.partialorder %v3177_v12, 0.0  ;;  %v3251_v8 = vmul.f32 %v8383_v51, %v3177_v12  ;;  %vm3215_vm9 = vcmp.ge.f32.partialorder %v3178_v26, 0.0  ;;  %v3252_v23 = vmul.f32 %v8383_v51, %v3178_v26  ;;  %v3078_v56 = vpop.f32.mrb[127].mxu0 }
 0x2a9   : > { %v3701_v42 = vor.u32 %v3699_v49, %v3698_v24  ;;  %v3703_v55 = vrot.slane %v3698_v24, 4  ;;  %4783 = vst.msk [vmem:[#allocation5 + $0x68] sm:$0xff] %vm1762_vm11, %v6526_v44  ;;  %v4324_v0 = vshll.u32 %v8781_v3, 16  ;;  %v4329_v10 = vshll.u32 %v6491_v29, 16 }
 0x2aa   : > { %v3287_v36 = vsel %vm3214_vm8, %v3177_v12, %v3251_v8  ;;  %v3288_v43 = vsel %vm3215_vm9, %v3178_v26, %v3252_v23  ;;  %v6509_v31 = vrot.slane %v4082_v61, 9  ;;  %v4630_v49 = vrot.slane %v4036_v60, 5 }
 0x2ab   : > { %v3702_v57 = vsel %vm7240_vm10, %v3694_v34, %v3701_v42  ;;  %v3952_v35 = vsel %vm7165_vm2, %v3703_v55, %v3951_v9  ;;  %v6732_v5 = vpack.c.bf16 %v3287_v36, %v3287_v36  ;;  %v6733_v21 = vpack.c.bf16 %v3288_v43, %v3288_v43  ;;  %v4037_v9 = vld [vmem:[#allocation4 + $0x60] sm:$0xf]  ;;  %v3954_v55 = vld [vmem:[#allocation4 + $0x84] sm:$0xf] }
 0x2ac   : > { %3950 = vst.msk [vmem:[#allocation4 + $0x7c] sm:$0xf] %vm966_vm4, %v3702_v57  ;;  %3953 = vst [vmem:[#allocation4 + $0x80] sm:$0x1] %v3952_v35  ;;  %v4326_v7 = vrot.slane %v4324_v0, 1  ;;  %v4331_v25 = vrot.slane %v4329_v10, 1  ;;  %v4631_v44 = vsel %vm7271_vm13, %v6509_v31, %v4630_v49  ;;  %v3136_v29 = vadd.f32 %v8751_v45, %v8355_v37 }
 0x2ad   : > { %v4633_v59 = vrot.slane %v8772_v38, 5  ;;  %v3705_v12 = vshrl.u32 %v6732_v5, 16  ;;  %v3708_v26 = vshll.u32 %v6732_v5, 16  ;;  %v3713_v34 = vshrl.u32 %v6733_v21, 16  ;;  %v8804_v52 = vpop.f32.mrb[128].mxu0 }
 0x2ae   : > { %v3716_v33 = vshll.u32 %v6733_v21, 16  ;;  %v4327_v24 = vor.u32 %v4326_v7, %v4322_v19  ;;  %v4632_v61 = vrot.slane %v4630_v49, 4  ;;  %v3083_v60 = vpop.f32.mrb[129].mxu0  ;;  %v3137_v23 = vadd.f32 %v8756_v16, %v8358_v6  ;;  %v3958_v19 = vld [vmem:[#allocation4 + $0x8c] sm:$0x1] }
 0x2af   : > { %v3707_v8 = vrot.slane %v3705_v12, 7  ;;  %v3715_v38 = vrot.slane %v3713_v34, 7  ;;  %v8813_v56 = vcombine.low %v4037_v9, %v8798_v50  ;;  %v8815_v42 = vpop.f32.mrb[130].mxu0  ;;  %v3179_v37 = vadd.f32 %v8715_v63, %v3136_v29  ;;  %v4083_v21 = vld [vmem:[#allocation4 + $0x60] sm:$0xe] }
 0x2b0   : > { %v4332_v0 = vsel %vm1481_vm12, %v4327_v24, %v4331_v25  ;;  %v4634_v36 = vsel %vm7271_vm13, %v4632_v61, %v4633_v59  ;;  %v6492_v45 = vcombine.low %v8802_v32, %v8802_v32  ;;  %v3086_v43 = vpop.f32.mrb[131].mxu0  ;;  %v3180_v5 = vadd.f32 %v8715_v63, %v3137_v23 }
 0x2b1   : > { %v3710_v10 = vor.u32 %v3708_v26, %v3707_v8  ;;  %v3711_v6 = vrot.slane %v3707_v8, 4  ;;  %v3718_v16 = vor.u32 %v3716_v33, %v3715_v38  ;;  %v3720_v31 = vrot.slane %v3715_v38, 4  ;;  %4467 = vrot.lane.b32.xlu0 %v4332_v0, %s7095_s0 }
 0x2b2   : > { %v6527_v57 = vcombine.low %v4631_v44, %v4634_v36  ;;  %vm3216_vm14 = vcmp.ge.f32.partialorder %v3179_v37, 0.0  ;;  %v3253_v35 = vmul.f32 %v8383_v51, %v3179_v37  ;;  %v4334_v59 = vshrl.u32 %v8813_v56, 16 }
 0x2b3   : > { %v3955_v7 = vsel %vm7206_vm6, %v3710_v10, %v3954_v55  ;;  %v3719_v25 = vsel %vm7240_vm10, %v3711_v6, %v3718_v16  ;;  %v3959_v49 = vsel %vm7165_vm2, %v3720_v31, %v3958_v19  ;;  %vm3217_vm15 = vcmp.ge.f32.partialorder %v3180_v5, 0.0  ;;  %v8848_v6 = vld [vmem:[#allocation4 + $0x70] sm:$0xf] }
 0x2b4   : > { %3956 = vst [vmem:[#allocation4 + $0x84] sm:$0xf] %v3955_v7  ;;  %3957 = vst.msk [vmem:[#allocation4 + $0x88] sm:$0xf] %vm966_vm4, %v3719_v25  ;;  %v3289_v12 = vsel %vm3216_vm14, %v3179_v37, %v3253_v35  ;;  %v3254_v26 = vmul.f32 %v8383_v51, %v3180_v5  ;;  %v4336_v34 = vshll.u32 %v8813_v56, 16  ;;  %v4341_v24 = vshll.u32 %v6492_v45, 16 }
 0x2b5   : > { %3960 = vst [vmem:[#allocation4 + $0x8c] sm:$0x1] %v3959_v49  ;;  %4784 = vst.msk [vmem:[#allocation5 + $0x78] sm:$0xff] %vm1762_vm11, %v6527_v57  ;;  %v6734_v33 = vpack.c.bf16 %v3289_v12, %v3289_v12  ;;  %v6510_v44 = vrot.slane %v4083_v21, 9  ;;  %v4637_v61 = vrot.slane %v8798_v50, 5  ;;  %v8838_v29 = vpop.f32.mrb[132].mxu0  ;;  %v3138_v38 = vadd.f32 %v8775_v41, %v8369_v47 }
 0x2b6   : > { %v3290_v9 = vsel %vm3217_vm15, %v3180_v5, %v3254_v26  ;;  %v4338_v60 = vrot.slane %v4336_v34, 1  ;;  %v4640_v8 = vrot.slane %v8802_v32, 5  ;;  %v3091_v23 = vpop.f32.mrb[133].mxu0  ;;  %v4343_v36 = vrot.slane %v4341_v24, 1  ;;  %v8852_v57 = vld [vmem:[#allocation4 + $0x74] sm:$0x1] }
 0x2b7   : > { %v3722_v55 = vshrl.u32 %v6734_v33, 16  ;;  %v3725_v19 = vshll.u32 %v6734_v33, 16  ;;  %v6735_v0 = vpack.c.bf16 %v3290_v9, %v3290_v9  ;;  %v8843_v37 = vpop.f32.mrb[134].mxu0  ;;  %v4638_v50 = vsel %vm7271_vm13, %v6510_v44, %v4637_v61  ;;  %v3961_v35 = vld [vmem:[#allocation4 + $0x90] sm:$0xf] }
 0x2b8   : > { %v4339_v45 = vor.u32 %v4338_v60, %v4334_v59  ;;  %v4639_v43 = vrot.slane %v4637_v61, 4  ;;  %v3181_v10 = vadd.f32 %v8715_v63, %v3138_v38  ;;  %v3094_v32 = vpop.f32.mrb[135].mxu0  ;;  %v3139_v41 = vadd.f32 %v8787_v15, %v8372_v62  ;;  %v4039_v26 = vld [vmem:[#allocation4 + $0x6c] sm:$0xf]  ;;  %v3965_v34 = vld [vmem:[#allocation4 + $0x98] sm:$0x1] }
 0x2b9   : > { %v3724_v16 = vrot.slane %v3722_v55, 7  ;;  %v3730_v31 = vshrl.u32 %v6735_v0, 16  ;;  %v3733_v47 = vshll.u32 %v6735_v0, 16  ;;  %v8861_v33 = vcombine.low %v4039_v26, %v8848_v6 }
 0x2ba   : > { %v4344_v5 = vsel %vm1481_vm12, %v4339_v45, %v4343_v36  ;;  %v4641_v21 = vsel %vm7271_vm13, %v4639_v43, %v4640_v8  ;;  %vm3218_vm0 = vcmp.ge.f32.partialorder %v3181_v10, 0.0  ;;  %v3255_v7 = vmul.f32 %v8383_v51, %v3181_v10  ;;  %v4084_v8 = vld [vmem:[#allocation4 + $0x6c] sm:$0xe] }
 0x2bb   : > { %v3727_v25 = vor.u32 %v3725_v19, %v3724_v16  ;;  %v3728_v49 = vrot.slane %v3724_v16, 4  ;;  %v3732_v59 = vrot.slane %v3730_v31, 7  ;;  %v6528_v12 = vcombine.low %v4638_v50, %v4641_v21  ;;  %4469 = vrot.lane.b32.xlu1 %v4344_v5, %s7095_s0 }
 0x2bc   : > { %v3291_v62 = vsel %vm3218_vm0, %v3181_v10, %v3255_v7  ;;  %v3182_v15 = vadd.f32 %v8715_v63, %v3139_v41  ;;  %v6493_v24 = vcombine.low %v8852_v57, %v8852_v57  ;;  %v4346_v55 = vshrl.u32 %v8861_v33, 16 }
 0x2bd   : > { %v3962_v44 = vsel %vm7206_vm6, %v3727_v25, %v3961_v35  ;;  %v3735_v61 = vor.u32 %v3733_v47, %v3732_v59  ;;  %v3737_v9 = vrot.slane %v3732_v59, 4  ;;  %4785 = vst.msk [vmem:[#allocation5 + $0x88] sm:$0xff] %vm1762_vm11, %v6528_v12  ;;  %v6736_v60 = vpack.c.bf16 %v3291_v62, %v3291_v62  ;;  %v8868_v38 = vpop.f32.mrb[136].mxu0  ;;  %v3968_v25 = vld [vmem:[#allocation4 + $0x9c] sm:$0xf] }
 0x2be   : > { %3963 = vst [vmem:[#allocation4 + $0x90] sm:$0xf] %v3962_v44  ;;  %vm3219_vm1 = vcmp.ge.f32.partialorder %v3182_v15, 0.0  ;;  %v3256_v23 = vmul.f32 %v8383_v51, %v3182_v15  ;;  %v4348_v19 = vshll.u32 %v8861_v33, 16  ;;  %v3099_v0 = vpop.f32.mrb[137].mxu0  ;;  %v4353_v31 = vshll.u32 %v6493_v24, 16 }
 0x2bf   : > { %v3736_v36 = vsel %vm7240_vm10, %v3728_v49, %v3735_v61  ;;  %v3966_v45 = vsel %vm7165_vm2, %v3737_v9, %v3965_v34  ;;  %v3739_v50 = vshrl.u32 %v6736_v60, 16  ;;  %v3742_v43 = vshll.u32 %v6736_v60, 16  ;;  %v8877_v10 = vpop.f32.mrb[138].mxu0  ;;  %v4042_v34 = vld [vmem:[#allocation4 + $0x7c] sm:$0xf] }
 0x2c0   : > { %3964 = vst.msk [vmem:[#allocation4 + $0x94] sm:$0xf] %vm966_vm4, %v3736_v36  ;;  %3967 = vst [vmem:[#allocation4 + $0x98] sm:$0x1] %v3966_v45  ;;  %v3292_v32 = vsel %vm3219_vm1, %v3182_v15, %v3256_v23  ;;  %v4350_v16 = vrot.slane %v4348_v19, 1  ;;  %v6511_v47 = vrot.slane %v4084_v8, 9  ;;  %v3140_v12 = vadd.f32 %v8804_v52, %v8390_v27 }
 0x2c1   : > { %v3102_v41 = vpop.f32.mrb[139].mxu0  ;;  %v3741_v35 = vrot.slane %v3739_v50, 7  ;;  %v6737_v5 = vpack.c.bf16 %v3292_v32, %v3292_v32  ;;  %v4644_v21 = vrot.slane %v8848_v6, 5  ;;  %v4647_v7 = vrot.slane %v8852_v57, 5  ;;  %v4067_v61 = vld [vmem:[#allocation4 + $0x80] sm:$0x1] }
 0x2c2   : > { %v4351_v49 = vor.u32 %v4350_v16, %v4346_v55  ;;  %v4355_v59 = vrot.slane %v4353_v31, 1  ;;  %v3141_v26 = vadd.f32 %v8815_v42, %v8398_v46  ;;  %v3183_v60 = vadd.f32 %v8715_v63, %v3140_v12  ;;  %v4041_v8 = vld [vmem:[#allocation4 + $0x78] sm:$0xf]  ;;  %v3972_v55 = vld [vmem:[#allocation4 + $0xa4] sm:$0x1] }
 0x2c3   : > { %v3744_v62 = vor.u32 %v3742_v43, %v3741_v35  ;;  %v3745_v15 = vrot.slane %v3741_v35, 4  ;;  %v3747_v24 = vshrl.u32 %v6737_v5, 16  ;;  %v3750_v44 = vshll.u32 %v6737_v5, 16  ;;  %v4085_v16 = vld [vmem:[#allocation4 + $0x78] sm:$0xe] }
 0x2c4   : > { %v4356_v9 = vsel %vm1481_vm12, %v4351_v49, %v4355_v59  ;;  %v4645_v6 = vsel %vm7271_vm13, %v6511_v47, %v4644_v21  ;;  %v4646_v57 = vrot.slane %v4644_v21, 4  ;;  %v3184_v46 = vadd.f32 %v8715_v63, %v3141_v26 }
 0x2c5   : > { %v3969_v27 = vsel %vm7206_vm6, %v3744_v62, %v3968_v25  ;;  %v3749_v52 = vrot.slane %v3747_v24, 7  ;;  %4471 = vrot.lane.b32.xlu0 %v4356_v9, %s7095_s0  ;;  %v8894_v42 = vcombine.low %v4041_v8, %v4042_v34  ;;  %v8896_v23 = vpop.f32.mrb[140].mxu0  ;;  %vm3220_vm3 = vcmp.ge.f32.partialorder %v3183_v60, 0.0 }
 0x2c6   : > { %3970 = vst [vmem:[#allocation4 + $0x9c] sm:$0xf] %v3969_v27  ;;  %v4648_v19 = vsel %vm7271_vm13, %v4646_v57, %v4647_v7  ;;  %v3257_v0 = vmul.f32 %v8383_v51, %v3183_v60  ;;  %v6494_v36 = vcombine.low %v4067_v61, %v4067_v61  ;;  %v3107_v45 = vpop.f32.mrb[141].mxu0  ;;  %vm3221_vm7 = vcmp.ge.f32.partialorder %v3184_v46, 0.0 }
 0x2c7   : > { %v3752_v50 = vor.u32 %v3750_v44, %v3749_v52  ;;  %v3754_v43 = vrot.slane %v3749_v52, 4  ;;  %v6529_v32 = vcombine.low %v4645_v6, %v4648_v19  ;;  %v3258_v47 = vmul.f32 %v8383_v51, %v3184_v46  ;;  %v8904_v5 = vpop.f32.mrb[142].mxu0  ;;  %v4068_v45 = vld [vmem:[#allocation4 + $0x8c] sm:$0x1] }
 0x2c8   : > { %v3293_v31 = vsel %vm3220_vm3, %v3183_v60, %v3257_v0  ;;  %v4358_v41 = vshrl.u32 %v8894_v42, 16  ;;  %v4360_v35 = vshll.u32 %v8894_v42, 16  ;;  %v4365_v49 = vshll.u32 %v6494_v36, 16  ;;  %v3110_v59 = vpop.f32.mrb[143].mxu0 }
 0x2c9   : > { %v3753_v21 = vsel %vm7240_vm10, %v3745_v15, %v3752_v50  ;;  %v3973_v7 = vsel %vm7165_vm2, %v3754_v43, %v3972_v55  ;;  %4786 = vst.msk [vmem:[#allocation5 + $0x98] sm:$0xff] %vm1762_vm11, %v6529_v32  ;;  %v6738_v25 = vpack.c.bf16 %v3293_v31, %v3293_v31  ;;  %v3294_v12 = vsel %vm3221_vm7, %v3184_v46, %v3258_v47  ;;  %v4044_v15 = vld [vmem:[#allocation4 + $0x88] sm:$0xf]  ;;  %v4043_v55 = vld [vmem:[#allocation4 + $0x84] sm:$0xf] }
 0x2ca   : > { %3971 = vst.msk [vmem:[#allocation4 + $0xa0] sm:$0xf] %vm966_vm4, %v3753_v21  ;;  %3974 = vst [vmem:[#allocation4 + $0xa4] sm:$0x1] %v3973_v7  ;;  %v4362_v26 = vrot.slane %v4360_v35, 1  ;;  %v6512_v62 = vrot.slane %v4085_v16, 9  ;;  %v6739_v6 = vpack.c.bf16 %v3294_v12, %v3294_v12  ;;  %v3142_v46 = vadd.f32 %v8838_v29, %v8405_v22 }
 0x2cb   : > { %v4651_v24 = vrot.slane %v4042_v34, 5  ;;  %v3756_v44 = vshrl.u32 %v6738_v25, 16  ;;  %v3759_v9 = vshll.u32 %v6738_v25, 16  ;;  %v4367_v57 = vrot.slane %v4365_v49, 1  ;;  %v3975_v34 = vld [vmem:[#allocation4 + $0xa8] sm:$0xf] }
 0x2cc   : > { %v4363_v60 = vor.u32 %v4362_v26, %v4358_v41  ;;  %v4654_v52 = vrot.slane %v4067_v61, 5  ;;  %v3764_v0 = vshrl.u32 %v6739_v6, 16  ;;  %v3767_v36 = vshll.u32 %v6739_v6, 16  ;;  %v3979_v35 = vld [vmem:[#allocation4 + $0xb0] sm:$0x1] }
 0x2cd   : > { %v4652_v8 = vsel %vm7271_vm13, %v6512_v62, %v4651_v24  ;;  %v4653_v27 = vrot.slane %v4651_v24, 4  ;;  %v3758_v19 = vrot.slane %v3756_v44, 7  ;;  %v3143_v32 = vadd.f32 %v8843_v37, %v8412_v39  ;;  %v4086_v49 = vld [vmem:[#allocation4 + $0x84] sm:$0xe] }
 0x2ce   : > { %v4368_v50 = vsel %vm1481_vm12, %v4363_v60, %v4367_v57  ;;  %v8921_v16 = vcombine.low %v4043_v55, %v4044_v15  ;;  %v3766_v47 = vrot.slane %v3764_v0, 7  ;;  %v3185_v22 = vadd.f32 %v8715_v63, %v3142_v46  ;;  %v3349_v0 = vld [vmem:[#allocation4 + $0xc0] sm:$0x1] }
 0x2cf   : > { %v4655_v43 = vsel %vm7271_vm13, %v4653_v27, %v4654_v52  ;;  %v3761_v61 = vor.u32 %v3759_v9, %v3758_v19  ;;  %v3762_v31 = vrot.slane %v3758_v19, 4  ;;  %4473 = vrot.lane.b32.xlu1 %v4368_v50, %s7095_s0  ;;  %v3186_v29 = vadd.f32 %v8715_v63, %v3143_v32 }
 0x2d0   : > { %v6530_v41 = vcombine.low %v4652_v8, %v4655_v43  ;;  %v6495_v21 = vcombine.low %v4068_v45, %v4068_v45  ;;  %v4370_v7 = vshrl.u32 %v8921_v16, 16  ;;  %v3769_v39 = vor.u32 %v3767_v36, %v3766_v47  ;;  %v3403_v43 = vld [vmem:[#allocation4 + $0xc8] sm:$0x1] }
 0x2d1   : > { %v3976_v25 = vsel %vm7206_vm6, %v3761_v61, %v3975_v34  ;;  %v3771_v37 = vrot.slane %v3766_v47, 4  ;;  %v4372_v59 = vshll.u32 %v8921_v16, 16  ;;  %vm3222_vm8 = vcmp.ge.f32.partialorder %v3185_v22, 0.0 }
 0x2d2   : > { %4787 = vst.msk [vmem:[#allocation5 + $0xa8] sm:$0xff] %vm1762_vm11, %v6530_v41  ;;  %3977 = vst [vmem:[#allocation4 + $0xa8] sm:$0xf] %v3976_v25  ;;  %v3259_v12 = vmul.f32 %v8383_v51, %v3185_v22  ;;  %vm3223_vm9 = vcmp.ge.f32.partialorder %v3186_v29, 0.0  ;;  %v3260_v26 = vmul.f32 %v8383_v51, %v3186_v29  ;;  %v3770_v62 = vsel %vm7240_vm10, %v3762_v31, %v3769_v39  ;;  %v4046_v41 = vld [vmem:[#allocation4 + $0x94] sm:$0xf] }
 0x2d3   : > { %v3980_v24 = vsel %vm7165_vm2, %v3771_v37, %v3979_v35  ;;  %v4374_v44 = vrot.slane %v4372_v59, 1  ;;  %v4377_v9 = vshll.u32 %v6495_v21, 16  ;;  %3978 = vst.msk [vmem:[#allocation4 + $0xac] sm:$0xf] %vm966_vm4, %v3770_v62  ;;  %v6513_v60 = vrot.slane %v4086_v49, 9 }
 0x2d4   : > { %3981 = vst [vmem:[#allocation4 + $0xb0] sm:$0x1] %v3980_v24  ;;  %v3295_v6 = vsel %vm3222_vm8, %v3185_v22, %v3259_v12  ;;  %v3296_v57 = vsel %vm3223_vm9, %v3186_v29, %v3260_v26  ;;  %v4658_v8 = vrot.slane %v4044_v15, 5  ;;  %v4661_v34 = vrot.slane %v4068_v45, 5  ;;  %v4069_v25 = vld [vmem:[#allocation4 + $0x98] sm:$0x1] }
 0x2d5   : > { %v6740_v27 = vpack.c.bf16 %v3295_v6, %v3295_v6  ;;  %v6741_v52 = vpack.c.bf16 %v3296_v57, %v3296_v57  ;;  %v4375_v55 = vor.u32 %v4374_v44, %v4370_v7  ;;  %v4379_v19 = vrot.slane %v4377_v9, 1  ;;  %v3982_v39 = vld [vmem:[#allocation4 + $0xb4] sm:$0xf]  ;;  %v3986_v37 = vld [vmem:[#allocation4 + $0xbc] sm:$0x1] }
 0x2d6   : > { %v4659_v36 = vsel %vm7271_vm13, %v6513_v60, %v4658_v8  ;;  %v4660_v46 = vrot.slane %v4658_v8, 4  ;;  %v3144_v50 = vadd.f32 %v8868_v38, %v8432_v30  ;;  %v3350_v29 = vsel %vm7165_vm2, 0, %v3349_v0  ;;  %v4045_v38 = vld [vmem:[#allocation4 + $0x90] sm:$0xf] }
 0x2d7   : > { %v3773_v32 = vshrl.u32 %v6740_v27, 16  ;;  %v3776_v61 = vshll.u32 %v6740_v27, 16  ;;  %v3781_v31 = vshrl.u32 %v6741_v52, 16  ;;  %v3784_v47 = vshll.u32 %v6741_v52, 16  ;;  %3351 = vst [vmem:[#allocation4 + $0xc0] sm:$0x1] %v3350_v29 }
 0x2d8   : > { %v4380_v15 = vsel %vm1481_vm12, %v4375_v55, %v4379_v19  ;;  %v4662_v35 = vsel %vm7271_vm13, %v4660_v46, %v4661_v34  ;;  %v3187_v22 = vadd.f32 %v8715_v63, %v3144_v50  ;;  %v3145_v30 = vadd.f32 %v8877_v10, %v8439_v54  ;;  %v4087_v9 = vld [vmem:[#allocation4 + $0x90] sm:$0xe] }
 0x2d9   : > { %v3775_v45 = vrot.slane %v3773_v32, 7  ;;  %v3783_v21 = vrot.slane %v3781_v31, 7  ;;  %v6531_v7 = vcombine.low %v4659_v36, %v4662_v35  ;;  %4475 = vrot.lane.b32.xlu0 %v4380_v15, %s7095_s0  ;;  %v3404_v59 = vsel %vm7172_vm5, 0, %v3403_v43  ;;  %v3352_v43 = vld [vmem:[#allocation4 + $0xcc] sm:$0x1] }
 0x2da   : > { %vm3224_vm14 = vcmp.ge.f32.partialorder %v3187_v22, 0.0  ;;  %v3261_v49 = vmul.f32 %v8383_v51, %v3187_v22  ;;  %v8954_v12 = vcombine.low %v4045_v38, %v4046_v41  ;;  %3405 = vst [vmem:[#allocation4 + $0xc8] sm:$0x1] %v3404_v59  ;;  %v3188_v10 = vadd.f32 %v8715_v63, %v3145_v30  ;;  %v3406_v38 = vld [vmem:[#allocation4 + $0xd4] sm:$0x1] }
 0x2db   : > { %v3778_v26 = vor.u32 %v3776_v61, %v3775_v45  ;;  %v3779_v62 = vrot.slane %v3775_v45, 4  ;;  %v3786_v24 = vor.u32 %v3784_v47, %v3783_v21  ;;  %v3788_v44 = vrot.slane %v3783_v21, 4  ;;  %4788 = vst.msk [vmem:[#allocation5 + $0xb8] sm:$0xff] %vm1762_vm11, %v6531_v7 }
 0x2dc   : > { %v3297_v54 = vsel %vm3224_vm14, %v3187_v22, %v3261_v49  ;;  %v6496_v6 = vcombine.low %v4069_v25, %v4069_v25  ;;  %v4382_v57 = vshrl.u32 %v8954_v12, 16  ;;  %vm3225_vm15 = vcmp.ge.f32.partialorder %v3188_v10, 0.0 }
 0x2dd   : > { %v3983_v60 = vsel %vm7206_vm6, %v3778_v26, %v3982_v39  ;;  %v3787_v8 = vsel %vm7240_vm10, %v3779_v62, %v3786_v24  ;;  %v3987_v27 = vsel %vm7165_vm2, %v3788_v44, %v3986_v37  ;;  %v6742_v52 = vpack.c.bf16 %v3297_v54, %v3297_v54  ;;  %v4070_v24 = vld [vmem:[#allocation4 + $0xa4] sm:$0x1] }
 0x2de   : > { %3984 = vst [vmem:[#allocation4 + $0xb4] sm:$0xf] %v3983_v60  ;;  %3985 = vst.msk [vmem:[#allocation4 + $0xb8] sm:$0xf] %vm966_vm4, %v3787_v8  ;;  %v3262_v55 = vmul.f32 %v8383_v51, %v3188_v10  ;;  %v4384_v19 = vshll.u32 %v8954_v12, 16  ;;  %v4389_v0 = vshll.u32 %v6496_v6, 16  ;;  %v3146_v7 = vadd.f32 %v8896_v23, %v8459_v48 }
 0x2df   : > { %3988 = vst [vmem:[#allocation4 + $0xbc] sm:$0x1] %v3987_v27  ;;  %v3790_v36 = vshrl.u32 %v6742_v52, 16  ;;  %v3793_v46 = vshll.u32 %v6742_v52, 16  ;;  %v6514_v34 = vrot.slane %v4087_v9, 9  ;;  %v4665_v50 = vrot.slane %v4046_v41, 5 }
 0x2e0   : > { %v3298_v32 = vsel %vm3225_vm15, %v3188_v10, %v3262_v55  ;;  %v4386_v61 = vrot.slane %v4384_v19, 1  ;;  %v4391_v31 = vrot.slane %v4389_v0, 1  ;;  %v4668_v47 = vrot.slane %v4069_v25, 5  ;;  %v3989_v45 = vld [vmem:[#allocation4 + $0xc0] sm:$0xf] }
 0x2e1   : > { %v3792_v15 = vrot.slane %v3790_v36, 7  ;;  %v6743_v35 = vpack.c.bf16 %v3298_v32, %v3298_v32  ;;  %v4666_v22 = vsel %vm7271_vm13, %v6514_v34, %v4665_v50  ;;  %v4667_v29 = vrot.slane %v4665_v50, 4  ;;  %v4048_v23 = vld [vmem:[#allocation4 + $0xa0] sm:$0xf]  ;;  %v4088_v10 = vld [vmem:[#allocation4 + $0x9c] sm:$0xe] }
 0x2e2   : > { %v4387_v21 = vor.u32 %v4386_v61, %v4382_v57  ;;  %v3353_v30 = vsel %vm7165_vm2, 0, %v3352_v43  ;;  %v3147_v41 = vadd.f32 %v8904_v5, %v8462_v58  ;;  %v3189_v62 = vadd.f32 %v8715_v63, %v3146_v7  ;;  %v3993_v9 = vld [vmem:[#allocation4 + $0xc8] sm:$0x1]  ;;  %v4047_v57 = vld [vmem:[#allocation4 + $0x9c] sm:$0xf] }
 0x2e3   : > { %v3795_v39 = vor.u32 %v3793_v46, %v3792_v15  ;;  %v3796_v25 = vrot.slane %v3792_v15, 4  ;;  %v3798_v37 = vshrl.u32 %v6743_v35, 16  ;;  %v3801_v49 = vshll.u32 %v6743_v35, 16  ;;  %3354 = vst [vmem:[#allocation4 + $0xcc] sm:$0x1] %v3353_v30 }
 0x2e4   : > { %v4392_v59 = vsel %vm1481_vm12, %v4387_v21, %v4391_v31  ;;  %v4669_v26 = vsel %vm7271_vm13, %v4667_v29, %v4668_v47  ;;  %v3190_v48 = vadd.f32 %v8715_v63, %v3147_v41  ;;  %v3407_v54 = vsel %vm7172_vm5, 0, %v3406_v38  ;;  %v4050_v50 = vld [vmem:[#allocation4 + $0xac] sm:$0xf]  ;;  %v4071_v31 = vld [vmem:[#allocation4 + $0xb0] sm:$0x1] }
 0x2e5   : > { %v3990_v58 = vsel %vm7206_vm6, %v3795_v39, %v3989_v45  ;;  %v3800_v5 = vrot.slane %v3798_v37, 7  ;;  %v6532_v44 = vcombine.low %v4666_v22, %v4669_v26  ;;  %4477 = vrot.lane.b32.xlu1 %v4392_v59, %s7095_s0  ;;  %vm3226_vm0 = vcmp.ge.f32.partialorder %v3189_v62, 0.0  ;;  %3408 = vst [vmem:[#allocation4 + $0xd4] sm:$0x1] %v3407_v54  ;;  %v4049_v30 = vld [vmem:[#allocation4 + $0xa8] sm:$0xf] }
 0x2e6   : > { %3991 = vst [vmem:[#allocation4 + $0xc0] sm:$0xf] %v3990_v58  ;;  %v3263_v6 = vmul.f32 %v8383_v51, %v3189_v62  ;;  %vm3227_vm1 = vcmp.ge.f32.partialorder %v3190_v48, 0.0  ;;  %v3264_v63 = vmul.f32 %v8383_v51, %v3190_v48  ;;  %v8989_v27 = vcombine.low %v4047_v57, %v4048_v23  ;;  %v4089_v39 = vld [vmem:[#allocation4 + $0xa8] sm:$0xe] }
 0x2e7   : > { %v3803_v60 = vor.u32 %v3801_v49, %v3800_v5  ;;  %v3805_v8 = vrot.slane %v3800_v5, 4  ;;  %4789 = vst.msk [vmem:[#allocation5 + $0xc8] sm:$0xff] %vm1762_vm11, %v6532_v44  ;;  %v6497_v52 = vcombine.low %v4070_v24, %v4070_v24  ;;  %v6515_v19 = vrot.slane %v4088_v10, 9  ;;  %v4072_v57 = vld [vmem:[#allocation4 + $0xbc] sm:$0x1] }
 0x2e8   : > { %v3299_v4 = vsel %vm3226_vm0, %v3189_v62, %v3263_v6  ;;  %v3300_v55 = vsel %vm3227_vm1, %v3190_v48, %v3264_v63  ;;  %v4672_v0 = vrot.slane %v4048_v23, 5  ;;  %v4394_v43 = vshrl.u32 %v8989_v27, 16  ;;  %v4052_v63 = vld [vmem:[#allocation4 + $0xb8] sm:$0xf]  ;;  %v4051_v40 = vld [vmem:[#allocation4 + $0xb4] sm:$0xf] }
 0x2e9   : > { %v3804_v36 = vsel %vm7240_vm10, %v3796_v25, %v3803_v60  ;;  %v3994_v46 = vsel %vm7165_vm2, %v3805_v8, %v3993_v9  ;;  %v6744_v51 = vpack.c.bf16 %v3299_v4, %v3299_v4  ;;  %v6745_v34 = vpack.c.bf16 %v3300_v55, %v3300_v55  ;;  %v4090_v55 = vld [vmem:[#allocation4 + $0xb4] sm:$0xe] }
 0x2ea   : > { %3992 = vst.msk [vmem:[#allocation4 + $0xc4] sm:$0xf] %vm966_vm4, %v3804_v36  ;;  %3995 = vst [vmem:[#allocation4 + $0xc8] sm:$0x1] %v3994_v46  ;;  %v4396_v32 = vshll.u32 %v8989_v27, 16  ;;  %v4401_v61 = vshll.u32 %v6497_v52, 16  ;;  %v4673_v22 = vsel %vm7271_vm13, %v6515_v19, %v4672_v0  ;;  %v9000_v25 = vcombine.low %v4049_v30, %v4050_v50 }
 0x2eb   : > { %v3807_v47 = vshrl.u32 %v6744_v51, 16  ;;  %v3810_v15 = vshll.u32 %v6744_v51, 16  ;;  %v3815_v35 = vshrl.u32 %v6745_v34, 16  ;;  %v3818_v29 = vshll.u32 %v6745_v34, 16  ;;  %v3996_v49 = vld [vmem:[#allocation4 + $0xcc] sm:$0xf] }
 0x2ec   : > { %v4398_v45 = vrot.slane %v4396_v32, 1  ;;  %v4674_v21 = vrot.slane %v4672_v0, 4  ;;  %v4675_v7 = vrot.slane %v4070_v24, 5  ;;  %v6498_v37 = vcombine.low %v4071_v31, %v4071_v31  ;;  %v4000_v59 = vld [vmem:[#allocation4 + $0xd4] sm:$0x1]  ;;  %v4456_v32 = vpop.permute.xlu0 %4455 }
 0x2ed   : > { %v3809_v41 = vrot.slane %v3807_v47, 7  ;;  %v3817_v38 = vrot.slane %v3815_v35, 7  ;;  %v4403_v62 = vrot.slane %v4401_v61, 1  ;;  %v4679_v23 = vrot.slane %v4050_v50, 5  ;;  %v4021_v61 = vld [vmem:[#allocation4] sm:$0xf] }
 0x2ee   : > { %v4399_v26 = vor.u32 %v4398_v45, %v4394_v43  ;;  %v4676_v48 = vsel %vm7271_vm13, %v4674_v21, %v4675_v7  ;;  %v4408_v9 = vshll.u32 %v9000_v25, 16  ;;  %v6516_v6 = vrot.slane %v4089_v39, 9  ;;  %v4022_v47 = vld [vmem:[#allocation4 + $0x4] sm:$0xf]  ;;  %v7039_v45 = vld [vmem:[%s9724_s5] sm:$0xff]  }
 0x2ef   : > { %v3812_v58 = vor.u32 %v3810_v15, %v3809_v41  ;;  %v3813_v5 = vrot.slane %v3809_v41, 4  ;;  %v3820_v44 = vor.u32 %v3818_v29, %v3817_v38  ;;  %v3822_v54 = vrot.slane %v3817_v38, 4  ;;  %v4057_v29 = vld [vmem:[#allocation4 + $0x8] sm:$0x1]  ;;  %v4075_v38 = vld [vmem:[#allocation4] sm:$0xe] }
 0x2f0   : > { %v4404_v24 = vsel %vm1481_vm12, %v4399_v26, %v4403_v62  ;;  %v6533_v10 = vcombine.low %v4673_v22, %v4676_v48  ;;  %v4413_v4 = vshll.u32 %v6498_v37, 16  ;;  %v4406_v19 = vshrl.u32 %v9000_v25, 16 }
 0x2f1   : > { %v3997_v60 = vsel %vm7206_vm6, %v3812_v58, %v3996_v49  ;;  %v3821_v8 = vsel %vm7240_vm10, %v3813_v5, %v3820_v44  ;;  %v4001_v52 = vsel %vm7165_vm2, %v3822_v54, %v4000_v59  ;;  %4479 = vrot.lane.b32.xlu0 %v4404_v24, %s7095_s0  ;;  %v4410_v0 = vrot.slane %v4408_v9, 1  ;;  %v9040_v58 = vld [vmem:[#allocation4 + $0xc4] sm:$0xf]  ;;  %v4073_v9 = vld [vmem:[#allocation4 + $0xc8] sm:$0x1] }
 0x2f2   : > { %3998 = vst [vmem:[#allocation4 + $0xcc] sm:$0xf] %v3997_v60  ;;  %3999 = vst.msk [vmem:[#allocation4 + $0xd0] sm:$0xf] %vm966_vm4, %v3821_v8  ;;  %v4681_v36 = vrot.slane %v4679_v23, 4  ;;  %v4682_v46 = vrot.slane %v4071_v31, 5  ;;  %v4680_v34 = vsel %vm7271_vm13, %v6516_v6, %v4679_v23  ;;  %v9020_v50 = vcombine.low %v4051_v40, %v4052_v63 }
 0x2f3   : > { %4002 = vst [vmem:[#allocation4 + $0xd4] sm:$0x1] %v4001_v52  ;;  %4790 = vst.msk [vmem:[#allocation5 + $0xd8] sm:$0xff] %vm1762_vm11, %v6533_v10  ;;  %v4415_v51 = vrot.slane %v4413_v4, 1  ;;  %v6499_v43 = vcombine.low %v4072_v57, %v4072_v57  ;;  %v4411_v15 = vor.u32 %v4410_v0, %v4406_v19  ;;  %v6517_v22 = vrot.slane %v4090_v55, 9  ;;  %v9043_v5 = vld [vmem:[#allocation5 + $0x28] sm:$0xff] }
 0x2f4   : > { %4017 = vst.msk [vmem:[#allocation4 + $0xd0] sm:$0xf] %vm966_vm4, %v9740_v2  ;;  %v4683_v35 = vsel %vm7271_vm13, %v4681_v36, %v4682_v46  ;;  %v4686_v31 = vrot.slane %v4052_v63, 5  ;;  %v4420_v7 = vshll.u32 %v9020_v50, 16  ;;  %v4689_v41 = vrot.slane %v4072_v57, 5  ;;  %v7044_v6 = vld [vmem:[%s9724_s5 + $0x8] sm:$0xff]  }
 0x2f5   : > { %v6534_v21 = vcombine.low %v4680_v34, %v4683_v35  ;;  %v4425_v30 = vshll.u32 %v6499_v43, 16  ;;  %v4416_v39 = vsel %vm1481_vm12, %v4411_v15, %v4415_v51  ;;  %v4418_v37 = vshrl.u32 %v9020_v50, 16  ;;  %v4053_v10 = vld [vmem:[#allocation4 + $0xc0] sm:$0xf] }
 0x2f6   : > { %v4688_v49 = vrot.slane %v4686_v31, 4  ;;  %v9032_v59 = vsel %vm1762_vm11, %v8497_v13, %v4456_v32  ;;  %4481 = vrot.lane.b32.xlu1 %v4416_v39, %s7095_s0  ;;  %v4422_v26 = vrot.slane %v4420_v7, 1  ;;  %v4687_v62 = vsel %vm7271_vm13, %v6517_v22, %v4686_v31  ;;  %v4091_v46 = vld [vmem:[#allocation4 + $0xc0] sm:$0xe] }
 0x2f7   : > { %4791 = vst.msk [vmem:[#allocation5 + $0xe8] sm:$0xff] %vm1762_vm11, %v6534_v21  ;;  %v9038_v48 = vcombine.low %v4021_v61, %v4022_v47  ;;  %v6484_v23 = vcombine.low %v4057_v29, %v4057_v29  ;;  %5031 = vmatmul.mubr.bf16.vlgmr.msra.gmra.mrb[72].mxu1 %v9032_v59  ;;  %v4427_v44 = vrot.slane %v4425_v30, 1  ;;  %v6502_v54 = vrot.slane %v4075_v38, 9  ;;  %v7045_v38 = vld [vmem:[%s9724_s5 + $0x10] sm:$0xff]  }
 0x2f8   : > { %v4690_v13 = vsel %vm7271_vm13, %v4688_v49, %v4689_v41  ;;  %v4581_v24 = vrot.slane %v4022_v47, 5  ;;  %5235 = vmatpush1.bf16.msra.mxu1 %v7039_v45  ;;  %6575 = vmatprep.mubr.msk.bf16.mxu1 %vm1762_vm11, %v9043_v5  ;;  %v4423_v60 = vor.u32 %v4422_v26, %v4418_v37  ;;  %v4584_v4 = vrot.slane %v4057_v29, 5  ;;  %v4458_v47 = vpop.permute.xlu1 %4457 }
 0x2f9   : > { %v4014_v63 = vld [vmem:[#allocation4 + $0xcc] sm:$0xf]  ;;  %v6535_v8 = vcombine.low %v4687_v62, %v4690_v13  ;;  %v4240_v52 = vshll.u32 %v9038_v48, 16  ;;  %5236 = vmatprep.subr.bf16.mxu1 %v9740_v2  ;;  %v4238_v0 = vshrl.u32 %v9038_v48, 16  ;;  %v4245_v36 = vshll.u32 %v6484_v23, 16  ;;  %v9088_v23 = vld [vmem:[#allocation5 + $0x38] sm:$0xff] }
 0x2fa   : > { %v4018_v57 = vld [vmem:[#allocation4 + $0xd4] sm:$0x1]  ;;  %v4015_v55 = vsel %vm7206_vm6, 0, %v4014_v63  ;;  %v4428_v40 = vsel %vm1481_vm12, %v4423_v60, %v4427_v44  ;;  %v4583_v34 = vrot.slane %v4581_v24, 4  ;;  %v9062_v43 = vcombine.low %v4053_v10, %v9040_v58  ;;  %v4460_v29 = vpop.permute.xlu0 %4459 }
 0x2fb   : > { %v4019_v19 = vsel %vm7165_vm2, 0, %v4018_v57  ;;  %4016 = vst [vmem:[#allocation4 + $0xcc] sm:$0xf] %v4015_v55  ;;  %4792 = vst.msk [vmem:[#allocation5 + $0xf8] sm:$0xff] %vm1762_vm11, %v6535_v8  ;;  %v4242_v51 = vrot.slane %v4240_v52, 1  ;;  %4483 = vrot.lane.b32.xlu0 %v4428_v40, %s7095_s0  ;;  %v4247_v17 = vrot.slane %v4245_v36, 1  ;;  %v4582_v1 = vsel %vm7271_vm13, %v6502_v54, %v4581_v24 }
 0x2fc   : > { %4020 = vst [vmem:[#allocation4 + $0xd4] sm:$0x1] %v4019_v19  ;;  %v6500_v32 = vcombine.low %v4073_v9, %v4073_v9  ;;  %v4693_v61 = vrot.slane %v9040_v58, 5  ;;  %5237 = vmatpush1.bf16.msra.mxu1 %v7044_v6  ;;  %v4585_v35 = vsel %vm7271_vm13, %v4583_v34, %v4584_v4  ;;  %v4432_v22 = vshll.u32 %v9062_v43, 16  ;;  %v4056_v45 = vld [vmem:[#allocation4 + $0xd0] sm:$0xf] }
 0x2fd   : > { %v4243_v15 = vor.u32 %v4242_v51, %v4238_v0  ;;  %v6518_v31 = vrot.slane %v4091_v46, 9  ;;  %5238 = vmatprep.subr.bf16.mxu1 %v9740_v2  ;;  %v6520_v21 = vcombine.low %v4582_v1, %v4585_v35  ;;  %v4430_v7 = vshrl.u32 %v9062_v43, 16  ;;  %v7047_v51 = vld [vmem:[%s9724_s5 + $0x20] sm:$0xff]  }
 0x2fe   : > { %v4437_v30 = vshll.u32 %v6500_v32, 16  ;;  %v4695_v41 = vrot.slane %v4693_v61, 4  ;;  %v4434_v37 = vrot.slane %v4432_v22, 1  ;;  %v4696_v49 = vrot.slane %v4073_v9, 5 }
 0x2ff   : > { %v4248_v39 = vsel %vm1481_vm12, %v4243_v15, %v4247_v17  ;;  %v9079_v26 = vsel %vm1762_vm11, %v8566_v20, %v4458_v47  ;;  %4777 = vst.msk [vmem:[#allocation5 + $0x8] sm:$0xff] %vm1762_vm11, %v6520_v21  ;;  %v9085_v62 = vsel %vm1762_vm11, %v8615_v53, %v4460_v29  ;;  %v4700_v58 = vrot.slane %v4056_v45, 5  ;;  %v7046_v53 = vld [vmem:[%s9724_s5 + $0x18] sm:$0xff]   ;;  %v7049_v15 = vld [vmem:[%s9724_s5 + $0x30] sm:$0xff]  }
 0x300   : > { %4453 = vrot.lane.b32.xlu0 %v4248_v39, %s7095_s0  ;;  %5039 = vmatmul.mubr.bf16.gmra.mrb[76].mxu1 %v9079_v26  ;;  %v4435_v44 = vor.u32 %v4434_v37, %v4430_v7  ;;  %v4439_v13 = vrot.slane %v4437_v30, 1  ;;  %v4694_v54 = vsel %vm7271_vm13, %v6518_v31, %v4693_v61  ;;  %v4697_v20 = vsel %vm7271_vm13, %v4695_v41, %v4696_v49  ;;  %v9146_v31 = vld [vmem:[#allocation5 + $0x58] sm:$0xff]  ;;  %v7050_v29 = vld [vmem:[%s9724_s5 + $0x38] sm:$0xff]   ;;  %v9166_v7 = vld [vmem:[#allocation5 + $0x68] sm:$0xff] }
 0x301   : > { %5605 = vmatmul.mubr.bf16.vlgmr.msra.gmra.mrb[144].mxu0 %v9079_v26  ;;  %6576 = vmatprep.mubr.msk.bf16.mxu1 %vm1762_vm11, %v9088_v23  ;;  %v6536_v24 = vcombine.low %v4694_v54, %v4697_v20  ;;  %v4702_v52 = vrot.slane %v4700_v58, 4  ;;  %v7052_v30 = vld [vmem:[%s9724_s5 + $0x48] sm:$0xff]   ;;  %v9182_v41 = vld [vmem:[#allocation5 + $0x78] sm:$0xff]  ;;  %v9199_v49 = vld [vmem:[#allocation5 + $0x88] sm:$0xff] }
 0x302   : > { %6655 = vmatprep.mubr.msk.bf16.mxu0 %vm1762_vm11, %v9088_v23  ;;  %v4055_v10 = vld [vmem:[#allocation4 + $0xcc] sm:$0xf]  ;;  %5239 = vmatpush1.bf16.msra.mxu1 %v7045_v38  ;;  %v4440_v63 = vsel %vm1481_vm12, %v4435_v44, %v4439_v13  ;;  %v9211_v44 = vld [vmem:[#allocation5 + $0x98] sm:$0xff] }
 0x303   : > { %v4074_v9 = vld [vmem:[#allocation4 + $0xd4] sm:$0x1]  ;;  %v4092_v6 = vld [vmem:[#allocation4 + $0xcc] sm:$0xe]  ;;  %v9103_v57 = vcombine.low %v4055_v10, %v4056_v45  ;;  %5240 = vmatprep.subr.bf16.mxu1 %v9740_v2  ;;  %4793 = vst.msk [vmem:[#allocation5 + $0x108] sm:$0xff] %vm1762_vm11, %v6536_v24  ;;  %4485 = vrot.lane.b32.xlu1 %v4440_v63, %s7095_s0 }
 0x304   : > { %v6501_v60 = vcombine.low %v4074_v9, %v4074_v9  ;;  %v6519_v8 = vrot.slane %v4092_v6, 9  ;;  %v4703_v4 = vrot.slane %v4074_v9, 5  ;;  %v7054_v38 = vld [vmem:[%s9724_s5 + $0x58] sm:$0xff]  }
 0x305   : > { %v4444_v55 = vshll.u32 %v9103_v57, 16  ;;  %v4462_v0 = vpop.permute.xlu1 %4461  ;;  %v4442_v34 = vshrl.u32 %v9103_v57, 16 }
 0x306   : > { %v4449_v19 = vshll.u32 %v6501_v60, 16  ;;  %v4701_v36 = vsel %vm7271_vm13, %v6519_v8, %v4700_v58  ;;  %v4704_v46 = vsel %vm7271_vm13, %v4702_v52, %v4703_v4  ;;  %v9115_v40 = vsel %vm1762_vm11, %v8666_v28, %v4462_v0  ;;  %5241 = vmatpush1.bf16.msra.mxu1 %v7046_v53  ;;  %v7048_v28 = vld [vmem:[%s9724_s5 + $0x28] sm:$0xff]  }
 0x307   : > { %v4446_v17 = vrot.slane %v4444_v55, 1  ;;  %v6537_v32 = vcombine.low %v4701_v36, %v4704_v46  ;;  %5242 = vmatprep.subr.bf16.mxu1 %v9740_v2 }
 0x308   : > { %v4451_v1 = vrot.slane %v4449_v19, 1  ;;  %5047 = vmatmul.mubr.bf16.gmra.mrb[80].mxu1 %v9085_v62 }
 0x309   : > { %v4447_v61 = vor.u32 %v4446_v17, %v4442_v34  ;;  %4794 = vst.msk [vmem:[#allocation5 + $0x118] sm:$0xff] %vm1762_vm11, %v6537_v32  ;;  %5613 = vmatmul.mubr.bf16.gmra.mrb[148].mxu0 %v9085_v62  ;;  %6577 = vmatprep.mubr.msk.bf16.mxu1 %vm1762_vm11, %v9123_v18  ;;  %v7057_v34 = vld [vmem:[%s9724_s5 + $0xc0] sm:$0xff]   ;;  %v7067_v32 = vld [vmem:[%s9724_s5 + $0x108] sm:$0xff]  }
 0x30a   : > { %6656 = vmatprep.mubr.msk.bf16.mxu0 %vm1762_vm11, %v9123_v18  ;;  %5243 = vmatpush1.bf16.msra.mxu1 %v7047_v51  ;;  %v4852_v0 = vld [vmem:[#allocation5 + $0x108] sm:$0xff]  ;;  %v7058_v17 = vld [vmem:[#allocation5 + $0x18] sm:$0xff] }
 0x30b   : > { %v4452_v47 = vsel %vm1481_vm12, %v4447_v61, %v4451_v1  ;;  %5244 = vmatprep.subr.bf16.mxu1 %v9740_v2  ;;  %v7061_v1 = vld [vmem:[%s9724_s5 + $0xd8] sm:$0xff]  }
 0x30c   : > { %4487 = vrot.lane.b32.xlu1 %v4452_v47, %s7095_s0  ;;  %s9541_s0 = scalar_lea.vmem %s9727_s8, %s6706_s30 }
 0x30e   : > { %5245 = vmatpush1.bf16.msra.mxu1 %v7048_v28 }
 0x30f   : > { %v4464_v35 = vpop.permute.xlu0 %4463  ;;  %5246 = vmatprep.subr.bf16.mxu1 %v9740_v2 }
 0x310   : > { %v9143_v22 = vsel %vm1762_vm11, %v8703_v11, %v4464_v35  ;;  %5055 = vmatmul.mubr.bf16.gmra.mrb[84].mxu1 %v9115_v40  ;;  %v7051_v11 = vld [vmem:[%s9724_s5 + $0x40] sm:$0xff]  }
 0x311   : > { %5621 = vmatmul.mubr.bf16.gmra.mrb[152].mxu0 %v9115_v40  ;;  %6578 = vmatprep.mubr.msk.bf16.mxu1 %vm1762_vm11, %v9146_v31 }
 0x312   : > { %6657 = vmatprep.mubr.msk.bf16.mxu0 %vm1762_vm11, %v9146_v31  ;;  %5247 = vmatpush1.bf16.msra.mxu1 %v7049_v15 }
 0x313   : > { %5248 = vmatprep.subr.bf16.mxu1 %v9740_v2 }
 0x316   : > { %5249 = vmatpush1.bf16.msra.mxu1 %v7050_v29 }
 0x317   : > { %v4466_v45 = vpop.permute.xlu1 %4465  ;;  %5250 = vmatprep.subr.bf16.mxu1 %v9740_v2 }
 0x318   : > { %v9163_v21 = vsel %vm1762_vm11, %v8741_v14, %v4466_v45  ;;  %5063 = vmatmul.mubr.bf16.gmra.mrb[88].mxu1 %v9143_v22  ;;  %v7053_v14 = vld [vmem:[%s9724_s5 + $0x50] sm:$0xff]  }
 0x319   : > { %5629 = vmatmul.mubr.bf16.gmra.mrb[156].mxu0 %v9143_v22  ;;  %6579 = vmatprep.mubr.msk.bf16.mxu1 %vm1762_vm11, %v9166_v7 }
 0x31a   : > { %6658 = vmatprep.mubr.msk.bf16.mxu0 %vm1762_vm11, %v9166_v7  ;;  %5251 = vmatpush1.bf16.msra.mxu1 %v7051_v11 }
 0x31b   : > { %5252 = vmatprep.subr.bf16.mxu1 %v9740_v2 }
 0x31e   : > { %5253 = vmatpush1.bf16.msra.mxu1 %v7052_v30 }
 0x31f   : > { %5254 = vmatprep.subr.bf16.mxu1 %v9740_v2 }
 0x320   : > { %5071 = vmatmul.mubr.bf16.gmra.mrb[92].mxu1 %v9163_v21 }
 0x321   : > { %5637 = vmatmul.mubr.bf16.gmra.mrb[160].mxu0 %v9163_v21  ;;  %6580 = vmatprep.mubr.msk.bf16.mxu1 %vm1762_vm11, %v9182_v41 }
 0x322   : > { %6659 = vmatprep.mubr.msk.bf16.mxu0 %vm1762_vm11, %v9182_v41  ;;  %5255 = vmatpush1.bf16.msra.mxu1 %v7053_v14 }
 0x323   : > { %v4468_v39 = vpop.permute.xlu0 %4467  ;;  %5256 = vmatprep.subr.bf16.mxu1 %v9740_v2 }
 0x324   : > { %v9195_v37 = vsel %vm1762_vm11, %v8781_v3, %v4468_v39 }
 0x326   : > { %5257 = vmatpush1.bf16.msra.mxu1 %v7054_v38 }
 0x327   : > { %6857 = vmatprep.subr.bf16.mxu1 %v9740_v2 }
 0x328   : > { %5079 = vmatmul.mubr.bf16.gmra.mrb[96].mxu1 %v9195_v37 }
 0x329   : > { %5645 = vmatmul.mubr.bf16.gmra.mrb[164].mxu0 %v9195_v37  ;;  %6581 = vmatprep.mubr.msk.bf16.mxu1 %vm1762_vm11, %v9199_v49 }
 0x32a   : > { %6660 = vmatprep.mubr.msk.bf16.mxu0 %vm1762_vm11, %v9199_v49 }
 0x32d   : > { %v4470_v58 = vpop.permute.xlu1 %4469 }
 0x32e   : > { %v9208_v3 = vsel %vm1762_vm11, %v8813_v56, %v4470_v58  ;;  %v9224_v56 = vld [vmem:[#allocation5 + $0xa8] sm:$0xff] }
 0x330   : > { %5087 = vmatmul.mubr.bf16.gmra.mrb[100].mxu1 %v9208_v3 }
 0x331   : > { %5653 = vmatmul.mubr.bf16.gmra.mrb[168].mxu0 %v9208_v3  ;;  %6582 = vmatprep.mubr.msk.bf16.mxu1 %vm1762_vm11, %v9211_v44 }
 0x332   : > { %6661 = vmatprep.mubr.msk.bf16.mxu0 %vm1762_vm11, %v9211_v44 }
 0x337   : > { %v4472_v13 = vpop.permute.xlu0 %4471 }
 0x338   : > { %v9220_v54 = vsel %vm1762_vm11, %v8861_v33, %v4472_v13  ;;  %v9236_v33 = vld [vmem:[#allocation5 + $0xb8] sm:$0xff] }
 0x339   : > { %5095 = vmatmul.mubr.bf16.gmra.mrb[104].mxu1 %v9220_v54  ;;  %5661 = vmatmul.mubr.bf16.gmra.mrb[172].mxu0 %v9220_v54 }
 0x33a   : > { %6583 = vmatprep.mubr.msk.bf16.mxu1 %vm1762_vm11, %v9224_v56  ;;  %6662 = vmatprep.mubr.msk.bf16.mxu0 %vm1762_vm11, %v9224_v56 }
 0x341   : > { %v4474_v20 = vpop.permute.xlu1 %4473 }
 0x342   : > { %v9232_v53 = vsel %vm1762_vm11, %v8894_v42, %v4474_v20  ;;  %v9248_v42 = vld [vmem:[#allocation5 + $0xc8] sm:$0xff] }
 0x343   : > { %5103 = vmatmul.mubr.bf16.gmra.mrb[108].mxu1 %v9232_v53  ;;  %5669 = vmatmul.mubr.bf16.gmra.mrb[176].mxu0 %v9232_v53 }
 0x344   : > { %6584 = vmatprep.mubr.msk.bf16.mxu1 %vm1762_vm11, %v9236_v33  ;;  %6663 = vmatprep.mubr.msk.bf16.mxu0 %vm1762_vm11, %v9236_v33 }
 0x34b   : > { %v4476_v24 = vpop.permute.xlu0 %4475 }
 0x34c   : > { %v9244_v10 = vsel %vm1762_vm11, %v8921_v16, %v4476_v24  ;;  %v9260_v16 = vld [vmem:[#allocation5 + $0xd8] sm:$0xff] }
 0x34d   : > { %5111 = vmatmul.mubr.bf16.gmra.mrb[112].mxu1 %v9244_v10  ;;  %5677 = vmatmul.mubr.bf16.gmra.mrb[180].mxu0 %v9244_v10 }
 0x34e   : > { %6585 = vmatprep.mubr.msk.bf16.mxu1 %vm1762_vm11, %v9248_v42  ;;  %6664 = vmatprep.mubr.msk.bf16.mxu0 %vm1762_vm11, %v9248_v42 }
 0x357   : > { %v4478_v9 = vpop.permute.xlu1 %4477 }
 0x358   : > { %v9256_v6 = vsel %vm1762_vm11, %v8954_v12, %v4478_v9  ;;  %v9272_v12 = vld [vmem:[#allocation5 + $0xe8] sm:$0xff] }
 0x359   : > { %5119 = vmatmul.mubr.bf16.gmra.mrb[116].mxu1 %v9256_v6  ;;  %5685 = vmatmul.mubr.bf16.gmra.mrb[184].mxu0 %v9256_v6 }
 0x35a   : > { %6586 = vmatprep.mubr.msk.bf16.mxu1 %vm1762_vm11, %v9260_v16  ;;  %6665 = vmatprep.mubr.msk.bf16.mxu0 %vm1762_vm11, %v9260_v16 }
 0x363   : > { %v4480_v63 = vpop.permute.xlu0 %4479 }
 0x364   : > { %v9268_v60 = vsel %vm1762_vm11, %v8989_v27, %v4480_v63  ;;  %v9284_v27 = vld [vmem:[#allocation5 + $0xf8] sm:$0xff] }
 0x365   : > { %5127 = vmatmul.mubr.bf16.gmra.mrb[120].mxu1 %v9268_v60  ;;  %5693 = vmatmul.mubr.bf16.gmra.mrb[188].mxu0 %v9268_v60 }
 0x366   : > { %6587 = vmatprep.mubr.msk.bf16.mxu1 %vm1762_vm11, %v9272_v12  ;;  %6666 = vmatprep.mubr.msk.bf16.mxu0 %vm1762_vm11, %v9272_v12 }
 0x368   : > { %v4482_v8 = vpop.permute.xlu1 %4481 }
 0x369   : > { %v9280_v52 = vsel %vm1762_vm11, %v9000_v25, %v4482_v8 }
 0x36d   : > { %5135 = vmatmul.mubr.bf16.gmra.mrb[124].mxu1 %v9280_v52  ;;  %5701 = vmatmul.mubr.bf16.gmra.mrb[192].mxu0 %v9280_v52  ;;  %v4484_v4 = vpop.permute.xlu0 %4483 }
 0x36e   : > { %6588 = vmatprep.mubr.msk.bf16.mxu1 %vm1762_vm11, %v9284_v27  ;;  %6667 = vmatprep.mubr.msk.bf16.mxu0 %vm1762_vm11, %v9284_v27  ;;  %v9292_v55 = vsel %vm1762_vm11, %v9020_v50, %v4484_v4  ;;  %v4796_v50 = vld [vmem:[#allocation5 + $0x8] sm:$0xff] }
 0x372   : > { %v4454_v19 = vpop.permute.xlu0 %4453 }
 0x373   : > { %v4490_v25 = vsel %vm1762_vm11, %v9038_v48, %v4454_v19 }
 0x375   : > { %5143 = vmatmul.mubr.bf16.gmra.mrb[128].mxu1 %v9292_v55  ;;  %5709 = vmatmul.mubr.bf16.gmra.mrb[196].mxu0 %v9292_v55  ;;  %v4486_v36 = vpop.permute.xlu1 %4485 }
 0x376   : > { %6589 = vmatprep.mubr.msk.bf16.mxu1 %vm1762_vm11, %v4852_v0  ;;  %6668 = vmatprep.mubr.msk.bf16.mxu0 %vm1762_vm11, %v4852_v0  ;;  %v4538_v46 = vsel %vm1762_vm11, %v9062_v43, %v4486_v36  ;;  %v7059_v43 = vld [vmem:[%s9724_s5 + $0xc8] sm:$0xff]  }
 0x37d   : > { %5151 = vmatmul.mubr.bf16.gmra.mrb[132].mxu1 %v4538_v46  ;;  %5717 = vmatmul.mubr.bf16.gmra.mrb[200].mxu0 %v4538_v46 }
 0x37e   : > { %6602 = vmatprep.mubr.msk.bf16.mxu1 %vm1762_vm11, %v4796_v50  ;;  %v4488_v51 = vpop.permute.xlu1 %4487 }
 0x37f   : > { %v9305_v48 = vsel %vm1762_vm11, %v9103_v57, %v4488_v51  ;;  %v7060_v57 = vld [vmem:[%s9724_s5 + $0xd0] sm:$0xff]  }
 0x385   : > { %5267 = vmatmul.mubr.bf16.vlgmr.msra.gmra.mrb[136].mxu1 %v4490_v25 }
 0x386   : > { %6869 = vmatpush1.bf16.msra.mxu1 %v7057_v34  ;;  %6603 = vmatprep.mubr.msk.bf16.mxu1 %vm1762_vm11, %v7058_v17  ;;  %v5426_v34 = vld [vmem:[#allocation5 + $0x118] sm:$0xff] }
 0x387   : > { %6858 = vmatprep.subr.bf16.mxu1 %v9740_v2 }
 0x38a   : > { %6870 = vmatpush1.bf16.msra.mxu1 %v7059_v43 }
 0x38b   : > { %6859 = vmatprep.subr.bf16.mxu1 %v9740_v2 }
 0x38d   : > { %5275 = vmatmul.mubr.bf16.gmra.mrb[140].mxu1 %v9032_v59  ;;  %v7062_v59 = vld [vmem:[%s9724_s5 + $0xe0] sm:$0xff]  }
 0x38e   : > { %6604 = vmatprep.mubr.msk.bf16.mxu1 %vm1762_vm11, %v9043_v5  ;;  %6871 = vmatpush1.bf16.msra.mxu1 %v7060_v57  ;;  %v7063_v5 = vld [vmem:[%s9724_s5 + $0xe8] sm:$0xff]  }
 0x38f   : > { %6860 = vmatprep.subr.bf16.mxu1 %v9740_v2 }
 0x392   : > { %6872 = vmatpush1.bf16.msra.mxu1 %v7061_v1 }
 0x393   : > { %6861 = vmatprep.subr.bf16.mxu1 %v9740_v2 }
 0x395   : > { %5283 = vmatmul.mubr.bf16.gmra.mrb[144].mxu1 %v9079_v26  ;;  %v7064_v26 = vld [vmem:[%s9724_s5 + $0xf0] sm:$0xff]  }
 0x396   : > { %6605 = vmatprep.mubr.msk.bf16.mxu1 %vm1762_vm11, %v9088_v23  ;;  %6873 = vmatpush1.bf16.msra.mxu1 %v7062_v59  ;;  %v7065_v23 = vld [vmem:[%s9724_s5 + $0xf8] sm:$0xff]  }
 0x397   : > { %6862 = vmatprep.subr.bf16.mxu1 %v9740_v2 }
 0x39a   : > { %6874 = vmatpush1.bf16.msra.mxu1 %v7063_v5 }
 0x39b   : > { %6863 = vmatprep.subr.bf16.mxu1 %v9740_v2 }
 0x39d   : > { %5291 = vmatmul.mubr.bf16.gmra.mrb[148].mxu1 %v9085_v62  ;;  %v7066_v62 = vld [vmem:[%s9724_s5 + $0x100] sm:$0xff]  }
 0x39e   : > { %6606 = vmatprep.mubr.msk.bf16.mxu1 %vm1762_vm11, %v9123_v18  ;;  %6875 = vmatpush1.bf16.msra.mxu1 %v7064_v26  ;;  %v7069_v18 = vld [vmem:[%s9724_s5 + $0x118] sm:$0xff]  }
 0x39f   : > { %6864 = vmatprep.subr.bf16.mxu1 %v9740_v2 }
 0x3a2   : > { %6876 = vmatpush1.bf16.msra.mxu1 %v7065_v23 }
 0x3a3   : > { %6865 = vmatprep.subr.bf16.mxu1 %v9740_v2 }
 0x3a5   : > { %5299 = vmatmul.mubr.bf16.gmra.mrb[152].mxu1 %v9115_v40  ;;  %v7068_v40 = vld [vmem:[%s9724_s5 + $0x110] sm:$0xff]  }
 0x3a6   : > { %6607 = vmatprep.mubr.msk.bf16.mxu1 %vm1762_vm11, %v9146_v31  ;;  %6877 = vmatpush1.bf16.msra.mxu1 %v7066_v62 }
 0x3a7   : > { %6866 = vmatprep.subr.bf16.mxu1 %v9740_v2 }
 0x3aa   : > { %6878 = vmatpush1.bf16.msra.mxu1 %v7067_v32 }
 0x3ab   : > { %6867 = vmatprep.subr.bf16.mxu1 %v9740_v2 }
 0x3ad   : > { %5307 = vmatmul.mubr.bf16.gmra.mrb[156].mxu1 %v9143_v22 }
 0x3ae   : > { %6608 = vmatprep.mubr.msk.bf16.mxu1 %vm1762_vm11, %v9166_v7  ;;  %6879 = vmatpush1.bf16.msra.mxu1 %v7068_v40 }
 0x3af   : > { %6868 = vmatprep.subr.bf16.mxu1 %v9740_v2 }
 0x3b2   : > { %6880 = vmatpush1.bf16.msra.mxu1 %v7069_v18 }
 0x3b5   : > { %5315 = vmatmul.mubr.bf16.gmra.mrb[160].mxu1 %v9163_v21 }
 0x3b6   : > { %6609 = vmatprep.mubr.msk.bf16.mxu1 %vm1762_vm11, %v9182_v41 }
 0x3bd   : > { %5323 = vmatmul.mubr.bf16.gmra.mrb[164].mxu1 %v9195_v37 }
 0x3be   : > { %6610 = vmatprep.mubr.msk.bf16.mxu1 %vm1762_vm11, %v9199_v49 }
 0x3c5   : > { %5331 = vmatmul.mubr.bf16.gmra.mrb[168].mxu1 %v9208_v3 }
 0x3c6   : > { %6611 = vmatprep.mubr.msk.bf16.mxu1 %vm1762_vm11, %v9211_v44 }
 0x3ca   : > { %v9379_v2 = vpop.f32.mrb[72].mxu1 }
 0x3cb   : > { %v5034_v61 = vpop.f32.mrb[73].mxu1 }
 0x3cc   : > { %v9381_v28 = vpop.f32.mrb[74].mxu1 }
 0x3cd   : > { %5339 = vmatmul.mubr.bf16.gmra.mrb[172].mxu1 %v9220_v54  ;;  %v5037_v47 = vpop.f32.mrb[75].mxu1 }
 0x3ce   : > { %6612 = vmatprep.mubr.msk.bf16.mxu1 %vm1762_vm11, %v9224_v56 }
 0x3d3   : > { %v9386_v15 = vpop.f32.mrb[76].mxu1 }
 0x3d4   : > { %v9388_v35 = vpop.f32.mrb[144].mxu0  ;;  %v5042_v22 = vpop.f32.mrb[77].mxu1 }
 0x3d5   : > { %5347 = vmatmul.mubr.bf16.gmra.mrb[176].mxu1 %v9232_v53  ;;  %v5608_v31 = vpop.f32.mrb[145].mxu0  ;;  %v9391_v29 = vpop.f32.mrb[78].mxu1 }
 0x3d6   : > { %6613 = vmatprep.mubr.msk.bf16.mxu1 %vm1762_vm11, %v9236_v33  ;;  %v9395_v11 = vpop.f32.mrb[146].mxu0  ;;  %v5045_v45 = vpop.f32.mrb[79].mxu1 }
 0x3d7   : > { %v5611_v21 = vpop.f32.mrb[147].mxu0 }
 0x3db   : > { %v9397_v7 = vpop.f32.mrb[80].mxu1 }
 0x3dc   : > { %v9399_v30 = vpop.f32.mrb[148].mxu0  ;;  %v5050_v14 = vpop.f32.mrb[81].mxu1 }
 0x3dd   : > { %5355 = vmatmul.mubr.bf16.gmra.mrb[180].mxu1 %v9244_v10  ;;  %v5616_v41 = vpop.f32.mrb[149].mxu0  ;;  %v9402_v38 = vpop.f32.mrb[82].mxu1 }
 0x3de   : > { %6614 = vmatprep.mubr.msk.bf16.mxu1 %vm1762_vm11, %v9248_v42  ;;  %v9406_v39 = vpop.f32.mrb[150].mxu0  ;;  %v5053_v37 = vpop.f32.mrb[83].mxu1 }
 0x3df   : > { %v5619_v49 = vpop.f32.mrb[151].mxu0 }
 0x3e3   : > { %v9408_v58 = vpop.f32.mrb[84].mxu1 }
 0x3e4   : > { %v9410_v3 = vpop.f32.mrb[152].mxu0  ;;  %v5058_v44 = vpop.f32.mrb[85].mxu1 }
 0x3e5   : > { %5363 = vmatmul.mubr.bf16.gmra.mrb[184].mxu1 %v9256_v6  ;;  %v5624_v13 = vpop.f32.mrb[153].mxu0  ;;  %v9413_v54 = vpop.f32.mrb[86].mxu1 }
 0x3e6   : > { %6615 = vmatprep.mubr.msk.bf16.mxu1 %vm1762_vm11, %v9260_v16  ;;  %v9417_v56 = vpop.f32.mrb[154].mxu0  ;;  %v5061_v20 = vpop.f32.mrb[87].mxu1 }
 0x3e7   : > { %v5627_v53 = vpop.f32.mrb[155].mxu0 }
 0x3eb   : > { %v9419_v33 = vpop.f32.mrb[88].mxu1 }
 0x3ec   : > { %v9421_v24 = vpop.f32.mrb[156].mxu0  ;;  %v5066_v10 = vpop.f32.mrb[89].mxu1 }
 0x3ed   : > { %5371 = vmatmul.mubr.bf16.gmra.mrb[188].mxu1 %v9268_v60  ;;  %v5632_v42 = vpop.f32.mrb[157].mxu0  ;;  %v9424_v9 = vpop.f32.mrb[90].mxu1 }
 0x3ee   : > { %6616 = vmatprep.mubr.msk.bf16.mxu1 %vm1762_vm11, %v9272_v12  ;;  %v9428_v6 = vpop.f32.mrb[158].mxu0  ;;  %v5069_v16 = vpop.f32.mrb[91].mxu1 }
 0x3ef   : > { %v5635_v63 = vpop.f32.mrb[159].mxu0 }
 0x3f3   : > { %v9430_v8 = vpop.f32.mrb[92].mxu1 }
 0x3f4   : > { %v9432_v4 = vpop.f32.mrb[160].mxu0  ;;  %v5074_v19 = vpop.f32.mrb[93].mxu1 }
 0x3f5   : > { %5379 = vmatmul.mubr.bf16.gmra.mrb[192].mxu1 %v9280_v52  ;;  %v5640_v25 = vpop.f32.mrb[161].mxu0  ;;  %v9435_v0 = vpop.f32.mrb[94].mxu1 }
 0x3f6   : > { %6617 = vmatprep.mubr.msk.bf16.mxu1 %vm1762_vm11, %v9284_v27  ;;  %v9439_v60 = vpop.f32.mrb[162].mxu0  ;;  %v5077_v12 = vpop.f32.mrb[95].mxu1 }
 0x3f7   : > { %v5643_v36 = vpop.f32.mrb[163].mxu0 }
 0x3fb   : > { %v9441_v46 = vpop.f32.mrb[96].mxu1 }
 0x3fc   : > { %v9443_v50 = vpop.f32.mrb[164].mxu0  ;;  %v5082_v51 = vpop.f32.mrb[97].mxu1 }
 0x3fd   : > { %5387 = vmatmul.mubr.bf16.gmra.mrb[196].mxu1 %v9292_v55  ;;  %v5648_v17 = vpop.f32.mrb[165].mxu0  ;;  %v9446_v52 = vpop.f32.mrb[98].mxu1 }
 0x3fe   : > { %6669 = vmatprep.mubr.msk.bf16.mxu1 %vm1762_vm11, %v5426_v34  ;;  %v9449_v43 = vpop.f32.mrb[166].mxu0  ;;  %v5085_v27 = vpop.f32.mrb[99].mxu1 }
 0x3ff   : > { %v5651_v57 = vpop.f32.mrb[167].mxu0 }
 0x403   : > { %v9451_v1 = vpop.f32.mrb[100].mxu1 }
 0x404   : > { %v9453_v59 = vpop.f32.mrb[168].mxu0  ;;  %v5090_v5 = vpop.f32.mrb[101].mxu1 }
 0x405   : > { %5725 = vmatmul.mubr.bf16.vlgmr.msra.gmra.mrb[200].mxu1 %v9305_v48  ;;  %v5656_v26 = vpop.f32.mrb[169].mxu0  ;;  %v9456_v23 = vpop.f32.mrb[102].mxu1 }
 0x406   : > { %v9458_v55 = vpop.f32.mrb[170].mxu0  ;;  %v5093_v62 = vpop.f32.mrb[103].mxu1 }
 0x407   : > { %v5659_v32 = vpop.f32.mrb[171].mxu0 }
 0x40c   : > { %v9460_v40 = vpop.f32.mrb[104].mxu1  ;;  %v9462_v18 = vpop.f32.mrb[172].mxu0 }
 0x40d   : > { %v5098_v61 = vpop.f32.mrb[105].mxu1  ;;  %v5664_v47 = vpop.f32.mrb[173].mxu0 }
 0x40e   : > { %v9464_v22 = vpop.f32.mrb[106].mxu1  ;;  %v9466_v31 = vpop.f32.mrb[174].mxu0 }
 0x40f   : > { %v5101_v45 = vpop.f32.mrb[107].mxu1  ;;  %v5667_v21 = vpop.f32.mrb[175].mxu0 }
 0x416   : > { %v9468_v48 = vpop.f32.mrb[108].mxu1  ;;  %v9470_v14 = vpop.f32.mrb[176].mxu0 }
 0x417   : > { %v5106_v41 = vpop.f32.mrb[109].mxu1  ;;  %v5672_v37 = vpop.f32.mrb[177].mxu0 }
 0x418   : > { %v9472_v49 = vpop.f32.mrb[110].mxu1  ;;  %v9474_v44 = vpop.f32.mrb[178].mxu0 }
 0x419   : > { %v5109_v13 = vpop.f32.mrb[111].mxu1  ;;  %v5675_v20 = vpop.f32.mrb[179].mxu0 }
 0x420   : > { %v9476_v53 = vpop.f32.mrb[112].mxu1  ;;  %v9478_v10 = vpop.f32.mrb[180].mxu0 }
 0x421   : > { %v5114_v42 = vpop.f32.mrb[113].mxu1  ;;  %v5680_v16 = vpop.f32.mrb[181].mxu0 }
 0x422   : > { %v9480_v63 = vpop.f32.mrb[114].mxu1  ;;  %v9482_v19 = vpop.f32.mrb[182].mxu0 }
 0x423   : > { %v5117_v25 = vpop.f32.mrb[115].mxu1  ;;  %v5683_v12 = vpop.f32.mrb[183].mxu0 }
 0x42c   : > { %v9484_v36 = vpop.f32.mrb[116].mxu1  ;;  %v9486_v51 = vpop.f32.mrb[184].mxu0 }
 0x42d   : > { %v5122_v34 = vpop.f32.mrb[117].mxu1  ;;  %v5688_v17 = vpop.f32.mrb[185].mxu0 }
 0x42e   : > { %v9488_v27 = vpop.f32.mrb[118].mxu1  ;;  %v9490_v57 = vpop.f32.mrb[186].mxu0 }
 0x42f   : > { %v5125_v5 = vpop.f32.mrb[119].mxu1  ;;  %v5691_v26 = vpop.f32.mrb[187].mxu0 }
 0x438   : > { %v9492_v62 = vpop.f32.mrb[120].mxu1  ;;  %v9494_v32 = vpop.f32.mrb[188].mxu0 }
 0x439   : > { %v5130_v61 = vpop.f32.mrb[121].mxu1  ;;  %v5696_v47 = vpop.f32.mrb[189].mxu0 }
 0x43a   : > { %v9496_v45 = vpop.f32.mrb[122].mxu1  ;;  %v9498_v21 = vpop.f32.mrb[190].mxu0 }
 0x43b   : > { %9741 = vst [vmem:[#allocation7_spill] sm:$0xff] %v9496_v45  ;;  %v5133_v41 = vpop.f32.mrb[123].mxu1  ;;  %v5699_v37 = vpop.f32.mrb[191].mxu0 }
 0x440   : > { %v9500_v13 = vpop.f32.mrb[124].mxu1  ;;  %v9502_v20 = vpop.f32.mrb[192].mxu0 }
 0x441   : > { %9742 = vst [vmem:[#allocation8_spill] sm:$0xff] %v9500_v13  ;;  %v5138_v42 = vpop.f32.mrb[125].mxu1  ;;  %v5704_v16 = vpop.f32.mrb[193].mxu0 }
 0x442   : > { %v9504_v25 = vpop.f32.mrb[126].mxu1  ;;  %v9506_v12 = vpop.f32.mrb[194].mxu0 }
 0x443   : > { %9743 = vst [vmem:[#allocation9_spill] sm:$0xff] %v9504_v25  ;;  %9744 = vst [vmem:[#allocation10_spill] sm:$0xff] %v9506_v12  ;;  %v5141_v34 = vpop.f32.mrb[127].mxu1  ;;  %v5707_v17 = vpop.f32.mrb[195].mxu0 }
 0x448   : > { %v9508_v5 = vpop.f32.mrb[128].mxu1  ;;  %v9510_v26 = vpop.f32.mrb[196].mxu0 }
 0x449   : > { %9745 = vst [vmem:[#allocation11_spill] sm:$0xff] %v9508_v5  ;;  %9746 = vst [vmem:[#allocation12_spill] sm:$0xff] %v9510_v26  ;;  %v5146_v61 = vpop.f32.mrb[129].mxu1  ;;  %v5712_v47 = vpop.f32.mrb[197].mxu0 }
 0x44a   : > { %v9512_v41 = vpop.f32.mrb[130].mxu1  ;;  %v9514_v37 = vpop.f32.mrb[198].mxu0  ;;  %v6779_v47 = vld [vmem:[%s7215_s13] sm:$0xff]  }
 0x44b   : > { %9747 = vst [vmem:[#allocation13_spill] sm:$0xff] %v9512_v41  ;;  %9748 = vst [vmem:[#allocation14_spill] sm:$0xff] %v9514_v37  ;;  %v5149_v13 = vpop.f32.mrb[131].mxu1  ;;  %v5715_v42 = vpop.f32.mrb[199].mxu0 }
 0x44c   : > { %v9529_v42 = vld [vmem:[%s9725_s6] ss:$0 sm:$0xff] }
 0x450   : > { %v9516_v16 = vpop.f32.mrb[132].mxu1  ;;  %v9518_v25 = vpop.f32.mrb[200].mxu0 }
 0x451   : > { %9749 = vst [vmem:[#allocation15_spill] sm:$0xff] %v9516_v16  ;;  %9750 = vst [vmem:[#allocation16_spill] sm:$0xff] %v9518_v25  ;;  %v5154_v12 = vpop.f32.mrb[133].mxu1  ;;  %v5720_v34 = vpop.f32.mrb[201].mxu0  ;;  %v6781_v25 = vunpack.c.h.bf16 %v6779_v47 }
 0x452   : > { %v9520_v17 = vpop.f32.mrb[134].mxu1  ;;  %v9522_v5 = vpop.f32.mrb[202].mxu0 }
 0x453   : > { %9751 = vst [vmem:[#allocation17_spill] sm:$0xff] %v9520_v17  ;;  %9752 = vst [vmem:[#allocation18_spill] sm:$0xff] %v9522_v5  ;;  %v5157_v26 = vpop.f32.mrb[135].mxu1  ;;  %v5723_v45 = vpop.f32.mrb[203].mxu0  ;;  %v6780_v17 = vunpack.c.l.bf16 %v6779_v47 }
 0x458   : > { %v5268_v61 = vpop.f32.mrb[136].mxu1 }
 0x459   : > { %v5269_v41 = vadd.f32 %v5268_v61, %v9379_v2  ;;  %v5270_v13 = vpop.f32.mrb[137].mxu1 }
 0x45a   : > { %v5271_v12 = vpop.f32.mrb[138].mxu1 }
 0x45b   : > { %v5733_v34 = vadd.f32 %v9388_v35, %v5269_v41  ;;  %v5272_v16 = vadd.f32 %v5271_v12, %v9381_v28  ;;  %v5273_v26 = vpop.f32.mrb[139].mxu1  ;;  %v6842_v41 = vld [vmem:[%s7215_s13 + $0x8] sm:$0xff]  }
 0x45c   : > { %v6784_v47 = vunpack.c.l.bf16 %v6842_v41 }
 0x45d   : > { %v5772_v45 = vadd.f32 %v9529_v42, %v5733_v34  ;;  %v5734_v5 = vadd.f32 %v9395_v11, %v5272_v16 }
 0x45f   : > { %v5868_v37 = vadd.f32 %v6780_v17, %v5772_v45  ;;  %v5773_v2 = vadd.f32 %v9529_v42, %v5734_v5 }
 0x460   : > { %v5276_v35 = vpop.f32.mrb[140].mxu1 }
 0x461   : > { %v6746_v28 = vpack.c.bf16 %v5868_v37, %v5868_v37  ;;  %v5869_v61 = vadd.f32 %v6781_v25, %v5773_v2  ;;  %v5277_v13 = vadd.f32 %v5276_v35, %v9386_v15  ;;  %v5278_v11 = vpop.f32.mrb[141].mxu1  ;;  %v6785_v15 = vunpack.c.h.bf16 %v6842_v41  ;;  %v6843_v35 = vld [vmem:[%s7215_s13 + $0x10] sm:$0xff]  }
 0x462   : > { %v5279_v16 = vpop.f32.mrb[142].mxu1 }
 0x463   : > { %6028 = vst.msk [vmem:[%s9541_s0] sm:$0xf] %vm966_vm4, %v6746_v28  ;;  %v6747_v5 = vpack.c.bf16 %v5869_v61, %v5869_v61  ;;  %v5735_v17 = vadd.f32 %v9399_v30, %v5277_v13  ;;  %v5280_v12 = vadd.f32 %v5279_v16, %v9391_v29  ;;  %v5281_v34 = vpop.f32.mrb[143].mxu1 }
 0x465   : > { %6029 = vst.msk [vmem:[%s9541_s0 + $0x4] sm:$0xf] %vm966_vm4, %v6747_v5  ;;  %v5774_v37 = vadd.f32 %v9529_v42, %v5735_v17  ;;  %v5736_v25 = vadd.f32 %v9406_v39, %v5280_v12  ;;  %v6788_v39 = vunpack.c.l.bf16 %v6843_v35 }
 0x467   : > { %v5870_v26 = vadd.f32 %v6784_v47, %v5774_v37  ;;  %v5775_v45 = vadd.f32 %v9529_v42, %v5736_v25  ;;  %v6844_v25 = vld [vmem:[%s7215_s13 + $0x18] sm:$0xff]  }
 0x468   : > { %v5284_v2 = vpop.f32.mrb[144].mxu1 }
 0x469   : > { %v6748_v28 = vpack.c.bf16 %v5870_v26, %v5870_v26  ;;  %v5871_v30 = vadd.f32 %v6785_v15, %v5775_v45  ;;  %v5285_v61 = vadd.f32 %v5284_v2, %v9397_v7  ;;  %v5286_v29 = vpop.f32.mrb[145].mxu1  ;;  %v6789_v7 = vunpack.c.h.bf16 %v6843_v35 }
 0x46a   : > { %v5287_v13 = vpop.f32.mrb[146].mxu1 }
 0x46b   : > { %6030 = vst.msk [vmem:[%s9541_s0 + $0x8] sm:$0xf] %vm966_vm4, %v6748_v28  ;;  %v6749_v11 = vpack.c.bf16 %v5871_v30, %v5871_v30  ;;  %v5737_v16 = vadd.f32 %v9410_v3, %v5285_v61  ;;  %v5288_v41 = vadd.f32 %v5287_v13, %v9402_v38  ;;  %v5289_v5 = vpop.f32.mrb[147].mxu1 }
 0x46d   : > { %6031 = vst.msk [vmem:[%s9541_s0 + $0xc] sm:$0xf] %vm966_vm4, %v6749_v11  ;;  %v5776_v17 = vadd.f32 %v9529_v42, %v5737_v16  ;;  %v5738_v47 = vadd.f32 %v9417_v56, %v5288_v41  ;;  %v6792_v56 = vunpack.c.l.bf16 %v6844_v25 }
 0x46f   : > { %v5872_v12 = vadd.f32 %v6788_v39, %v5776_v17  ;;  %v5777_v34 = vadd.f32 %v9529_v42, %v5738_v47  ;;  %v6845_v39 = vld [vmem:[%s7215_s13 + $0x20] sm:$0xff]  }
 0x470   : > { %v5292_v37 = vpop.f32.mrb[148].mxu1 }
 0x471   : > { %v6750_v15 = vpack.c.bf16 %v5872_v12, %v5872_v12  ;;  %v5873_v3 = vadd.f32 %v6789_v7, %v5777_v34  ;;  %v5293_v26 = vadd.f32 %v5292_v37, %v9408_v58  ;;  %v5294_v38 = vpop.f32.mrb[149].mxu1  ;;  %v6793_v58 = vunpack.c.h.bf16 %v6844_v25 }
 0x472   : > { %v5295_v45 = vpop.f32.mrb[150].mxu1  ;;  %v6846_v38 = vld [vmem:[%s7215_s13 + $0x28] sm:$0xff]  }
 0x473   : > { %6032 = vst.msk [vmem:[%s9541_s0 + $0x10] sm:$0xf] %vm966_vm4, %v6750_v15  ;;  %v6751_v2 = vpack.c.bf16 %v5873_v3, %v5873_v3  ;;  %v5739_v28 = vadd.f32 %v9421_v24, %v5293_v26  ;;  %v5296_v35 = vadd.f32 %v5295_v45, %v9413_v54  ;;  %v5297_v30 = vpop.f32.mrb[151].mxu1 }
 0x475   : > { %6033 = vst.msk [vmem:[%s9541_s0 + $0x14] sm:$0xf] %vm966_vm4, %v6751_v2  ;;  %v5778_v61 = vadd.f32 %v9529_v42, %v5739_v28  ;;  %v5740_v29 = vadd.f32 %v9428_v6, %v5296_v35  ;;  %v6796_v6 = vunpack.c.l.bf16 %v6845_v39 }
 0x477   : > { %v5874_v13 = vadd.f32 %v6792_v56, %v5778_v61  ;;  %v5779_v11 = vadd.f32 %v9529_v42, %v5740_v29 }
 0x478   : > { %v5300_v16 = vpop.f32.mrb[152].mxu1 }
 0x479   : > { %v6752_v41 = vpack.c.bf16 %v5874_v13, %v5874_v13  ;;  %v5875_v24 = vadd.f32 %v6793_v58, %v5779_v11  ;;  %v5301_v5 = vadd.f32 %v5300_v16, %v9419_v33  ;;  %v5302_v54 = vpop.f32.mrb[153].mxu1  ;;  %v6797_v33 = vunpack.c.h.bf16 %v6845_v39  ;;  %v6847_v39 = vld [vmem:[%s7215_s13 + $0x30] sm:$0xff]  }
 0x47a   : > { %v5303_v17 = vpop.f32.mrb[154].mxu1 }
 0x47b   : > { %6034 = vst.msk [vmem:[%s9541_s0 + $0x18] sm:$0xf] %vm966_vm4, %v6752_v41  ;;  %v6753_v47 = vpack.c.bf16 %v5875_v24, %v5875_v24  ;;  %v5741_v7 = vadd.f32 %v9432_v4, %v5301_v5  ;;  %v5304_v12 = vadd.f32 %v5303_v17, %v9424_v9  ;;  %v5305_v34 = vpop.f32.mrb[155].mxu1 }
 0x47d   : > { %6035 = vst.msk [vmem:[%s9541_s0 + $0x1c] sm:$0xf] %vm966_vm4, %v6753_v47  ;;  %v5780_v37 = vadd.f32 %v9529_v42, %v5741_v7  ;;  %v5742_v25 = vadd.f32 %v9439_v60, %v5304_v12  ;;  %v6800_v60 = vunpack.c.l.bf16 %v6846_v38 }
 0x47f   : > { %v5876_v15 = vadd.f32 %v6796_v6, %v5780_v37  ;;  %v5781_v3 = vadd.f32 %v9529_v42, %v5742_v25 }
 0x480   : > { %v5308_v26 = vpop.f32.mrb[156].mxu1 }
 0x481   : > { %v6754_v45 = vpack.c.bf16 %v5876_v15, %v5876_v15  ;;  %v5877_v4 = vadd.f32 %v6797_v33, %v5781_v3  ;;  %v5309_v2 = vadd.f32 %v5308_v26, %v9430_v8  ;;  %v5310_v9 = vpop.f32.mrb[157].mxu1  ;;  %v6801_v8 = vunpack.c.h.bf16 %v6846_v38  ;;  %v6848_v33 = vld [vmem:[%s7215_s13 + $0x38] sm:$0xff]  }
 0x482   : > { %v5311_v28 = vpop.f32.mrb[158].mxu1 }
 0x483   : > { %6036 = vst.msk [vmem:[%s9541_s0 + $0x20] sm:$0xf] %vm966_vm4, %v6754_v45  ;;  %v6755_v56 = vpack.c.bf16 %v5877_v4, %v5877_v4  ;;  %v5743_v35 = vadd.f32 %v9443_v50, %v5309_v2  ;;  %v5312_v30 = vadd.f32 %v5311_v28, %v9435_v0  ;;  %v5313_v61 = vpop.f32.mrb[159].mxu1 }
 0x485   : > { %6037 = vst.msk [vmem:[%s9541_s0 + $0x24] sm:$0xf] %vm966_vm4, %v6755_v56  ;;  %v5782_v29 = vadd.f32 %v9529_v42, %v5743_v35  ;;  %v5744_v58 = vadd.f32 %v9449_v43, %v5312_v30  ;;  %v6804_v43 = vunpack.c.l.bf16 %v6847_v39  ;;  %v6849_v30 = vld [vmem:[%s7215_s13 + $0x40] sm:$0xff]  }
 0x487   : > { %v5878_v13 = vadd.f32 %v6800_v60, %v5782_v29  ;;  %v5783_v11 = vadd.f32 %v9529_v42, %v5744_v58 }
 0x488   : > { %v5316_v16 = vpop.f32.mrb[160].mxu1 }
 0x489   : > { %v6756_v41 = vpack.c.bf16 %v5878_v13, %v5878_v13  ;;  %v5879_v50 = vadd.f32 %v6801_v8, %v5783_v11  ;;  %v5317_v24 = vadd.f32 %v5316_v16, %v9441_v46  ;;  %v5318_v0 = vpop.f32.mrb[161].mxu1  ;;  %v6805_v46 = vunpack.c.h.bf16 %v6847_v39 }
 0x48a   : > { %v5319_v5 = vpop.f32.mrb[162].mxu1 }
 0x48b   : > { %6038 = vst.msk [vmem:[%s9541_s0 + $0x28] sm:$0xf] %vm966_vm4, %v6756_v41  ;;  %v6757_v54 = vpack.c.bf16 %v5879_v50, %v5879_v50  ;;  %v5745_v17 = vadd.f32 %v9453_v59, %v5317_v24  ;;  %v5320_v47 = vadd.f32 %v5319_v5, %v9446_v52  ;;  %v5321_v7 = vpop.f32.mrb[163].mxu1  ;;  %v6850_v5 = vld [vmem:[%s7215_s13 + $0x48] sm:$0xff]  }
 0x48d   : > { %6039 = vst.msk [vmem:[%s9541_s0 + $0x2c] sm:$0xf] %vm966_vm4, %v6757_v54  ;;  %v5784_v6 = vadd.f32 %v9529_v42, %v5745_v17  ;;  %v5746_v12 = vadd.f32 %v9458_v55, %v5320_v47  ;;  %v6808_v55 = vunpack.c.l.bf16 %v6848_v33 }
 0x48f   : > { %v5880_v34 = vadd.f32 %v6804_v43, %v5784_v6  ;;  %v5785_v37 = vadd.f32 %v9529_v42, %v5746_v12 }
 0x490   : > { %v5324_v25 = vpop.f32.mrb[164].mxu1 }
 0x491   : > { %v6758_v15 = vpack.c.bf16 %v5880_v34, %v5880_v34  ;;  %v5881_v59 = vadd.f32 %v6805_v46, %v5785_v37  ;;  %v5325_v3 = vadd.f32 %v5324_v25, %v9451_v1  ;;  %v5326_v52 = vpop.f32.mrb[165].mxu1  ;;  %v6809_v1 = vunpack.c.h.bf16 %v6848_v33 }
 0x492   : > { %v5327_v26 = vpop.f32.mrb[166].mxu1 }
 0x493   : > { %6040 = vst.msk [vmem:[%s9541_s0 + $0x30] sm:$0xf] %vm966_vm4, %v6758_v15  ;;  %v6759_v38 = vpack.c.bf16 %v5881_v59, %v5881_v59  ;;  %v5747_v45 = vadd.f32 %v9462_v18, %v5325_v3  ;;  %v5328_v4 = vadd.f32 %v5327_v26, %v9456_v23  ;;  %v5329_v2 = vpop.f32.mrb[167].mxu1  ;;  %v6851_v15 = vld [vmem:[%s7215_s13 + $0x50] sm:$0xff]  }
 0x495   : > { %6041 = vst.msk [vmem:[%s9541_s0 + $0x34] sm:$0xf] %vm966_vm4, %v6759_v38  ;;  %v5786_v9 = vadd.f32 %v9529_v42, %v5747_v45  ;;  %v5748_v28 = vadd.f32 %v9466_v31, %v5328_v4  ;;  %v6812_v31 = vunpack.c.l.bf16 %v6849_v30 }
 0x497   : > { %v5882_v56 = vadd.f32 %v6808_v55, %v5786_v9  ;;  %v5787_v35 = vadd.f32 %v9529_v42, %v5748_v28 }
 0x498   : > { %v5332_v60 = vpop.f32.mrb[168].mxu1 }
 0x499   : > { %v6760_v61 = vpack.c.bf16 %v5882_v56, %v5882_v56  ;;  %v5883_v18 = vadd.f32 %v6809_v1, %v5787_v35  ;;  %v5333_v29 = vadd.f32 %v5332_v60, %v9460_v40  ;;  %v5334_v23 = vpop.f32.mrb[169].mxu1  ;;  %v6813_v40 = vunpack.c.h.bf16 %v6849_v30  ;;  %v6852_v56 = vld [vmem:[%s7215_s13 + $0x58] sm:$0xff]  }
 0x49a   : > { %v5335_v58 = vpop.f32.mrb[170].mxu1 }
 0x49b   : > { %6042 = vst.msk [vmem:[%s9541_s0 + $0x38] sm:$0xf] %vm966_vm4, %v6760_v61  ;;  %v6761_v8 = vpack.c.bf16 %v5883_v18, %v5883_v18  ;;  %v5749_v13 = vadd.f32 %v9470_v14, %v5333_v29  ;;  %v5336_v11 = vadd.f32 %v5335_v58, %v9464_v22  ;;  %v5337_v16 = vpop.f32.mrb[171].mxu1 }
 0x49c   : > { %v6853_v16 = vld [vmem:[%s7215_s13 + $0x60] sm:$0xff]  }
 0x49d   : > { %6043 = vst.msk [vmem:[%s9541_s0 + $0x3c] sm:$0xf] %vm966_vm4, %v6761_v8  ;;  %v5788_v39 = vadd.f32 %v9529_v42, %v5749_v13  ;;  %v5750_v41 = vadd.f32 %v9474_v44, %v5336_v11  ;;  %v6816_v44 = vunpack.c.l.bf16 %v6850_v5 }
 0x49f   : > { %v5884_v50 = vadd.f32 %v6812_v31, %v5788_v39  ;;  %v5789_v24 = vadd.f32 %v9529_v42, %v5750_v41 }
 0x4a0   : > { %v5340_v0 = vpop.f32.mrb[172].mxu1 }
 0x4a1   : > { %v6762_v54 = vpack.c.bf16 %v5884_v50, %v5884_v50  ;;  %v5885_v14 = vadd.f32 %v6813_v40, %v5789_v24  ;;  %v5341_v17 = vadd.f32 %v5340_v0, %v9468_v48  ;;  %v5342_v22 = vpop.f32.mrb[173].mxu1  ;;  %v6817_v48 = vunpack.c.h.bf16 %v6850_v5  ;;  %v9753_v0 = vld [vmem:[#allocation7_spill] sm:$0xff] }
 0x4a2   : > { %v5343_v43 = vpop.f32.mrb[174].mxu1 }
 0x4a3   : > { %6044 = vst.msk [vmem:[%s9541_s0 + $0x40] sm:$0xf] %vm966_vm4, %v6762_v54  ;;  %v6763_v47 = vpack.c.bf16 %v5885_v14, %v5885_v14  ;;  %v5751_v7 = vadd.f32 %v9478_v10, %v5341_v17  ;;  %v5344_v6 = vadd.f32 %v5343_v43, %v9472_v49  ;;  %v5345_v12 = vpop.f32.mrb[175].mxu1  ;;  %v9754_v17 = vld [vmem:[#allocation10_spill] sm:$0xff] }
 0x4a4   : > { %v9755_v12 = vld [vmem:[#allocation8_spill] sm:$0xff] }
 0x4a5   : > { %6045 = vst.msk [vmem:[%s9541_s0 + $0x44] sm:$0xf] %vm966_vm4, %v6763_v47  ;;  %v5790_v46 = vadd.f32 %v9529_v42, %v5751_v7  ;;  %v5752_v34 = vadd.f32 %v9482_v19, %v5344_v6  ;;  %v6820_v19 = vunpack.c.l.bf16 %v6851_v15 }
 0x4a7   : > { %v5886_v37 = vadd.f32 %v6816_v44, %v5790_v46  ;;  %v5791_v25 = vadd.f32 %v9529_v42, %v5752_v34  ;;  %v6854_v44 = vld [vmem:[%s7215_s13 + $0x68] sm:$0xff]  }
 0x4a8   : > { %v5348_v33 = vpop.f32.mrb[176].mxu1 }
 0x4a9   : > { %v6764_v59 = vpack.c.bf16 %v5886_v37, %v5886_v37  ;;  %v5887_v10 = vadd.f32 %v6817_v48, %v5791_v25  ;;  %v5349_v3 = vadd.f32 %v5348_v33, %v9476_v53  ;;  %v5350_v49 = vpop.f32.mrb[177].mxu1  ;;  %v6821_v53 = vunpack.c.h.bf16 %v6851_v15  ;;  %v9756_v25 = vld [vmem:[#allocation12_spill] sm:$0xff] }
 0x4aa   : > { %v5351_v52 = vpop.f32.mrb[178].mxu1  ;;  %v6832_v15 = vunpack.c.l.bf16 %v6854_v44 }
 0x4ab   : > { %6046 = vst.msk [vmem:[%s9541_s0 + $0x48] sm:$0xf] %vm966_vm4, %v6764_v59  ;;  %v6765_v26 = vpack.c.bf16 %v5887_v10, %v5887_v10  ;;  %v5753_v38 = vadd.f32 %v9486_v51, %v5349_v3  ;;  %v5352_v45 = vadd.f32 %v5351_v52, %v9480_v63  ;;  %v5353_v55 = vpop.f32.mrb[179].mxu1  ;;  %v9757_v59 = vld [vmem:[#allocation9_spill] sm:$0xff]  ;;  %v9758_v52 = vld [vmem:[#allocation14_spill] sm:$0xff] }
 0x4ad   : > { %6047 = vst.msk [vmem:[%s9541_s0 + $0x4c] sm:$0xf] %vm966_vm4, %v6765_v26  ;;  %v5792_v4 = vadd.f32 %v9529_v42, %v5753_v38  ;;  %v5754_v2 = vadd.f32 %v9490_v57, %v5352_v45  ;;  %v6824_v57 = vunpack.c.l.bf16 %v6852_v56  ;;  %v6833_v38 = vunpack.c.h.bf16 %v6854_v44 }
 0x4af   : > { %v5888_v9 = vadd.f32 %v6820_v19, %v5792_v4  ;;  %v5793_v28 = vadd.f32 %v9529_v42, %v5754_v2  ;;  %v6855_v4 = vld [vmem:[%s7215_s13 + $0x70] sm:$0xff]  }
 0x4b0   : > { %v5356_v1 = vpop.f32.mrb[180].mxu1 }
 0x4b1   : > { %v6766_v35 = vpack.c.bf16 %v5888_v9, %v5888_v9  ;;  %v5889_v51 = vadd.f32 %v6821_v53, %v5793_v28  ;;  %v5357_v60 = vadd.f32 %v5356_v1, %v9484_v36  ;;  %v5358_v63 = vpop.f32.mrb[181].mxu1  ;;  %v6825_v36 = vunpack.c.h.bf16 %v6852_v56  ;;  %v9759_v9 = vld [vmem:[#allocation11_spill] sm:$0xff] }
 0x4b2   : > { %v5359_v30 = vpop.f32.mrb[182].mxu1  ;;  %v6836_v63 = vunpack.c.l.bf16 %v6855_v4 }
 0x4b3   : > { %6048 = vst.msk [vmem:[%s9541_s0 + $0x50] sm:$0xf] %vm966_vm4, %v6766_v35  ;;  %v6767_v61 = vpack.c.bf16 %v5889_v51, %v5889_v51  ;;  %v5755_v18 = vadd.f32 %v9494_v32, %v5357_v60  ;;  %v5360_v29 = vadd.f32 %v5359_v30, %v9488_v27  ;;  %v5361_v23 = vpop.f32.mrb[183].mxu1  ;;  %v9760_v51 = vld [vmem:[#allocation16_spill] sm:$0xff]  ;;  %v9761_v30 = vld [vmem:[#allocation13_spill] sm:$0xff] }
 0x4b5   : > { %6049 = vst.msk [vmem:[%s9541_s0 + $0x54] sm:$0xf] %vm966_vm4, %v6767_v61  ;;  %v5794_v58 = vadd.f32 %v9529_v42, %v5755_v18  ;;  %v5756_v8 = vadd.f32 %v9498_v21, %v5360_v29  ;;  %v6828_v21 = vunpack.c.l.bf16 %v6853_v16  ;;  %v9762_v29 = vld [vmem:[#allocation18_spill] sm:$0xff] }
 0x4b7   : > { %v5890_v13 = vadd.f32 %v6824_v57, %v5794_v58  ;;  %v5795_v31 = vadd.f32 %v9529_v42, %v5756_v8  ;;  %v6837_v58 = vunpack.c.h.bf16 %v6855_v4 }
 0x4b8   : > { %v5364_v11 = vpop.f32.mrb[184].mxu1 }
 0x4b9   : > { %v6768_v39 = vpack.c.bf16 %v5890_v13, %v5890_v13  ;;  %v5891_v32 = vadd.f32 %v6825_v36, %v5795_v31  ;;  %v5365_v41 = vadd.f32 %v5364_v11, %v9492_v62  ;;  %v5366_v27 = vpop.f32.mrb[185].mxu1  ;;  %v6829_v62 = vunpack.c.h.bf16 %v6853_v16  ;;  %v9763_v16 = vld [vmem:[#allocation15_spill] sm:$0xff] }
 0x4ba   : > { %v5367_v40 = vpop.f32.mrb[186].mxu1 }
 0x4bb   : > { %6050 = vst.msk [vmem:[%s9541_s0 + $0x58] sm:$0xf] %vm966_vm4, %v6768_v39  ;;  %v6769_v50 = vpack.c.bf16 %v5891_v32, %v5891_v32  ;;  %v5757_v24 = vadd.f32 %v9502_v20, %v5365_v41  ;;  %v5368_v5 = vadd.f32 %v5367_v40, %v9753_v0  ;;  %v5369_v54 = vpop.f32.mrb[187].mxu1  ;;  %v9764_v40 = vld [vmem:[#allocation17_spill] sm:$0xff] }
 0x4bd   : > { %6051 = vst.msk [vmem:[%s9541_s0 + $0x5c] sm:$0xf] %vm966_vm4, %v6769_v50  ;;  %v5796_v14 = vadd.f32 %v9529_v42, %v5757_v24  ;;  %v5758_v22 = vadd.f32 %v9754_v17, %v5368_v5 }
 0x4bf   : > { %v5892_v43 = vadd.f32 %v6828_v21, %v5796_v14  ;;  %v5797_v47 = vadd.f32 %v9529_v42, %v5758_v22  ;;  %v6856_v21 = vld [vmem:[%s7215_s13 + $0x78] sm:$0xff]  }
 0x4c0   : > { %v5372_v7 = vpop.f32.mrb[188].mxu1  ;;  %v6840_v54 = vunpack.c.l.bf16 %v6856_v21 }
 0x4c1   : > { %v6770_v6 = vpack.c.bf16 %v5892_v43, %v5892_v43  ;;  %v5893_v20 = vadd.f32 %v6829_v62, %v5797_v47  ;;  %v5373_v46 = vadd.f32 %v5372_v7, %v9755_v12  ;;  %v5374_v34 = vpop.f32.mrb[189].mxu1  ;;  %v6841_v43 = vunpack.c.h.bf16 %v6856_v21 }
 0x4c2   : > { %v5375_v48 = vpop.f32.mrb[190].mxu1 }
 0x4c3   : > { %6052 = vst.msk [vmem:[%s9541_s0 + $0x60] sm:$0xf] %vm966_vm4, %v6770_v6  ;;  %v6771_v37 = vpack.c.bf16 %v5893_v20, %v5893_v20  ;;  %v5759_v33 = vadd.f32 %v9756_v25, %v5373_v46  ;;  %v5376_v10 = vadd.f32 %v5375_v48, %v9757_v59  ;;  %v5377_v3 = vpop.f32.mrb[191].mxu1 }
 0x4c5   : > { %6053 = vst.msk [vmem:[%s9541_s0 + $0x64] sm:$0xf] %vm966_vm4, %v6771_v37  ;;  %v5798_v49 = vadd.f32 %v9529_v42, %v5759_v33  ;;  %v5760_v26 = vadd.f32 %v9758_v52, %v5376_v10 }
 0x4c7   : > { %v5894_v19 = vadd.f32 %v6832_v15, %v5798_v49  ;;  %v5799_v45 = vadd.f32 %v9529_v42, %v5760_v26 }
 0x4c8   : > { %v5380_v55 = vpop.f32.mrb[192].mxu1 }
 0x4c9   : > { %v6772_v2 = vpack.c.bf16 %v5894_v19, %v5894_v19  ;;  %v5895_v53 = vadd.f32 %v6833_v38, %v5799_v45  ;;  %v5381_v28 = vadd.f32 %v5380_v55, %v9759_v9  ;;  %v5382_v1 = vpop.f32.mrb[193].mxu1 }
 0x4ca   : > { %v5383_v56 = vpop.f32.mrb[194].mxu1 }
 0x4cb   : > { %6054 = vst.msk [vmem:[%s9541_s0 + $0x68] sm:$0xf] %vm966_vm4, %v6772_v2  ;;  %v6773_v35 = vpack.c.bf16 %v5895_v53, %v5895_v53  ;;  %v5761_v60 = vadd.f32 %v9760_v51, %v5381_v28  ;;  %v5384_v61 = vadd.f32 %v5383_v56, %v9761_v30  ;;  %v5385_v18 = vpop.f32.mrb[195].mxu1 }
 0x4cd   : > { %6055 = vst.msk [vmem:[%s9541_s0 + $0x6c] sm:$0xf] %vm966_vm4, %v6773_v35  ;;  %v5800_v57 = vadd.f32 %v9529_v42, %v5761_v60  ;;  %v5762_v23 = vadd.f32 %v9762_v29, %v5384_v61 }
 0x4cf   : > { %v5896_v8 = vadd.f32 %v6836_v63, %v5800_v57  ;;  %v5801_v36 = vadd.f32 %v9529_v42, %v5762_v23 }
 0x4d0   : > { %v5388_v13 = vpop.f32.mrb[196].mxu1 }
 0x4d1   : > { %v6774_v31 = vpack.c.bf16 %v5896_v8, %v5896_v8  ;;  %v5897_v11 = vadd.f32 %v6837_v58, %v5801_v36  ;;  %v5389_v39 = vadd.f32 %v5388_v13, %v9763_v16  ;;  %v5390_v32 = vpop.f32.mrb[197].mxu1 }
 0x4d2   : > { %v5391_v41 = vpop.f32.mrb[198].mxu1 }
 0x4d3   : > { %6056 = vst.msk [vmem:[%s9541_s0 + $0x70] sm:$0xf] %vm966_vm4, %v6774_v31  ;;  %v6775_v27 = vpack.c.bf16 %v5897_v11, %v5897_v11  ;;  %v5392_v50 = vadd.f32 %v5391_v41, %v9764_v40  ;;  %v5393_v24 = vpop.f32.mrb[199].mxu1 }
 0x4d5   : > { %6057 = vst.msk [vmem:[%s9541_s0 + $0x74] sm:$0xf] %vm966_vm4, %v6775_v27 }
 0x4d8   : > { %v5726_v0 = vpop.f32.mrb[200].mxu1 }
 0x4d9   : > { %v5763_v5 = vadd.f32 %v5726_v0, %v5389_v39  ;;  %v5728_v14 = vpop.f32.mrb[201].mxu1 }
 0x4da   : > { %v5729_v17 = vpop.f32.mrb[202].mxu1 }
 0x4db   : > { %v5802_v22 = vadd.f32 %v9529_v42, %v5763_v5  ;;  %v5764_v62 = vadd.f32 %v5729_v17, %v5392_v50  ;;  %v5731_v47 = vpop.f32.mrb[203].mxu1 }
 0x4dd   : > { %v5898_v7 = vadd.f32 %v6840_v54, %v5802_v22  ;;  %v5803_v44 = vadd.f32 %v9529_v42, %v5764_v62 }
 0x4df   : > { %v6776_v6 = vpack.c.bf16 %v5898_v7, %v5898_v7  ;;  %v5899_v20 = vadd.f32 %v6841_v43, %v5803_v44 }
 0x4e1   : > { %6058 = vst.msk [vmem:[%s9541_s0 + $0x78] sm:$0xf] %vm966_vm4, %v6776_v6  ;;  %v6777_v12 = vpack.c.bf16 %v5899_v20, %v5899_v20 }
 0x4e3   : > { %6059 = vst.msk [vmem:[%s9541_s0 + $0x7c] sm:$0xf] %vm966_vm4, %v6777_v12 }
 0x4e4 PF: > { %s19_s29 = sadd.s32 1, %s7092_s29   ;;  %s9765_s27 = smov %s7088_s28 }
 0x4e5   : > { %p16_p5 = scmp.ge.s32.totalorder %s19_s29, 4   ;;  %s9766_s28 = smov %s9768_s7 }
 0x4e7   :  { %18 = sbr.rel (!%p16_p5) target bundleno = 2 (0x2), region = 116 }

</bundles_post_ra>
